<compile_context>
chip_gen: v7x
topology: tpu7x:2x2x1
jax: 0.10.0
libtpu: 0.0.40
codegen_flags: <defaults>
</compile_context>

<pallas_src>
import jax
import jax.numpy as jnp
from jax import lax
from jax.experimental import pallas as pl
from jax.experimental.pallas import tpu as pltpu


# ----------------------------------------------------------------------------
# Fused kernel: one grid step == one LSTM layer; FC head on the last step.
# Gate order follows PyTorch nn.LSTM: [i, f, g, o].
# ----------------------------------------------------------------------------
def _make_kernel(T, Bp, H, Dp, n_layers):
    def kernel(x_ref, wih_ref, whh_ref, bias_ref, w1_ref, b1_ref, w2_ref, b2_ref,
               o_ref, gx_scr, seq_scr):
        l = pl.program_id(0)

        # ---- hoisted input projection: one big matmul per layer, bias folded in ----
        @pl.when(l == 0)
        def _():
            gx_scr[...] = (
                jnp.dot(x_ref[...], wih_ref[...],
                        preferred_element_type=jnp.float32)
                + bias_ref[...]
            )

        @pl.when(l > 0)
        def _():
            gx_scr[...] = (
                jnp.dot(seq_scr[...].astype(jnp.bfloat16), wih_ref[:H, :],
                        preferred_element_type=jnp.float32)
                + bias_ref[...]
            )

        # ---- sequential recurrence: only h @ W_hh on the critical path ----
        def step(t, carry):
            h, c = carry
            row = pl.multiple_of(t * Bp, Bp)
            gates = gx_scr[pl.ds(row, Bp), :] + jnp.dot(
                h.astype(jnp.bfloat16), whh_ref[...],
                preferred_element_type=jnp.float32)
            i_g = jax.nn.sigmoid(gates[:, 0 * H:1 * H])
            f_g = jax.nn.sigmoid(gates[:, 1 * H:2 * H])
            g_g = jnp.tanh(gates[:, 2 * H:3 * H])
            o_g = jax.nn.sigmoid(gates[:, 3 * H:4 * H])
            c = f_g * c + i_g * g_g
            h = o_g * jnp.tanh(c)
            seq_scr[pl.ds(row, Bp), :] = h        # stays in VMEM (next layer's input)
            return h, c

        z = jnp.zeros((Bp, H), jnp.float32)
        h, _c = lax.fori_loop(0, T, step, (z, z))
        # after the last layer's loop, h == RNN_out[:, -1, :]

        # ---- fc1 -> ReLU -> dropout (eval: identity) -> fc2, only on last layer ----
        @pl.when(l == n_layers - 1)
        def _():
            fc = jnp.dot(h.astype(jnp.bfloat16), w1_ref[...],
                         preferred_element_type=jnp.float32) + b1_ref[...]
            fc = jnp.maximum(fc, 0.0)
            out = jnp.dot(fc.astype(jnp.bfloat16), w2_ref[...],
                          preferred_element_type=jnp.float32) + b2_ref[...]
            o_ref[...] = out.astype(o_ref.dtype)

    return kernel


# ----------------------------------------------------------------------------
# DecoderRNN forward (single fused Pallas call, grid over LSTM layers)
# ----------------------------------------------------------------------------
def decoder_rnn_forward(params, x_rnn):
    """x_rnn: (B, T, CNN_embed_dim), batch-first like PyTorch. Returns (B, num_classes)."""
    B, T, D = x_rnn.shape
    lstm = params["lstm"]
    n_layers = len(lstm)
    H = lstm[0]["w_hh_t"].shape[0]
    FC = params["w1_t"].shape[1]
    C = params["w2_t"].shape[1]

    # Lane/sublane-aligned padding (inert: zero rows/cols, sliced off afterwards).
    Bp = max(8, ((B + 7) // 8) * 8)
    Dp = ((max(D, H) + 127) // 128) * 128
    Cp = ((C + 127) // 128) * 128

    # Time-major, padded, bf16 input: row = t*Bp + b.
    x_t = jnp.transpose(x_rnn, (1, 0, 2)).astype(jnp.float32)           # (T, B, D)
    x_t = jnp.pad(x_t, ((0, 0), (0, Bp - B), (0, Dp - D)))              # (T, Bp, Dp)
    x_flat = x_t.reshape(T * Bp, Dp).astype(jnp.bfloat16)

    # Stacked per-layer LSTM weights (bf16 MXU operands; bias kept f32).
    wih_all = jnp.stack([
        jnp.pad(layer["w_ih_t"], ((0, Dp - layer["w_ih_t"].shape[0]), (0, 0)))
        for layer in lstm]).astype(jnp.bfloat16)                         # (L, Dp, 4H)
    whh_all = jnp.stack([layer["w_hh_t"] for layer in lstm]).astype(jnp.bfloat16)  # (L, H, 4H)
    bias_all = jnp.stack([layer["bias"] for layer in lstm]).astype(jnp.float32)    # (L, 1, 4H)

    w1 = params["w1_t"].astype(jnp.bfloat16)                             # (H, FC)
    b1 = params["b1"].astype(jnp.float32)                                # (1, FC)
    w2 = jnp.pad(params["w2_t"], ((0, 0), (0, Cp - C))).astype(jnp.bfloat16)   # (FC, Cp)
    b2 = jnp.pad(params["b2"], ((0, 0), (0, Cp - C))).astype(jnp.float32)      # (1, Cp)

    grid_spec = pltpu.PrefetchScalarGridSpec(
        num_scalar_prefetch=0,
        grid=(n_layers,),
        in_specs=[
            pl.BlockSpec((T * Bp, Dp), lambda l: (0, 0)),        # x (resident)
            pl.BlockSpec((None, Dp, 4 * H), lambda l: (l, 0, 0)),  # W_ih, prefetched per layer
            pl.BlockSpec((None, H, 4 * H), lambda l: (l, 0, 0)),   # W_hh, prefetched per layer
            pl.BlockSpec((None, 1, 4 * H), lambda l: (l, 0, 0)),   # fused bias
            pl.BlockSpec((H, FC), lambda l: (0, 0)),             # fc1 weight (resident)
            pl.BlockSpec((1, FC), lambda l: (0, 0)),             # fc1 bias
            pl.BlockSpec((FC, Cp), lambda l: (0, 0)),            # fc2 weight (resident)
            pl.BlockSpec((1, Cp), lambda l: (0, 0)),             # fc2 bias
        ],
        out_specs=pl.BlockSpec((Bp, Cp), lambda l: (0, 0)),      # logits (written on last layer)
        scratch_shapes=[
            pltpu.VMEM((T * Bp, 4 * H), jnp.float32),            # hoisted gate projections
            pltpu.VMEM((T * Bp, H), jnp.float32),                # current layer's hidden sequence
        ],
    )
    # Layers are sequentially dependent -> "arbitrary".  (On v7x a batch-tile axis
    # marked "parallel" would engage the second TensorCore at larger serving batch.)
    out_pad = pl.pallas_call(
        _make_kernel(T=T, Bp=Bp, H=H, Dp=Dp, n_layers=n_layers),
        out_shape=jax.ShapeDtypeStruct((Bp, Cp), jnp.float32),
        grid_spec=grid_spec,
        compiler_params=pltpu.CompilerParams(dimension_semantics=("arbitrary",)),
    )(x_flat, wih_all, whh_all, bias_all, w1, b1, w2, b2)
    return out_pad[:B, :C]


# ----------------------------------------------------------------------------
# Pure-JAX reference (PyTorch semantics, f32) for correctness check
# ----------------------------------------------------------------------------
def decoder_rnn_reference(params, x_rnn):
    x = jnp.transpose(x_rnn, (1, 0, 2)).astype(jnp.float32)  # (T, B, D)
    B = x.shape[1]
    for layer in params["lstm"]:
        H = layer["w_hh_t"].shape[0]

        def step(carry, x_t, layer=layer, H=H):
            h, c = carry
            gates = x_t @ layer["w_ih_t"] + h @ layer["w_hh_t"] + layer["bias"]
            i = jax.nn.sigmoid(gates[:, 0 * H:1 * H])
            f = jax.nn.sigmoid(gates[:, 1 * H:2 * H])
            g = jnp.tanh(gates[:, 2 * H:3 * H])
            o = jax.nn.sigmoid(gates[:, 3 * H:4 * H])
            c = f * c + i * g
            h = o * jnp.tanh(c)
            return (h, c), h

        init = (jnp.zeros((B, H), jnp.float32), jnp.zeros((B, H), jnp.float32))
        _, x = lax.scan(step, init, x)
    last = x[-1]
    h = jnp.maximum(last @ params["w1_t"] + params["b1"], 0.0)
    return h @ params["w2_t"] + params["b2"]


# ----------------------------------------------------------------------------
# Deterministic parameter init (shapes per DecoderRNN.__init__)
# ----------------------------------------------------------------------------
def init_params(key, cnn_embed_dim=300, h_rnn_layers=3, h_rnn=256, h_fc_dim=128,
                num_classes=2):
    keys = jax.random.split(key, 4 * h_rnn_layers + 4)
    k = iter(keys)
    scale = 1.0 / jnp.sqrt(h_rnn)
    lstm = []
    for layer in range(h_rnn_layers):
        d_in = cnn_embed_dim if layer == 0 else h_rnn
        w_ih = jax.random.uniform(next(k), (4 * h_rnn, d_in), jnp.float32, -scale, scale)
        w_hh = jax.random.uniform(next(k), (4 * h_rnn, h_rnn), jnp.float32, -scale, scale)
        b_ih = jax.random.uniform(next(k), (4 * h_rnn,), jnp.float32, -scale, scale)
        b_hh = jax.random.uniform(next(k), (4 * h_rnn,), jnp.float32, -scale, scale)
        lstm.append({
            "w_ih_t": w_ih.T,                               # (d_in, 4H)
            "w_hh_t": w_hh.T,                               # (H, 4H)
            "bias": (b_ih + b_hh).reshape(1, 4 * h_rnn),    # (1, 4H)  (b_ih + b_hh fused)
        })
    w1 = jax.random.uniform(next(k), (h_fc_dim, h_rnn), jnp.float32,
                            -1.0 / jnp.sqrt(h_rnn), 1.0 / jnp.sqrt(h_rnn))
    b1 = jax.random.uniform(next(k), (h_fc_dim,), jnp.float32, -0.05, 0.05)
    w2 = jax.random.uniform(next(k), (num_classes, h_fc_dim), jnp.float32,
                            -1.0 / jnp.sqrt(h_fc_dim), 1.0 / jnp.sqrt(h_fc_dim))
    b2 = jax.random.uniform(next(k), (num_classes,), jnp.float32, -0.05, 0.05)
    return {
        "lstm": lstm,
        "w1_t": w1.T, "b1": b1.reshape(1, h_fc_dim),
        "w2_t": w2.T, "b2": b2.reshape(1, num_classes),
    }


if __name__ == "__main__":
    B, T, D = 2, 8, 300          # batch, time_steps, CNN_embed_dim
    key = jax.random.PRNGKey(0)
    pkey, xkey = jax.random.split(key)

    params = init_params(pkey, cnn_embed_dim=D)
    x_rnn = jax.random.normal(xkey, (B, T, D), jnp.float32)

    out = jax.jit(decoder_rnn_forward)(params, x_rnn)
    out = jax.block_until_ready(out)

    ref = decoder_rnn_reference(params, x_rnn)
    assert out.shape == (B, 2), out.shape
    # bf16 MXU operands (f32 accumulation/state) -> slightly looser tolerance vs f32 ref.
    assert jnp.allclose(out, ref, atol=3e-2, rtol=3e-2), (out, ref)

    print("KERNEL_OK")
</pallas_src>

<mosaic_0001>
module attributes {stable_mosaic.version = 11 : i64} {
  func.func @kernel(%arg0: i32, %arg1: memref<64x384xbf16, #tpu.memory_space<vmem>>, %arg2: memref<1x384x1024xbf16, #tpu.memory_space<vmem>>, %arg3: memref<1x256x1024xbf16, #tpu.memory_space<vmem>>, %arg4: memref<1x1x1024xf32, #tpu.memory_space<vmem>>, %arg5: memref<256x128xbf16, #tpu.memory_space<vmem>>, %arg6: memref<1x128xf32, #tpu.memory_space<vmem>>, %arg7: memref<128x128xbf16, #tpu.memory_space<vmem>>, %arg8: memref<1x128xf32, #tpu.memory_space<vmem>>, %arg9: memref<8x128xf32, #tpu.memory_space<vmem>>, %arg10: memref<64x1024xf32, #tpu.memory_space<vmem>>, %arg11: memref<64x256xf32, #tpu.memory_space<vmem>>) attributes {dimension_semantics = [#tpu.dimension_semantics<arbitrary>], iteration_bounds = array<i64: 3>, scalar_prefetch = 0 : i64, scratch_operands = 2 : i64, tpu.core_type = #tpu.core_type<tc>, window_params = [{pipeline_mode = #tpu.pipeline_mode<synchronous>, transform_indices = @transform_0, window_bounds = array<i64: 64, 384>}, {transform_indices = @transform_1, window_bounds = array<i64: 1, 384, 1024>}, {transform_indices = @transform_2, window_bounds = array<i64: 1, 256, 1024>}, {transform_indices = @transform_3, window_bounds = array<i64: 1, 1, 1024>}, {pipeline_mode = #tpu.pipeline_mode<synchronous>, transform_indices = @transform_4, window_bounds = array<i64: 256, 128>}, {pipeline_mode = #tpu.pipeline_mode<synchronous>, transform_indices = @transform_5, window_bounds = array<i64: 1, 128>}, {pipeline_mode = #tpu.pipeline_mode<synchronous>, transform_indices = @transform_6, window_bounds = array<i64: 128, 128>}, {pipeline_mode = #tpu.pipeline_mode<synchronous>, transform_indices = @transform_7, window_bounds = array<i64: 1, 128>}, {pipeline_mode = #tpu.pipeline_mode<synchronous>, transform_indices = @transform_8, window_bounds = array<i64: 8, 128>}]} {
    %c0_i32 = arith.constant 0 : i32
    %0 = arith.cmpi eq, %arg0, %c0_i32 : i32
    %1 = arith.extui %0 : i1 to i32
    %c0_i32_0 = arith.constant 0 : i32
    %2 = arith.cmpi ne, %1, %c0_i32_0 : i32
    scf.if %2 {
      %c0 = arith.constant 0 : index
      %c0_6 = arith.constant 0 : index
      %12 = vector.load %arg1[%c0, %c0_6] : memref<64x384xbf16, #tpu.memory_space<vmem>>, vector<64x384xbf16>
      %c0_7 = arith.constant 0 : index
      %c0_8 = arith.constant 0 : index
      %c0_9 = arith.constant 0 : index
      %13 = vector.load %arg2[%c0_7, %c0_8, %c0_9] : memref<1x384x1024xbf16, #tpu.memory_space<vmem>>, vector<1x384x1024xbf16>
      %14 = vector.shape_cast %13 : vector<1x384x1024xbf16> to vector<384x1024xbf16>
      %cst_10 = arith.constant dense<0.000000e+00> : vector<64x1024xf32>
      %15 = tpu.matmul %12, %14, %cst_10 {dimension_numbers = #tpu.dot_dimension_numbers<[1], [0], [0], [1], [0, 0, 1, 1], [], []>} : vector<64x384xbf16>, vector<384x1024xbf16>, vector<64x1024xf32> -> vector<64x1024xf32>
      %c0_11 = arith.constant 0 : index
      %c0_12 = arith.constant 0 : index
      %c0_13 = arith.constant 0 : index
      %16 = vector.load %arg4[%c0_11, %c0_12, %c0_13] : memref<1x1x1024xf32, #tpu.memory_space<vmem>>, vector<1x1x1024xf32>
      %17 = vector.shape_cast %16 : vector<1x1x1024xf32> to vector<1x1024xf32>
      %18 = vector.broadcast %17 : vector<1x1024xf32> to vector<64x1024xf32>
      %19 = arith.addf %15, %18 : vector<64x1024xf32>
      %c0_14 = arith.constant 0 : index
      %c0_15 = arith.constant 0 : index
      %20 = vector.load %arg10[%c0_14, %c0_15] : memref<64x1024xf32, #tpu.memory_space<vmem>>, vector<64x1024xf32>
      tpu.vector_store %arg10[%c0_14, %c0_15], %19 {strides = array<i32>} : memref<64x1024xf32, #tpu.memory_space<vmem>>, vector<64x1024xf32>,
    } else {
    }
    %c0_i32_1 = arith.constant 0 : i32
    %3 = arith.cmpi sgt, %arg0, %c0_i32_1 : i32
    %4 = arith.extui %3 : i1 to i32
    %c0_i32_2 = arith.constant 0 : i32
    %5 = arith.cmpi ne, %4, %c0_i32_2 : i32
    scf.if %5 {
      %c0 = arith.constant 0 : index
      %c0_6 = arith.constant 0 : index
      %12 = vector.load %arg11[%c0, %c0_6] : memref<64x256xf32, #tpu.memory_space<vmem>>, vector<64x256xf32>
      %13 = arith.truncf %12 : vector<64x256xf32> to vector<64x256xbf16>
      %c0_7 = arith.constant 0 : index
      %c0_8 = arith.constant 0 : index
      %c0_9 = arith.constant 0 : index
      %14 = vector.load %arg2[%c0_7, %c0_8, %c0_9] : memref<1x384x1024xbf16, #tpu.memory_space<vmem>>, vector<1x256x1024xbf16>
      %15 = vector.shape_cast %14 : vector<1x256x1024xbf16> to vector<256x1024xbf16>
      %cst_10 = arith.constant dense<0.000000e+00> : vector<64x1024xf32>
      %16 = tpu.matmul %13, %15, %cst_10 {dimension_numbers = #tpu.dot_dimension_numbers<[1], [0], [0], [1], [0, 0, 1, 1], [], []>} : vector<64x256xbf16>, vector<256x1024xbf16>, vector<64x1024xf32> -> vector<64x1024xf32>
      %c0_11 = arith.constant 0 : index
      %c0_12 = arith.constant 0 : index
      %c0_13 = arith.constant 0 : index
      %17 = vector.load %arg4[%c0_11, %c0_12, %c0_13] : memref<1x1x1024xf32, #tpu.memory_space<vmem>>, vector<1x1x1024xf32>
      %18 = vector.shape_cast %17 : vector<1x1x1024xf32> to vector<1x1024xf32>
      %19 = vector.broadcast %18 : vector<1x1024xf32> to vector<64x1024xf32>
      %20 = arith.addf %16, %19 : vector<64x1024xf32>
      %c0_14 = arith.constant 0 : index
      %c0_15 = arith.constant 0 : index
      %21 = vector.load %arg10[%c0_14, %c0_15] : memref<64x1024xf32, #tpu.memory_space<vmem>>, vector<64x1024xf32>
      tpu.vector_store %arg10[%c0_14, %c0_15], %20 {strides = array<i32>} : memref<64x1024xf32, #tpu.memory_space<vmem>>, vector<64x1024xf32>,
    } else {
    }
    %cst = arith.constant 0.000000e+00 : f32
    %6 = vector.broadcast %cst : f32 to vector<8x256xf32>
    %c0_i32_3 = arith.constant 0 : i32
    %c8_i32 = arith.constant 8 : i32
    %7 = arith.addi %c0_i32_3, %c8_i32 : i32
    %c1_i32 = arith.constant 1 : i32
    %8:2 = scf.for %arg12 = %c0_i32_3 to %7 step %c1_i32 iter_args(%arg13 = %6, %arg14 = %6) -> (vector<8x256xf32>, vector<8x256xf32>)  : i32 {
      %c8_i32_6 = arith.constant 8 : i32
      %12 = arith.muli %arg12, %c8_i32_6 : i32
      %13 = tpu.assume_multiple %12, 8 : i32
      %14 = arith.index_cast %13 : i32 to index
      %c0 = arith.constant 0 : index
      %15 = vector.load %arg10[%14, %c0] : memref<64x1024xf32, #tpu.memory_space<vmem>>, vector<8x1024xf32>
      %16 = arith.truncf %arg13 : vector<8x256xf32> to vector<8x256xbf16>
      %c0_7 = arith.constant 0 : index
      %c0_8 = arith.constant 0 : index
      %c0_9 = arith.constant 0 : index
      %17 = vector.load %arg3[%c0_7, %c0_8, %c0_9] : memref<1x256x1024xbf16, #tpu.memory_space<vmem>>, vector<1x256x1024xbf16>
      %18 = vector.shape_cast %17 : vector<1x256x1024xbf16> to vector<256x1024xbf16>
      %cst_10 = arith.constant dense<0.000000e+00> : vector<8x1024xf32>
      %19 = tpu.matmul %16, %18, %cst_10 {dimension_numbers = #tpu.dot_dimension_numbers<[1], [0], [0], [1], [0, 0, 1, 1], [], []>} : vector<8x256xbf16>, vector<256x1024xbf16>, vector<8x1024xf32> -> vector<8x1024xf32>
      %20 = arith.addf %15, %19 : vector<8x1024xf32>
      %21 = vector.extract_strided_slice %20 {offsets = [0, 0], sizes = [8, 256], strides = [1, 1]} : vector<8x1024xf32> to vector<8x256xf32>
      %22 = arith.negf %21 : vector<8x256xf32>
      %23 = math.exp %22 : vector<8x256xf32>
      %cst_11 = arith.constant 1.000000e+00 : f32
      %24 = vector.broadcast %cst_11 : f32 to vector<8x256xf32>
      %25 = arith.addf %24, %23 : vector<8x256xf32>
      %26 = arith.divf %24, %25 : vector<8x256xf32>
      %27 = vector.extract_strided_slice %20 {offsets = [0, 256], sizes = [8, 256], strides = [1, 1]} : vector<8x1024xf32> to vector<8x256xf32>
      %28 = arith.negf %27 : vector<8x256xf32>
      %29 = math.exp %28 : vector<8x256xf32>
      %cst_12 = arith.constant 1.000000e+00 : f32
      %30 = vector.broadcast %cst_12 : f32 to vector<8x256xf32>
      %31 = arith.addf %30, %29 : vector<8x256xf32>
      %32 = arith.divf %30, %31 : vector<8x256xf32>
      %33 = vector.extract_strided_slice %20 {offsets = [0, 512], sizes = [8, 256], strides = [1, 1]} : vector<8x1024xf32> to vector<8x256xf32>
      %34 = math.tanh %33 : vector<8x256xf32>
      %35 = vector.extract_strided_slice %20 {offsets = [0, 768], sizes = [8, 256], strides = [1, 1]} : vector<8x1024xf32> to vector<8x256xf32>
      %36 = arith.negf %35 : vector<8x256xf32>
      %37 = math.exp %36 : vector<8x256xf32>
      %cst_13 = arith.constant 1.000000e+00 : f32
      %38 = vector.broadcast %cst_13 : f32 to vector<8x256xf32>
      %39 = arith.addf %38, %37 : vector<8x256xf32>
      %40 = arith.divf %38, %39 : vector<8x256xf32>
      %41 = arith.mulf %32, %arg14 : vector<8x256xf32>
      %42 = arith.mulf %26, %34 : vector<8x256xf32>
      %43 = arith.addf %41, %42 : vector<8x256xf32>
      %44 = math.tanh %43 : vector<8x256xf32>
      %45 = arith.mulf %40, %44 : vector<8x256xf32>
      %46 = arith.index_cast %13 : i32 to index
      %c0_14 = arith.constant 0 : index
      %47 = vector.load %arg11[%46, %c0_14] : memref<64x256xf32, #tpu.memory_space<vmem>>, vector<8x256xf32>
      tpu.vector_store %arg11[%46, %c0_14], %45 {strides = array<i32>} : memref<64x256xf32, #tpu.memory_space<vmem>>, vector<8x256xf32>,
      scf.yield %45, %43 : vector<8x256xf32>, vector<8x256xf32>
    }
    %c8_i32_4 = arith.constant 8 : i32
    %c2_i32 = arith.constant 2 : i32
    %9 = arith.cmpi eq, %arg0, %c2_i32 : i32
    %10 = arith.extui %9 : i1 to i32
    %c0_i32_5 = arith.constant 0 : i32
    %11 = arith.cmpi ne, %10, %c0_i32_5 : i32
    scf.if %11 {
      %12 = arith.truncf %8#0 : vector<8x256xf32> to vector<8x256xbf16>
      %c0 = arith.constant 0 : index
      %c0_6 = arith.constant 0 : index
      %13 = vector.load %arg5[%c0, %c0_6] : memref<256x128xbf16, #tpu.memory_space<vmem>>, vector<256x128xbf16>
      %cst_7 = arith.constant dense<0.000000e+00> : vector<8x128xf32>
      %14 = tpu.matmul %12, %13, %cst_7 {dimension_numbers = #tpu.dot_dimension_numbers<[1], [0], [0], [1], [0, 0, 1, 1], [], []>} : vector<8x256xbf16>, vector<256x128xbf16>, vector<8x128xf32> -> vector<8x128xf32>
      %c0_8 = arith.constant 0 : index
      %c0_9 = arith.constant 0 : index
      %15 = vector.load %arg6[%c0_8, %c0_9] : memref<1x128xf32, #tpu.memory_space<vmem>>, vector<1x128xf32>
      %16 = vector.broadcast %15 : vector<1x128xf32> to vector<8x128xf32>
      %17 = arith.addf %14, %16 : vector<8x128xf32>
      %cst_10 = arith.constant 0.000000e+00 : f32
      %18 = vector.broadcast %cst_10 : f32 to vector<8x128xf32>
      %19 = arith.maximumf %17, %18 : vector<8x128xf32>
      %20 = arith.truncf %19 : vector<8x128xf32> to vector<8x128xbf16>
      %c0_11 = arith.constant 0 : index
      %c0_12 = arith.constant 0 : index
      %21 = vector.load %arg7[%c0_11, %c0_12] : memref<128x128xbf16, #tpu.memory_space<vmem>>, vector<128x128xbf16>
      %cst_13 = arith.constant dense<0.000000e+00> : vector<8x128xf32>
      %22 = tpu.matmul %20, %21, %cst_13 {dimension_numbers = #tpu.dot_dimension_numbers<[1], [0], [0], [1], [0, 0, 1, 1], [], []>} : vector<8x128xbf16>, vector<128x128xbf16>, vector<8x128xf32> -> vector<8x128xf32>
      %c0_14 = arith.constant 0 : index
      %c0_15 = arith.constant 0 : index
      %23 = vector.load %arg8[%c0_14, %c0_15] : memref<1x128xf32, #tpu.memory_space<vmem>>, vector<1x128xf32>
      %24 = vector.broadcast %23 : vector<1x128xf32> to vector<8x128xf32>
      %25 = arith.addf %22, %24 : vector<8x128xf32>
      %c0_16 = arith.constant 0 : index
      %c0_17 = arith.constant 0 : index
      %26 = vector.load %arg9[%c0_16, %c0_17] : memref<8x128xf32, #tpu.memory_space<vmem>>, vector<8x128xf32>
      tpu.vector_store %arg9[%c0_16, %c0_17], %25 {strides = array<i32>} : memref<8x128xf32, #tpu.memory_space<vmem>>, vector<8x128xf32>,
    } else {
    }
    return
  }
  func.func @transform_0(%arg0: i32) -> (i32, i32) {
    %c0_i32 = arith.constant 0 : i32
    %c0_i32_0 = arith.constant 0 : i32
    %c0_i32_1 = arith.constant 0 : i32
    return %c0_i32, %c0_i32_0 : i32, i32
  }
  func.func @transform_1(%arg0: i32) -> (i32, i32, i32) {
    %c0_i32 = arith.constant 0 : i32
    %c0_i32_0 = arith.constant 0 : i32
    %c0_i32_1 = arith.constant 0 : i32
    return %arg0, %c0_i32, %c0_i32_0 : i32, i32, i32
  }
  func.func @transform_2(%arg0: i32) -> (i32, i32, i32) {
    %c0_i32 = arith.constant 0 : i32
    %c0_i32_0 = arith.constant 0 : i32
    %c0_i32_1 = arith.constant 0 : i32
    return %arg0, %c0_i32, %c0_i32_0 : i32, i32, i32
  }
  func.func @transform_3(%arg0: i32) -> (i32, i32, i32) {
    %c0_i32 = arith.constant 0 : i32
    %c0_i32_0 = arith.constant 0 : i32
    %c0_i32_1 = arith.constant 0 : i32
    return %arg0, %c0_i32, %c0_i32_0 : i32, i32, i32
  }
  func.func @transform_4(%arg0: i32) -> (i32, i32) {
    %c0_i32 = arith.constant 0 : i32
    %c0_i32_0 = arith.constant 0 : i32
    %c0_i32_1 = arith.constant 0 : i32
    return %c0_i32, %c0_i32_0 : i32, i32
  }
  func.func @transform_5(%arg0: i32) -> (i32, i32) {
    %c0_i32 = arith.constant 0 : i32
    %c0_i32_0 = arith.constant 0 : i32
    %c0_i32_1 = arith.constant 0 : i32
    return %c0_i32, %c0_i32_0 : i32, i32
  }
  func.func @transform_6(%arg0: i32) -> (i32, i32) {
    %c0_i32 = arith.constant 0 : i32
    %c0_i32_0 = arith.constant 0 : i32
    %c0_i32_1 = arith.constant 0 : i32
    return %c0_i32, %c0_i32_0 : i32, i32
  }
  func.func @transform_7(%arg0: i32) -> (i32, i32) {
    %c0_i32 = arith.constant 0 : i32
    %c0_i32_0 = arith.constant 0 : i32
    %c0_i32_1 = arith.constant 0 : i32
    return %c0_i32, %c0_i32_0 : i32, i32
  }
  func.func @transform_8(%arg0: i32) -> (i32, i32) {
    %c0_i32 = arith.constant 0 : i32
    %c0_i32_0 = arith.constant 0 : i32
    %c0_i32_1 = arith.constant 0 : i32
    return %c0_i32, %c0_i32_0 : i32, i32
  }
}

</mosaic_0001>

<bundles_post_ra>
// kernel: decoder_rnn_forward.1
= control target key start
LH: loop header
LB: loop body
LE: loop exit
PB: predicated region body
PF: predicated region fallthrough
CT: control target
= control target key end

     0   :  { %s5748_s27 = smov 0   ;;  %s6755_s0 = inlined_call_operand.vmem [shape: bf16[64,384], index: 0, kind: input, shape index: {}]   ;;  %s6756_s1 = inlined_call_operand.vmem [shape: bf16[3,384,1024], index: 1, kind: input, shape index: {}]   ;;  %s6757_s2 = inlined_call_operand.vmem [shape: bf16[3,256,1024], index: 2, kind: input, shape index: {}]   ;;  %s6758_s3 = inlined_call_operand.vmem [shape: f32[3,1,1024], index: 3, kind: input, shape index: {}]   ;;  %s6759_s4 = inlined_call_operand.vmem [shape: bf16[256,128], index: 4, kind: input, shape index: {}]   ;;  %s6760_s5 = inlined_call_operand.vmem [shape: f32[1,128], index: 5, kind: input, shape index: {}]   ;;  %s6761_s6 = inlined_call_operand.vmem [shape: bf16[128,128], index: 6, kind: input, shape index: {}]   ;;  %s6762_s7 = inlined_call_operand.vmem [shape: f32[1,128], index: 7, kind: input, shape index: {}]   ;;  %s6763_s8 = inlined_call_operand.vmem [shape: f32[8,128], index: 8, kind: output, shape index: {}]  }
   0x1 LB: > { %s5754_s28 = sadd.s32 4294967295, %s5678_s27   ;;  %p4839_p0 = scmp.ge.s32.totalorder %s5678_s27, 1  ;;  %s5678_s27 = sphi %s5748_s27, %s18_s27  }
   0x2   : > { %p276_p1 = scmp.lt.s32.totalorder %s5678_s27, 4 }
   0x4   : > { %p277_p2 = pnand %p4839_p0, %p276_p1 }
   0x5   : > { %p314_p3 = scmp.lt.s32.totalorder (!%p277_p2), %s5754_s28, 2  ;;  %p4844_p4 = scmp.ne.s32.totalorder (!%p277_p2), %s5754_s28, 0 }
   0x6   : > { %280 = sbr.rel (%p277_p2) target bundleno = 1679 (0x68f), region = 52 }
   0xd   : > { %s315_s29 = scalar_select %p314_p3, %s5754_s28, 2 }
   0xe   : > { %332 = sbr.rel (%p4844_p4) target bundleno = 456 (0x1c8), region = 56  ;;  %v5809_v56 = vld [vmem:[%s6755_s0 + $0x4] ss:$12 sps:$4 sm:$0xff] (!%p4844_p4)  }
   0xf   : > { %s5528_s30 = smul.u32 1536, %s315_s29  ;;  %s5346_s9 = sshll.u32 %s315_s29, 10  ;;  %1639 = vmatprep.mubr.bf16.mxu0 (!%p4844_p4), %v5809_v56  ;;  %1785 = vmatprep.mubr.bf16.mxu1 (!%p4844_p4), %v5809_v56 }
  0x10   : > { %s5763_s12 = scalar_lea.vmem %s6757_s2, %s5346_s9  ;;  %s4843_s13 = sshll.u32 %s315_s29, 3 }
  0x11   : > { %s5768_s16 = scalar_lea.vmem %s6756_s1, %s5528_s30  ;;  %s5773_s19 = scalar_lea.vmem %s6758_s3, %s4843_s13 }
  0x12   : > { %v349_v0 = vld [vmem:[%s5768_s16] sm:$0xff] (!%p4844_p4)  ;;  %v350_v2 = vld [vmem:[%s5768_s16 + $0x8] sm:$0xff] (!%p4844_p4) }
  0x13   : > { %v353_v1 = vld [vmem:[%s5768_s16 + $0x20] sm:$0xff] (!%p4844_p4)  ;;  %v354_v4 = vld [vmem:[%s5768_s16 + $0x28] sm:$0xff] (!%p4844_p4) }
  0x14   : > { %v4858_v3 = vcombine.high (!%p4844_p4), %v349_v0, %v353_v1  ;;  %v4857_v5 = vcombine.low (!%p4844_p4), %v349_v0, %v353_v1  ;;  %v357_v6 = vld [vmem:[%s5768_s16 + $0x40] sm:$0xff] (!%p4844_p4)  ;;  %v4860_v8 = vcombine.high (!%p4844_p4), %v350_v2, %v354_v4  ;;  %v4859_v9 = vcombine.low (!%p4844_p4), %v350_v2, %v354_v4  ;;  %v358_v11 = vld [vmem:[%s5768_s16 + $0x48] sm:$0xff] (!%p4844_p4) }
  0x15   : > { %v361_v7 = vld [vmem:[%s5768_s16 + $0x60] sm:$0xff]  ;;  %v362_v12 = vld [vmem:[%s5768_s16 + $0x68] sm:$0xff] }
  0x16   : > { %v4866_v10 = vcombine.high %v357_v6, %v361_v7  ;;  %v365_v13 = vld [vmem:[%s5768_s16 + $0x80] sm:$0xff]  ;;  %1607 = vmatprep.subr.bf16.mxu0 %v4858_v3  ;;  %v4868_v14 = vcombine.high %v358_v11, %v362_v12  ;;  %v366_v16 = vld [vmem:[%s5768_s16 + $0x88] sm:$0xff]  ;;  %1753 = vmatprep.subr.bf16.mxu1 %v4860_v8  ;;  %v4865_v18 = vcombine.low %v357_v6, %v361_v7 }
  0x17   : > { %v369_v15 = vld [vmem:[%s5768_s16 + $0xa0] sm:$0xff]  ;;  %v370_v17 = vld [vmem:[%s5768_s16 + $0xa8] sm:$0xff]  ;;  %1608 = vmatpush1.bf16.msra.mxu0 %v4857_v5  ;;  %1754 = vmatpush1.bf16.msra.mxu1 %v4859_v9  ;;  %v4867_v19 = vcombine.low %v358_v11, %v362_v12 }
  0x18   : > { %1609 = vmatprep.subr.bf16.mxu0 %v4866_v10  ;;  %v4874_v20 = vcombine.high %v365_v13, %v369_v15  ;;  %1755 = vmatprep.subr.bf16.mxu1 %v4868_v14  ;;  %v4876_v21 = vcombine.high %v366_v16, %v370_v17  ;;  %v373_v22 = vld [vmem:[%s5768_s16 + $0xc0] sm:$0xff]  ;;  %v374_v24 = vld [vmem:[%s5768_s16 + $0xc8] sm:$0xff]  ;;  %v4873_v26 = vcombine.low %v365_v13, %v369_v15 }
  0x19   : > { %v377_v23 = vld [vmem:[%s5768_s16 + $0xe0] sm:$0xff]  ;;  %v378_v25 = vld [vmem:[%s5768_s16 + $0xe8] sm:$0xff]  ;;  %v4875_v27 = vcombine.low %v366_v16, %v370_v17 }
  0x1a   : > { %v4882_v28 = vcombine.high %v373_v22, %v377_v23  ;;  %v4884_v29 = vcombine.high %v374_v24, %v378_v25  ;;  %v381_v30 = vld [vmem:[%s5768_s16 + $0x100] sm:$0xff]  ;;  %v382_v32 = vld [vmem:[%s5768_s16 + $0x108] sm:$0xff]  ;;  %v4881_v34 = vcombine.low %v373_v22, %v377_v23  ;;  %v4883_v35 = vcombine.low %v374_v24, %v378_v25 }
  0x1b   : > { %1610 = vmatpush1.bf16.msra.mxu0 %v4865_v18  ;;  %1756 = vmatpush1.bf16.msra.mxu1 %v4867_v19  ;;  %v385_v31 = vld [vmem:[%s5768_s16 + $0x120] sm:$0xff]  ;;  %v386_v33 = vld [vmem:[%s5768_s16 + $0x128] sm:$0xff] }
  0x1c   : > { %1611 = vmatprep.subr.bf16.mxu0 %v4874_v20  ;;  %1757 = vmatprep.subr.bf16.mxu1 %v4876_v21  ;;  %v4890_v36 = vcombine.high %v381_v30, %v385_v31  ;;  %v4892_v37 = vcombine.high %v382_v32, %v386_v33  ;;  %v389_v38 = vld [vmem:[%s5768_s16 + $0x140] sm:$0xff]  ;;  %v390_v40 = vld [vmem:[%s5768_s16 + $0x148] sm:$0xff]  ;;  %v4889_v42 = vcombine.low %v381_v30, %v385_v31 }
  0x1d   : > { %v393_v39 = vld [vmem:[%s5768_s16 + $0x160] sm:$0xff]  ;;  %v394_v41 = vld [vmem:[%s5768_s16 + $0x168] sm:$0xff]  ;;  %v4891_v43 = vcombine.low %v382_v32, %v386_v33 }
  0x1e   : > { %v4898_v44 = vcombine.high %v389_v38, %v393_v39  ;;  %v4900_v45 = vcombine.high %v390_v40, %v394_v41  ;;  %v397_v46 = vld [vmem:[%s5768_s16 + $0x180] sm:$0xff]  ;;  %v398_v48 = vld [vmem:[%s5768_s16 + $0x188] sm:$0xff]  ;;  %v4897_v50 = vcombine.low %v389_v38, %v393_v39  ;;  %v4899_v51 = vcombine.low %v390_v40, %v394_v41 }
  0x1f   : > { %1612 = vmatpush1.bf16.msra.mxu0 %v4873_v26  ;;  %1758 = vmatpush1.bf16.msra.mxu1 %v4875_v27  ;;  %v401_v47 = vld [vmem:[%s5768_s16 + $0x1a0] sm:$0xff]  ;;  %v402_v49 = vld [vmem:[%s5768_s16 + $0x1a8] sm:$0xff] }
  0x20   : > { %1613 = vmatprep.subr.bf16.mxu0 %v4882_v28  ;;  %1759 = vmatprep.subr.bf16.mxu1 %v4884_v29  ;;  %v4906_v52 = vcombine.high %v397_v46, %v401_v47  ;;  %v4908_v53 = vcombine.high %v398_v48, %v402_v49  ;;  %v405_v54 = vld [vmem:[%s5768_s16 + $0x1c0] sm:$0xff]  ;;  %v406_v57 = vld [vmem:[%s5768_s16 + $0x1c8] sm:$0xff]  ;;  %v4905_v59 = vcombine.low %v397_v46, %v401_v47 }
  0x21   : > { %v409_v55 = vld [vmem:[%s5768_s16 + $0x1e0] sm:$0xff]  ;;  %v410_v58 = vld [vmem:[%s5768_s16 + $0x1e8] sm:$0xff]  ;;  %v4907_v60 = vcombine.low %v398_v48, %v402_v49 }
  0x22   : > { %v4914_v61 = vcombine.high %v405_v54, %v409_v55  ;;  %v4916_v62 = vcombine.high %v406_v57, %v410_v58  ;;  %v413_v63 = vld [vmem:[%s5768_s16 + $0x200] sm:$0xff]  ;;  %v414_v1 = vld [vmem:[%s5768_s16 + $0x208] sm:$0xff]  ;;  %v4913_v3 = vcombine.low %v405_v54, %v409_v55  ;;  %v4915_v4 = vcombine.low %v406_v57, %v410_v58 }
  0x23   : > { %1614 = vmatpush1.bf16.msra.mxu0 %v4881_v34  ;;  %1760 = vmatpush1.bf16.msra.mxu1 %v4883_v35  ;;  %v417_v0 = vld [vmem:[%s5768_s16 + $0x220] sm:$0xff]  ;;  %v418_v2 = vld [vmem:[%s5768_s16 + $0x228] sm:$0xff] }
  0x24   : > { %1615 = vmatprep.subr.bf16.mxu0 %v4890_v36  ;;  %1761 = vmatprep.subr.bf16.mxu1 %v4892_v37  ;;  %v4922_v5 = vcombine.high %v413_v63, %v417_v0  ;;  %v4924_v6 = vcombine.high %v414_v1, %v418_v2  ;;  %v421_v7 = vld [vmem:[%s5768_s16 + $0x240] sm:$0xff]  ;;  %v422_v9 = vld [vmem:[%s5768_s16 + $0x248] sm:$0xff]  ;;  %v4921_v11 = vcombine.low %v413_v63, %v417_v0 }
  0x25   : > { %v425_v8 = vld [vmem:[%s5768_s16 + $0x260] sm:$0xff]  ;;  %v426_v10 = vld [vmem:[%s5768_s16 + $0x268] sm:$0xff]  ;;  %v4923_v12 = vcombine.low %v414_v1, %v418_v2 }
  0x26   : > { %v4930_v13 = vcombine.high %v421_v7, %v425_v8  ;;  %v4932_v14 = vcombine.high %v422_v9, %v426_v10  ;;  %v429_v15 = vld [vmem:[%s5768_s16 + $0x280] sm:$0xff]  ;;  %v430_v17 = vld [vmem:[%s5768_s16 + $0x288] sm:$0xff]  ;;  %v4929_v19 = vcombine.low %v421_v7, %v425_v8  ;;  %v4931_v20 = vcombine.low %v422_v9, %v426_v10 }
  0x27   : > { %1616 = vmatpush1.bf16.msra.mxu0 %v4889_v42  ;;  %1762 = vmatpush1.bf16.msra.mxu1 %v4891_v43  ;;  %v433_v16 = vld [vmem:[%s5768_s16 + $0x2a0] sm:$0xff]  ;;  %v434_v18 = vld [vmem:[%s5768_s16 + $0x2a8] sm:$0xff] }
  0x28   : > { %1617 = vmatprep.subr.bf16.mxu0 %v4898_v44  ;;  %1763 = vmatprep.subr.bf16.mxu1 %v4900_v45  ;;  %v4938_v21 = vcombine.high %v429_v15, %v433_v16  ;;  %v4940_v22 = vcombine.high %v430_v17, %v434_v18  ;;  %v437_v23 = vld [vmem:[%s5768_s16 + $0x2c0] sm:$0xff]  ;;  %v438_v25 = vld [vmem:[%s5768_s16 + $0x2c8] sm:$0xff]  ;;  %v4937_v27 = vcombine.low %v429_v15, %v433_v16 }
  0x29   : > { %v441_v24 = vld [vmem:[%s5768_s16 + $0x2e0] sm:$0xff]  ;;  %v442_v26 = vld [vmem:[%s5768_s16 + $0x2e8] sm:$0xff]  ;;  %v4939_v28 = vcombine.low %v430_v17, %v434_v18 }
  0x2a   : > { %v4946_v29 = vcombine.high %v437_v23, %v441_v24  ;;  %v4948_v30 = vcombine.high %v438_v25, %v442_v26  ;;  %v445_v31 = vld [vmem:[%s5768_s16 + $0x300] sm:$0xff]  ;;  %v446_v33 = vld [vmem:[%s5768_s16 + $0x308] sm:$0xff]  ;;  %v4945_v35 = vcombine.low %v437_v23, %v441_v24  ;;  %v4947_v36 = vcombine.low %v438_v25, %v442_v26 }
  0x2b   : > { %1618 = vmatpush1.bf16.msra.mxu0 %v4897_v50  ;;  %1764 = vmatpush1.bf16.msra.mxu1 %v4899_v51  ;;  %v449_v32 = vld [vmem:[%s5768_s16 + $0x320] sm:$0xff]  ;;  %v450_v34 = vld [vmem:[%s5768_s16 + $0x328] sm:$0xff] }
  0x2c   : > { %1619 = vmatprep.subr.bf16.mxu0 %v4906_v52  ;;  %1765 = vmatprep.subr.bf16.mxu1 %v4908_v53  ;;  %v4954_v37 = vcombine.high %v445_v31, %v449_v32  ;;  %v4956_v38 = vcombine.high %v446_v33, %v450_v34  ;;  %v453_v39 = vld [vmem:[%s5768_s16 + $0x340] sm:$0xff]  ;;  %v454_v41 = vld [vmem:[%s5768_s16 + $0x348] sm:$0xff]  ;;  %v4953_v43 = vcombine.low %v445_v31, %v449_v32 }
  0x2d   : > { %v457_v40 = vld [vmem:[%s5768_s16 + $0x360] sm:$0xff]  ;;  %v458_v42 = vld [vmem:[%s5768_s16 + $0x368] sm:$0xff]  ;;  %v4955_v44 = vcombine.low %v446_v33, %v450_v34 }
  0x2e   : > { %v4962_v45 = vcombine.high %v453_v39, %v457_v40  ;;  %v4964_v46 = vcombine.high %v454_v41, %v458_v42  ;;  %v461_v47 = vld [vmem:[%s5768_s16 + $0x380] sm:$0xff]  ;;  %v462_v49 = vld [vmem:[%s5768_s16 + $0x388] sm:$0xff]  ;;  %v4961_v51 = vcombine.low %v453_v39, %v457_v40  ;;  %v4963_v52 = vcombine.low %v454_v41, %v458_v42 }
  0x2f   : > { %1620 = vmatpush1.bf16.msra.mxu0 %v4905_v59  ;;  %1766 = vmatpush1.bf16.msra.mxu1 %v4907_v60  ;;  %v465_v48 = vld [vmem:[%s5768_s16 + $0x3a0] sm:$0xff]  ;;  %v466_v50 = vld [vmem:[%s5768_s16 + $0x3a8] sm:$0xff] }
  0x30   : > { %1621 = vmatprep.subr.bf16.mxu0 %v4914_v61  ;;  %1767 = vmatprep.subr.bf16.mxu1 %v4916_v62  ;;  %v4970_v53 = vcombine.high %v461_v47, %v465_v48  ;;  %v4972_v54 = vcombine.high %v462_v49, %v466_v50  ;;  %v469_v55 = vld [vmem:[%s5768_s16 + $0x3c0] sm:$0xff]  ;;  %v470_v58 = vld [vmem:[%s5768_s16 + $0x3c8] sm:$0xff]  ;;  %v4969_v60 = vcombine.low %v461_v47, %v465_v48 }
  0x31   : > { %v473_v57 = vld [vmem:[%s5768_s16 + $0x3e0] sm:$0xff]  ;;  %v474_v59 = vld [vmem:[%s5768_s16 + $0x3e8] sm:$0xff]  ;;  %v4971_v61 = vcombine.low %v462_v49, %v466_v50 }
  0x32   : > { %v4978_v62 = vcombine.high %v469_v55, %v473_v57  ;;  %v4980_v63 = vcombine.high %v470_v58, %v474_v59  ;;  %v477_v0 = vld [vmem:[%s5768_s16 + $0x400] sm:$0xff]  ;;  %v478_v2 = vld [vmem:[%s5768_s16 + $0x408] sm:$0xff] }
  0x33   : > { %1622 = vmatpush1.bf16.msra.mxu0 %v4913_v3  ;;  %1768 = vmatpush1.bf16.msra.mxu1 %v4915_v4  ;;  %v481_v1 = vld [vmem:[%s5768_s16 + $0x420] sm:$0xff]  ;;  %v482_v3 = vld [vmem:[%s5768_s16 + $0x428] sm:$0xff]  ;;  %v4977_v4 = vcombine.low %v469_v55, %v473_v57 }
  0x34   : > { %1623 = vmatprep.subr.bf16.mxu0 %v4922_v5  ;;  %1769 = vmatprep.subr.bf16.mxu1 %v4924_v6  ;;  %v4979_v5 = vcombine.low %v470_v58, %v474_v59  ;;  %v4986_v6 = vcombine.high %v477_v0, %v481_v1  ;;  %v4988_v7 = vcombine.high %v478_v2, %v482_v3  ;;  %v485_v8 = vld [vmem:[%s5768_s16 + $0x440] sm:$0xff]  ;;  %v5863_v17 = vld [vmem:[%s6755_s0 + $0x1c] ss:$12 sps:$4 sm:$0xff]  }
  0x35   : > { %v489_v9 = vld [vmem:[%s5768_s16 + $0x460] sm:$0xff]  ;;  %v514_v39 = vld [vmem:[%s5768_s16 + $0x528] sm:$0xff] }
  0x36   : > { %v5856_v10 = vld [vmem:[%s6755_s0] ss:$12 sps:$4 sm:$0xff]   ;;  %v4994_v15 = vcombine.high %v485_v8, %v489_v9 }
  0x37   : > { %1624 = vmatpush1.bf16.msra.mxu0 %v4921_v11  ;;  %1770 = vmatpush1.bf16.msra.mxu1 %v4923_v12  ;;  %v486_v11 = vld [vmem:[%s5768_s16 + $0x448] sm:$0xff]  ;;  %v493_v18 = vld [vmem:[%s5768_s16 + $0x480] sm:$0xff] }
  0x38   : > { %1625 = vmatprep.subr.bf16.mxu0 %v4930_v13  ;;  %1771 = vmatprep.subr.bf16.mxu1 %v4932_v14  ;;  %v490_v12 = vld [vmem:[%s5768_s16 + $0x468] sm:$0xff]  ;;  %v4985_v13 = vcombine.low %v477_v0, %v481_v1  ;;  %v4987_v14 = vcombine.low %v478_v2, %v482_v3  ;;  %v501_v26 = vld [vmem:[%s5768_s16 + $0x4c0] sm:$0xff] }
  0x39   : > { %v4996_v16 = vcombine.high %v486_v11, %v490_v12  ;;  %v4995_v23 = vcombine.low %v486_v11, %v490_v12  ;;  %v518_v47 = vld [vmem:[%s5768_s16 + $0x548] sm:$0xff]  ;;  %v529_v55 = vld [vmem:[%s5768_s16 + $0x5a0] sm:$0xff]  ;;  %v352_v11 = vld [vmem:[%s5768_s16 + $0x18] sm:$0xff] }
  0x3a   : > { %v522_v48 = vld [vmem:[%s5768_s16 + $0x568] sm:$0xff]  ;;  %v537_v0 = vld [vmem:[%s5768_s16 + $0x5e0] sm:$0xff]  ;;  %v356_v12 = vld [vmem:[%s5768_s16 + $0x38] sm:$0xff] }
  0x3b   : > { %1626 = vmatpush1.bf16.msra.mxu0 %v4929_v19  ;;  %1772 = vmatpush1.bf16.msra.mxu1 %v4931_v20  ;;  %v497_v19 = vld [vmem:[%s5768_s16 + $0x4a0] sm:$0xff]  ;;  %v494_v20 = vld [vmem:[%s5768_s16 + $0x488] sm:$0xff] }
  0x3c   : > { %1627 = vmatprep.subr.bf16.mxu0 %v4938_v21  ;;  %1773 = vmatprep.subr.bf16.mxu1 %v4940_v22  ;;  %v498_v21 = vld [vmem:[%s5768_s16 + $0x4a8] sm:$0xff]  ;;  %v4993_v22 = vcombine.low %v485_v8, %v489_v9  ;;  %v5002_v24 = vcombine.high %v493_v18, %v497_v19  ;;  %v5001_v31 = vcombine.low %v493_v18, %v497_v19  ;;  %v351_v8 = vld [vmem:[%s5768_s16 + $0x10] sm:$0xff] }
  0x3d   : > { %v5004_v25 = vcombine.high %v494_v20, %v498_v21  ;;  %v5003_v32 = vcombine.low %v494_v20, %v498_v21  ;;  %v526_v57 = vld [vmem:[%s5768_s16 + $0x588] sm:$0xff]  ;;  %v355_v9 = vld [vmem:[%s5768_s16 + $0x30] sm:$0xff]  ;;  %v4864_v18 = vcombine.high %v352_v11, %v356_v12 }
  0x3e   : > { %v530_v58 = vld [vmem:[%s5768_s16 + $0x5a8] sm:$0xff]  ;;  %v359_v19 = vld [vmem:[%s5768_s16 + $0x50] sm:$0xff] }
  0x3f   : > { %1628 = vmatpush1.bf16.msra.mxu0 %v4937_v27  ;;  %1774 = vmatpush1.bf16.msra.mxu1 %v4939_v28  ;;  %v505_v27 = vld [vmem:[%s5768_s16 + $0x4e0] sm:$0xff]  ;;  %v5922_v1 = vld [vmem:[%s6755_s0 + $0x48] ss:$12 sps:$4 sm:$0xff]  }
  0x40   : > { %1629 = vmatprep.subr.bf16.mxu0 %v4946_v29  ;;  %1775 = vmatprep.subr.bf16.mxu1 %v4948_v30  ;;  %v5878_v28 = vld [vmem:[%s6755_s0 + $0x18] ss:$12 sps:$4 sm:$0xff]   ;;  %v502_v29 = vld [vmem:[%s5768_s16 + $0x4c8] sm:$0xff]  ;;  %v5010_v33 = vcombine.high %v501_v26, %v505_v27  ;;  %v5009_v40 = vcombine.low %v501_v26, %v505_v27  ;;  %v363_v20 = vld [vmem:[%s5768_s16 + $0x70] sm:$0xff] }
  0x41   : > { %v506_v30 = vld [vmem:[%s5768_s16 + $0x4e8] sm:$0xff]  ;;  %v4870_v26 = vcombine.high %v359_v19, %v363_v20 }
  0x42   : > { %v5012_v34 = vcombine.high %v502_v29, %v506_v30  ;;  %v5011_v41 = vcombine.low %v502_v29, %v506_v30  ;;  %v534_v2 = vld [vmem:[%s5768_s16 + $0x5c8] sm:$0xff]  ;;  %v367_v29 = vld [vmem:[%s5768_s16 + $0x90] sm:$0xff] }
  0x43   : > { %1630 = vmatpush1.bf16.msra.mxu0 %v4945_v35  ;;  %1776 = vmatpush1.bf16.msra.mxu1 %v4947_v36  ;;  %v5885_v35 = vld [vmem:[%s6755_s0 + $0x34] ss:$12 sps:$4 sm:$0xff]   ;;  %v538_v3 = vld [vmem:[%s5768_s16 + $0x5e8] sm:$0xff] }
  0x44   : > { %1631 = vmatprep.subr.bf16.mxu0 %v4954_v37  ;;  %1777 = vmatprep.subr.bf16.mxu1 %v4956_v38  ;;  %v509_v36 = vld [vmem:[%s5768_s16 + $0x500] sm:$0xff]  ;;  %v510_v38 = vld [vmem:[%s5768_s16 + $0x508] sm:$0xff]  ;;  %v371_v30 = vld [vmem:[%s5768_s16 + $0xb0] sm:$0xff] }
  0x45   : > { %v513_v37 = vld [vmem:[%s5768_s16 + $0x520] sm:$0xff]  ;;  %v5019_v50 = vcombine.low %v510_v38, %v514_v39  ;;  %v5939_v21 = vld [vmem:[%s6755_s0 + $0x8] ss:$12 sps:$4 sm:$0xff]  }
  0x46   : > { %v5018_v42 = vcombine.high %v509_v36, %v513_v37  ;;  %v5017_v49 = vcombine.low %v509_v36, %v513_v37  ;;  %v4878_v36 = vcombine.high %v367_v29, %v371_v30 }
  0x47   : > { %1632 = vmatpush1.bf16.msra.mxu0 %v4953_v43  ;;  %1778 = vmatpush1.bf16.msra.mxu1 %v4955_v44  ;;  %v5020_v43 = vcombine.high %v510_v38, %v514_v39  ;;  %v517_v44 = vld [vmem:[%s5768_s16 + $0x540] sm:$0xff]  ;;  %v375_v38 = vld [vmem:[%s5768_s16 + $0xd0] sm:$0xff] }
  0x48   : > { %1633 = vmatprep.subr.bf16.mxu0 %v4962_v45  ;;  %1779 = vmatprep.subr.bf16.mxu1 %v4964_v46  ;;  %v521_v45 = vld [vmem:[%s5768_s16 + $0x560] sm:$0xff]  ;;  %v5900_v46 = vld [vmem:[%s6755_s0 + $0x30] ss:$12 sps:$4 sm:$0xff]  }
  0x49   : > { %v5025_v59 = vcombine.low %v517_v44, %v521_v45  ;;  %v379_v39 = vld [vmem:[%s5768_s16 + $0xf0] sm:$0xff] }
  0x4b   : > { %1634 = vmatpush1.bf16.msra.mxu0 %v4961_v51  ;;  %1780 = vmatpush1.bf16.msra.mxu1 %v4963_v52  ;;  %v5026_v51 = vcombine.high %v517_v44, %v521_v45  ;;  %v5028_v52 = vcombine.high %v518_v47, %v522_v48  ;;  %v4886_v45 = vcombine.high %v375_v38, %v379_v39 }
  0x4c   : > { %1635 = vmatprep.subr.bf16.mxu0 %v4970_v53  ;;  %1781 = vmatprep.subr.bf16.mxu1 %v4972_v54  ;;  %v5907_v53 = vld [vmem:[%s6755_s0 + $0x4c] ss:$12 sps:$4 sm:$0xff]   ;;  %v525_v54 = vld [vmem:[%s5768_s16 + $0x580] sm:$0xff] }
  0x4f   : > { %1636 = vmatpush1.bf16.msra.mxu0 %v4969_v60  ;;  %1782 = vmatpush1.bf16.msra.mxu1 %v4971_v61  ;;  %v5027_v60 = vcombine.low %v518_v47, %v522_v48  ;;  %v5034_v61 = vcombine.high %v525_v54, %v529_v55  ;;  %v383_v48 = vld [vmem:[%s5768_s16 + $0x110] sm:$0xff] }
  0x50   : > { %1637 = vmatprep.subr.bf16.mxu0 %v4978_v62  ;;  %1783 = vmatprep.subr.bf16.mxu1 %v4980_v63  ;;  %v5036_v62 = vcombine.high %v526_v57, %v530_v58  ;;  %v533_v63 = vld [vmem:[%s5768_s16 + $0x5c0] sm:$0xff] }
  0x53   : > { %1638 = vmatpush1.bf16.msra.mxu0 %v4977_v4  ;;  %1784 = vmatpush1.bf16.msra.mxu1 %v4979_v5  ;;  %v5033_v4 = vcombine.low %v525_v54, %v529_v55  ;;  %v5035_v5 = vcombine.low %v526_v57, %v530_v58  ;;  %v391_v58 = vld [vmem:[%s5768_s16 + $0x150] sm:$0xff] }
  0x54   : > { %1680 = vmatprep.subr.bf16.mxu0 %v4986_v6  ;;  %1826 = vmatprep.subr.bf16.mxu1 %v4988_v7  ;;  %v5042_v6 = vcombine.high %v533_v63, %v537_v0  ;;  %v5044_v7 = vcombine.high %v534_v2, %v538_v3 }
  0x56   : > { %1640 = vmatmul.mubr.bf16.vlgmr.msra.gmra.mrb[0].mxu0 %v5856_v10  ;;  %1786 = vmatmul.mubr.bf16.vlgmr.msra.gmra.mrb[0].mxu1 %v5856_v10 }
  0x57   : > { %1681 = vmatpush1.bf16.msra.mxu0 %v4985_v13  ;;  %1827 = vmatpush1.bf16.msra.mxu1 %v4987_v14  ;;  %v5041_v13 = vcombine.low %v533_v63, %v537_v0  ;;  %v5043_v14 = vcombine.low %v534_v2, %v538_v3 }
  0x58   : > { %1682 = vmatprep.subr.bf16.mxu0 %v4994_v15  ;;  %1828 = vmatprep.subr.bf16.mxu1 %v4996_v16  ;;  %v4862_v15 = vcombine.high %v351_v8, %v355_v9  ;;  %v5700_v16 = vmov 0  }
  0x59   : > { %1649 = vmatprep.mubr.bf16.mxu0 %v5863_v17  ;;  %1795 = vmatprep.mubr.bf16.mxu1 %v5863_v17 }
  0x5b   : > { %1683 = vmatpush1.bf16.msra.mxu0 %v4993_v22  ;;  %1829 = vmatpush1.bf16.msra.mxu1 %v4995_v23  ;;  %v360_v22 = vld [vmem:[%s5768_s16 + $0x58] sm:$0xff] }
  0x5c   : > { %1684 = vmatprep.subr.bf16.mxu0 %v5002_v24  ;;  %1830 = vmatprep.subr.bf16.mxu1 %v5004_v25  ;;  %v364_v23 = vld [vmem:[%s5768_s16 + $0x78] sm:$0xff]  ;;  %v4861_v24 = vcombine.low %v351_v8, %v355_v9  ;;  %v4863_v25 = vcombine.low %v352_v11, %v356_v12 }
  0x5d   : > { %v4872_v27 = vcombine.high %v360_v22, %v364_v23 }
  0x5e   : > { %1650 = vmatmul.mubr.bf16.gmra.mrb[4].mxu0 %v5878_v28  ;;  %1796 = vmatmul.mubr.bf16.gmra.mrb[4].mxu1 %v5878_v28 }
  0x5f   : > { %1685 = vmatpush1.bf16.msra.mxu0 %v5001_v31  ;;  %1831 = vmatpush1.bf16.msra.mxu1 %v5003_v32  ;;  %v368_v31 = vld [vmem:[%s5768_s16 + $0x98] sm:$0xff] }
  0x60   : > { %1686 = vmatprep.subr.bf16.mxu0 %v5010_v33  ;;  %1832 = vmatprep.subr.bf16.mxu1 %v5012_v34  ;;  %v372_v32 = vld [vmem:[%s5768_s16 + $0xb8] sm:$0xff]  ;;  %v4869_v33 = vcombine.low %v359_v19, %v363_v20  ;;  %v4871_v34 = vcombine.low %v360_v22, %v364_v23 }
  0x61   : > { %1659 = vmatprep.mubr.bf16.mxu0 %v5885_v35  ;;  %1805 = vmatprep.mubr.bf16.mxu1 %v5885_v35  ;;  %v4880_v37 = vcombine.high %v368_v31, %v372_v32  ;;  %v4879_v44 = vcombine.low %v368_v31, %v372_v32  ;;  %v412_v19 = vld [vmem:[%s5768_s16 + $0x1f8] sm:$0xff] }
  0x63   : > { %1687 = vmatpush1.bf16.msra.mxu0 %v5009_v40  ;;  %1833 = vmatpush1.bf16.msra.mxu1 %v5011_v41  ;;  %v5956_v40 = vld [vmem:[%s6755_s0 + $0x20] ss:$12 sps:$4 sm:$0xff]   ;;  %v376_v41 = vld [vmem:[%s5768_s16 + $0xd8] sm:$0xff] }
  0x64   : > { %1688 = vmatprep.subr.bf16.mxu0 %v5018_v42  ;;  %1834 = vmatprep.subr.bf16.mxu1 %v5020_v43  ;;  %v380_v42 = vld [vmem:[%s5768_s16 + $0xf8] sm:$0xff]  ;;  %v4877_v43 = vcombine.low %v367_v29, %v371_v30 }
  0x65   : > { %v4888_v47 = vcombine.high %v376_v41, %v380_v42  ;;  %v4887_v54 = vcombine.low %v376_v41, %v380_v42  ;;  %v420_v29 = vld [vmem:[%s5768_s16 + $0x238] sm:$0xff] }
  0x66   : > { %1660 = vmatmul.mubr.bf16.gmra.mrb[8].mxu0 %v5900_v46  ;;  %1806 = vmatmul.mubr.bf16.gmra.mrb[8].mxu1 %v5900_v46 }
  0x67   : > { %1689 = vmatpush1.bf16.msra.mxu0 %v5017_v49  ;;  %1835 = vmatpush1.bf16.msra.mxu1 %v5019_v50  ;;  %v387_v49 = vld [vmem:[%s5768_s16 + $0x130] sm:$0xff]  ;;  %v384_v50 = vld [vmem:[%s5768_s16 + $0x118] sm:$0xff] }
  0x68   : > { %1690 = vmatprep.subr.bf16.mxu0 %v5026_v51  ;;  %1836 = vmatprep.subr.bf16.mxu1 %v5028_v52  ;;  %v388_v51 = vld [vmem:[%s5768_s16 + $0x138] sm:$0xff]  ;;  %v4885_v52 = vcombine.low %v375_v38, %v379_v39  ;;  %v4894_v55 = vcombine.high %v383_v48, %v387_v49  ;;  %v4893_v63 = vcombine.low %v383_v48, %v387_v49 }
  0x69   : > { %1669 = vmatprep.mubr.bf16.mxu0 %v5907_v53  ;;  %1815 = vmatprep.mubr.bf16.mxu1 %v5907_v53  ;;  %v4896_v57 = vcombine.high %v384_v50, %v388_v51  ;;  %v4895_v0 = vcombine.low %v384_v50, %v388_v51  ;;  %v428_v38 = vld [vmem:[%s5768_s16 + $0x278] sm:$0xff] }
  0x6a   : > { %v436_v48 = vld [vmem:[%s5768_s16 + $0x2b8] sm:$0xff] }
  0x6b   : > { %1691 = vmatpush1.bf16.msra.mxu0 %v5025_v59  ;;  %1837 = vmatpush1.bf16.msra.mxu1 %v5027_v60  ;;  %v395_v59 = vld [vmem:[%s5768_s16 + $0x170] sm:$0xff]  ;;  %v5973_v60 = vld [vmem:[%s6755_s0 + $0x38] ss:$12 sps:$4 sm:$0xff]  }
  0x6c   : > { %1692 = vmatprep.subr.bf16.mxu0 %v5034_v61  ;;  %1838 = vmatprep.subr.bf16.mxu1 %v5036_v62  ;;  %v392_v61 = vld [vmem:[%s5768_s16 + $0x158] sm:$0xff]  ;;  %v4902_v2 = vcombine.high %v391_v58, %v395_v59  ;;  %v4901_v8 = vcombine.low %v391_v58, %v395_v59 }
  0x6d   : > { %v396_v62 = vld [vmem:[%s5768_s16 + $0x178] sm:$0xff] }
  0x6e   : > { %1670 = vmatmul.mubr.bf16.gmra.mrb[12].mxu0 %v5922_v1  ;;  %1816 = vmatmul.mubr.bf16.gmra.mrb[12].mxu1 %v5922_v1  ;;  %v4904_v3 = vcombine.high %v392_v61, %v396_v62  ;;  %v4903_v9 = vcombine.low %v392_v61, %v396_v62 }
  0x6f   : > { %1693 = vmatpush1.bf16.msra.mxu0 %v5033_v4  ;;  %1839 = vmatpush1.bf16.msra.mxu1 %v5035_v5  ;;  %v399_v4 = vld [vmem:[%s5768_s16 + $0x190] sm:$0xff] }
  0x70   : > { %1694 = vmatprep.subr.bf16.mxu0 %v5042_v6  ;;  %1840 = vmatprep.subr.bf16.mxu1 %v5044_v7  ;;  %v403_v5 = vld [vmem:[%s5768_s16 + $0x1b0] sm:$0xff]  ;;  %v400_v6 = vld [vmem:[%s5768_s16 + $0x198] sm:$0xff] }
  0x71   : > { %1712 = vmatprep.mubr.bf16.mxu0 %v5700_v16  ;;  %1858 = vmatprep.mubr.bf16.mxu1 %v5700_v16  ;;  %v404_v7 = vld [vmem:[%s5768_s16 + $0x1b8] sm:$0xff]  ;;  %v4910_v11 = vcombine.high %v399_v4, %v403_v5  ;;  %v4909_v20 = vcombine.low %v399_v4, %v403_v5 }
  0x72   : > { %v4912_v12 = vcombine.high %v400_v6, %v404_v7  ;;  %v4911_v22 = vcombine.low %v400_v6, %v404_v7 }
  0x73   : > { %1695 = vmatpush1.bf16.msra.mxu0 %v5041_v13  ;;  %1841 = vmatpush1.bf16.msra.mxu1 %v5043_v14  ;;  %v407_v13 = vld [vmem:[%s5768_s16 + $0x1d0] sm:$0xff] }
  0x74   : > { %1899 = vmatprep.subr.bf16.mxu0 %v4862_v15  ;;  %2045 = vmatprep.subr.bf16.mxu1 %v4864_v18  ;;  %v411_v14 = vld [vmem:[%s5768_s16 + $0x1f0] sm:$0xff]  ;;  %v408_v18 = vld [vmem:[%s5768_s16 + $0x1d8] sm:$0xff] }
  0x75   : > { %v5990_v15 = vld [vmem:[%s6755_s0 + $0x50] ss:$12 sps:$4 sm:$0xff]   ;;  %v4918_v23 = vcombine.high %v407_v13, %v411_v14  ;;  %v4917_v30 = vcombine.low %v407_v13, %v411_v14  ;;  %v4919_v31 = vcombine.low %v408_v18, %v412_v19 }
  0x76   : > { %1713 = vmatmul.mubr.bf16.vlgmr.msra.gmra.mrb[0].mxu0 %v5939_v21  ;;  %1859 = vmatmul.mubr.bf16.vlgmr.msra.gmra.mrb[0].mxu1 %v5939_v21 }
  0x77   : > { %1900 = vmatpush1.bf16.msra.mxu0 %v4861_v24  ;;  %2046 = vmatpush1.bf16.msra.mxu1 %v4863_v25  ;;  %v4920_v24 = vcombine.high %v408_v18, %v412_v19  ;;  %v415_v25 = vld [vmem:[%s5768_s16 + $0x210] sm:$0xff] }
  0x78   : > { %1901 = vmatprep.subr.bf16.mxu0 %v4870_v26  ;;  %2047 = vmatprep.subr.bf16.mxu1 %v4872_v27  ;;  %v419_v26 = vld [vmem:[%s5768_s16 + $0x230] sm:$0xff]  ;;  %v416_v27 = vld [vmem:[%s5768_s16 + $0x218] sm:$0xff] }
  0x79   : > { %1722 = vmatprep.mubr.bf16.mxu0 %v5700_v16  ;;  %1868 = vmatprep.mubr.bf16.mxu1 %v5700_v16  ;;  %v4926_v32 = vcombine.high %v415_v25, %v419_v26  ;;  %v4925_v39 = vcombine.low %v415_v25, %v419_v26  ;;  %v4927_v41 = vcombine.low %v416_v27, %v420_v29 }
  0x7b   : > { %1902 = vmatpush1.bf16.msra.mxu0 %v4869_v33  ;;  %2048 = vmatpush1.bf16.msra.mxu1 %v4871_v34  ;;  %v4928_v33 = vcombine.high %v416_v27, %v420_v29  ;;  %v423_v34 = vld [vmem:[%s5768_s16 + $0x250] sm:$0xff] }
  0x7c   : > { %1903 = vmatprep.subr.bf16.mxu0 %v4878_v36  ;;  %2049 = vmatprep.subr.bf16.mxu1 %v4880_v37  ;;  %v427_v36 = vld [vmem:[%s5768_s16 + $0x270] sm:$0xff]  ;;  %v424_v37 = vld [vmem:[%s5768_s16 + $0x258] sm:$0xff] }
  0x7d   : > { %v4934_v42 = vcombine.high %v423_v34, %v427_v36  ;;  %v4933_v49 = vcombine.low %v423_v34, %v427_v36 }
  0x7e   : > { %1723 = vmatmul.mubr.bf16.gmra.mrb[4].mxu0 %v5956_v40  ;;  %1869 = vmatmul.mubr.bf16.gmra.mrb[4].mxu1 %v5956_v40 }
  0x7f   : > { %1904 = vmatpush1.bf16.msra.mxu0 %v4877_v43  ;;  %2050 = vmatpush1.bf16.msra.mxu1 %v4879_v44  ;;  %v4936_v43 = vcombine.high %v424_v37, %v428_v38  ;;  %v431_v44 = vld [vmem:[%s5768_s16 + $0x290] sm:$0xff] }
  0x80   : > { %1905 = vmatprep.subr.bf16.mxu0 %v4886_v45  ;;  %2051 = vmatprep.subr.bf16.mxu1 %v4888_v47  ;;  %v435_v45 = vld [vmem:[%s5768_s16 + $0x2b0] sm:$0xff]  ;;  %v432_v47 = vld [vmem:[%s5768_s16 + $0x298] sm:$0xff] }
  0x81   : > { %1732 = vmatprep.mubr.bf16.mxu0 %v5700_v16  ;;  %1878 = vmatprep.mubr.bf16.mxu1 %v5700_v16  ;;  %v4942_v50 = vcombine.high %v431_v44, %v435_v45  ;;  %v4944_v51 = vcombine.high %v432_v47, %v436_v48  ;;  %v4941_v58 = vcombine.low %v431_v44, %v435_v45 }
  0x82   : > { %v4943_v59 = vcombine.low %v432_v47, %v436_v48 }
  0x83   : > { %1906 = vmatpush1.bf16.msra.mxu0 %v4885_v52  ;;  %2052 = vmatpush1.bf16.msra.mxu1 %v4887_v54  ;;  %v439_v52 = vld [vmem:[%s5768_s16 + $0x2d0] sm:$0xff] }
  0x84   : > { %1907 = vmatprep.subr.bf16.mxu0 %v4894_v55  ;;  %2053 = vmatprep.subr.bf16.mxu1 %v4896_v57  ;;  %v443_v54 = vld [vmem:[%s5768_s16 + $0x2f0] sm:$0xff]  ;;  %v440_v55 = vld [vmem:[%s5768_s16 + $0x2d8] sm:$0xff] }
  0x85   : > { %v444_v57 = vld [vmem:[%s5768_s16 + $0x2f8] sm:$0xff]  ;;  %v4950_v61 = vcombine.high %v439_v52, %v443_v54  ;;  %v4949_v4 = vcombine.low %v439_v52, %v443_v54 }
  0x86   : > { %1733 = vmatmul.mubr.bf16.gmra.mrb[8].mxu0 %v5973_v60  ;;  %1879 = vmatmul.mubr.bf16.gmra.mrb[8].mxu1 %v5973_v60  ;;  %v4952_v62 = vcombine.high %v440_v55, %v444_v57  ;;  %v4951_v5 = vcombine.low %v440_v55, %v444_v57 }
  0x87   : > { %1908 = vmatpush1.bf16.msra.mxu0 %v4893_v63  ;;  %2054 = vmatpush1.bf16.msra.mxu1 %v4895_v0  ;;  %v447_v63 = vld [vmem:[%s5768_s16 + $0x310] sm:$0xff] }
  0x88   : > { %1909 = vmatprep.subr.bf16.mxu0 %v4902_v2  ;;  %2055 = vmatprep.subr.bf16.mxu1 %v4904_v3  ;;  %v451_v0 = vld [vmem:[%s5768_s16 + $0x330] sm:$0xff]  ;;  %v448_v2 = vld [vmem:[%s5768_s16 + $0x318] sm:$0xff] }
  0x89   : > { %1742 = vmatprep.mubr.bf16.mxu0 %v5700_v16  ;;  %1888 = vmatprep.mubr.bf16.mxu1 %v5700_v16  ;;  %v452_v3 = vld [vmem:[%s5768_s16 + $0x338] sm:$0xff]  ;;  %v4958_v6 = vcombine.high %v447_v63, %v451_v0  ;;  %v4957_v13 = vcombine.low %v447_v63, %v451_v0 }
  0x8a   : > { %v4960_v7 = vcombine.high %v448_v2, %v452_v3  ;;  %v4959_v14 = vcombine.low %v448_v2, %v452_v3 }
  0x8b   : > { %1910 = vmatpush1.bf16.msra.mxu0 %v4901_v8  ;;  %2056 = vmatpush1.bf16.msra.mxu1 %v4903_v9  ;;  %v455_v8 = vld [vmem:[%s5768_s16 + $0x350] sm:$0xff] }
  0x8c   : > { %1911 = vmatprep.subr.bf16.mxu0 %v4910_v11  ;;  %2057 = vmatprep.subr.bf16.mxu1 %v4912_v12  ;;  %v459_v9 = vld [vmem:[%s5768_s16 + $0x370] sm:$0xff]  ;;  %v456_v11 = vld [vmem:[%s5768_s16 + $0x358] sm:$0xff] }
  0x8d   : > { %v460_v12 = vld [vmem:[%s5768_s16 + $0x378] sm:$0xff]  ;;  %v4966_v18 = vcombine.high %v455_v8, %v459_v9  ;;  %v4965_v25 = vcombine.low %v455_v8, %v459_v9 }
  0x8e   : > { %1743 = vmatmul.mubr.bf16.gmra.mrb[12].mxu0 %v5990_v15  ;;  %1889 = vmatmul.mubr.bf16.gmra.mrb[12].mxu1 %v5990_v15  ;;  %v4968_v19 = vcombine.high %v456_v11, %v460_v12  ;;  %v4967_v26 = vcombine.low %v456_v11, %v460_v12  ;;  %v511_v12 = vld [vmem:[%s5768_s16 + $0x510] sm:$0xff] }
  0x8f   : > { %1912 = vmatpush1.bf16.msra.mxu0 %v4909_v20  ;;  %2058 = vmatpush1.bf16.msra.mxu1 %v4911_v22  ;;  %v463_v20 = vld [vmem:[%s5768_s16 + $0x390] sm:$0xff] }
  0x90   : > { %1913 = vmatprep.subr.bf16.mxu0 %v4918_v23  ;;  %2059 = vmatprep.subr.bf16.mxu1 %v4920_v24  ;;  %v467_v22 = vld [vmem:[%s5768_s16 + $0x3b0] sm:$0xff]  ;;  %v464_v23 = vld [vmem:[%s5768_s16 + $0x398] sm:$0xff] }
  0x91   : > { %1931 = vmatprep.mubr.bf16.mxu0 %v5809_v56  ;;  %2077 = vmatprep.mubr.bf16.mxu1 %v5809_v56  ;;  %v4935_v56 = vcombine.low %v424_v37, %v428_v38  ;;  %v468_v24 = vld [vmem:[%s5768_s16 + $0x3b8] sm:$0xff]  ;;  %v4974_v27 = vcombine.high %v463_v20, %v467_v22  ;;  %v4973_v34 = vcombine.low %v463_v20, %v467_v22 }
  0x92   : > { %v4976_v29 = vcombine.high %v464_v23, %v468_v24  ;;  %v4975_v36 = vcombine.low %v464_v23, %v468_v24  ;;  %v519_v23 = vld [vmem:[%s5768_s16 + $0x550] sm:$0xff] }
  0x93   : > { %1914 = vmatpush1.bf16.msra.mxu0 %v4917_v30  ;;  %2060 = vmatpush1.bf16.msra.mxu1 %v4919_v31  ;;  %v471_v30 = vld [vmem:[%s5768_s16 + $0x3d0] sm:$0xff] }
  0x94   : > { %1915 = vmatprep.subr.bf16.mxu0 %v4926_v32  ;;  %2061 = vmatprep.subr.bf16.mxu1 %v4928_v33  ;;  %v475_v31 = vld [vmem:[%s5768_s16 + $0x3f0] sm:$0xff]  ;;  %v472_v32 = vld [vmem:[%s5768_s16 + $0x3d8] sm:$0xff] }
  0x95   : > { %v476_v33 = vld [vmem:[%s5768_s16 + $0x3f8] sm:$0xff]  ;;  %v4982_v37 = vcombine.high %v471_v30, %v475_v31  ;;  %v4981_v44 = vcombine.low %v471_v30, %v475_v31  ;;  %v523_v24 = vld [vmem:[%s5768_s16 + $0x570] sm:$0xff] }
  0x96   : > { %v4984_v38 = vcombine.high %v472_v32, %v476_v33  ;;  %v4983_v45 = vcombine.low %v472_v32, %v476_v33  ;;  %v527_v31 = vld [vmem:[%s5768_s16 + $0x590] sm:$0xff]  ;;  %v528_v33 = vld [vmem:[%s5768_s16 + $0x598] sm:$0xff] }
  0x97   : > { %1916 = vmatpush1.bf16.msra.mxu0 %v4925_v39  ;;  %2062 = vmatpush1.bf16.msra.mxu1 %v4927_v41  ;;  %v479_v39 = vld [vmem:[%s5768_s16 + $0x410] sm:$0xff] }
  0x98   : > { %1917 = vmatprep.subr.bf16.mxu0 %v4934_v42  ;;  %2063 = vmatprep.subr.bf16.mxu1 %v4936_v43  ;;  %v483_v41 = vld [vmem:[%s5768_s16 + $0x430] sm:$0xff]  ;;  %v480_v42 = vld [vmem:[%s5768_s16 + $0x418] sm:$0xff] }
  0x99   : > { %v484_v43 = vld [vmem:[%s5768_s16 + $0x438] sm:$0xff]  ;;  %v4990_v47 = vcombine.high %v479_v39, %v483_v41  ;;  %v4989_v52 = vcombine.low %v479_v39, %v483_v41  ;;  %v531_v32 = vld [vmem:[%s5768_s16 + $0x5b0] sm:$0xff] }
  0x9a   : > { %v4992_v48 = vcombine.high %v480_v42, %v484_v43  ;;  %v4991_v54 = vcombine.low %v480_v42, %v484_v43  ;;  %v535_v39 = vld [vmem:[%s5768_s16 + $0x5d0] sm:$0xff]  ;;  %v536_v42 = vld [vmem:[%s5768_s16 + $0x5d8] sm:$0xff] }
  0x9b   : > { %1918 = vmatpush1.bf16.msra.mxu0 %v4933_v49  ;;  %2064 = vmatpush1.bf16.msra.mxu1 %v4935_v56  ;;  %v487_v49 = vld [vmem:[%s5768_s16 + $0x450] sm:$0xff]  ;;  %v540_v43 = vld [vmem:[%s5768_s16 + $0x5f8] sm:$0xff] }
  0x9c   : > { %1919 = vmatprep.subr.bf16.mxu0 %v4942_v50  ;;  %2065 = vmatprep.subr.bf16.mxu1 %v4944_v51  ;;  %v491_v56 = vld [vmem:[%s5768_s16 + $0x470] sm:$0xff]  ;;  %v488_v50 = vld [vmem:[%s5768_s16 + $0x458] sm:$0xff] }
  0x9d   : > { %v492_v51 = vld [vmem:[%s5768_s16 + $0x478] sm:$0xff]  ;;  %v4998_v55 = vcombine.high %v487_v49, %v491_v56  ;;  %v4997_v63 = vcombine.low %v487_v49, %v491_v56  ;;  %v539_v41 = vld [vmem:[%s5768_s16 + $0x5f0] sm:$0xff]  ;;  %v5047_v49 = vcombine.low %v536_v42, %v540_v43 }
  0x9e   : > { %v5000_v57 = vcombine.high %v488_v50, %v492_v51  ;;  %v4999_v0 = vcombine.low %v488_v50, %v492_v51 }
  0x9f   : > { %1920 = vmatpush1.bf16.msra.mxu0 %v4941_v58  ;;  %2066 = vmatpush1.bf16.msra.mxu1 %v4943_v59  ;;  %v495_v58 = vld [vmem:[%s5768_s16 + $0x490] sm:$0xff] }
  0xa0   : > { %1921 = vmatprep.subr.bf16.mxu0 %v4950_v61  ;;  %2067 = vmatprep.subr.bf16.mxu1 %v4952_v62  ;;  %v499_v59 = vld [vmem:[%s5768_s16 + $0x4b0] sm:$0xff]  ;;  %v496_v61 = vld [vmem:[%s5768_s16 + $0x498] sm:$0xff] }
  0xa1   : > { %v500_v62 = vld [vmem:[%s5768_s16 + $0x4b8] sm:$0xff]  ;;  %v5006_v2 = vcombine.high %v495_v58, %v499_v59 }
  0xa2   : > { %v5008_v3 = vcombine.high %v496_v61, %v500_v62  ;;  %v5007_v8 = vcombine.low %v496_v61, %v500_v62 }
  0xa3   : > { %1922 = vmatpush1.bf16.msra.mxu0 %v4949_v4  ;;  %2068 = vmatpush1.bf16.msra.mxu1 %v4951_v5  ;;  %v503_v4 = vld [vmem:[%s5768_s16 + $0x4d0] sm:$0xff] }
  0xa4   : > { %1923 = vmatprep.subr.bf16.mxu0 %v4958_v6  ;;  %2069 = vmatprep.subr.bf16.mxu1 %v4960_v7  ;;  %v507_v5 = vld [vmem:[%s5768_s16 + $0x4f0] sm:$0xff]  ;;  %v504_v6 = vld [vmem:[%s5768_s16 + $0x4d8] sm:$0xff]  ;;  %v5005_v7 = vcombine.low %v495_v58, %v499_v59 }
  0xa5   : > { %v5014_v9 = vcombine.high %v503_v4, %v507_v5 }
  0xa7   : > { %1924 = vmatpush1.bf16.msra.mxu0 %v4957_v13  ;;  %2070 = vmatpush1.bf16.msra.mxu1 %v4959_v14  ;;  %v515_v13 = vld [vmem:[%s5768_s16 + $0x530] sm:$0xff]  ;;  %v512_v14 = vld [vmem:[%s5768_s16 + $0x518] sm:$0xff] }
  0xa8   : > { %1925 = vmatprep.subr.bf16.mxu0 %v4966_v18  ;;  %2071 = vmatprep.subr.bf16.mxu1 %v4968_v19  ;;  %v5013_v18 = vcombine.low %v503_v4, %v507_v5  ;;  %v5022_v20 = vcombine.high %v511_v12, %v515_v13 }
  0xab   : > { %1926 = vmatpush1.bf16.msra.mxu0 %v4965_v25  ;;  %2072 = vmatpush1.bf16.msra.mxu1 %v4967_v26  ;;  %v520_v25 = vld [vmem:[%s5768_s16 + $0x558] sm:$0xff]  ;;  %v5021_v26 = vcombine.low %v511_v12, %v515_v13 }
  0xac   : > { %1927 = vmatprep.subr.bf16.mxu0 %v4974_v27  ;;  %2073 = vmatprep.subr.bf16.mxu1 %v4976_v29  ;;  %v5030_v29 = vcombine.high %v519_v23, %v523_v24 }
  0xaf   : > { %1928 = vmatpush1.bf16.msra.mxu0 %v4973_v34  ;;  %2074 = vmatpush1.bf16.msra.mxu1 %v4975_v36  ;;  %v5029_v34 = vcombine.low %v519_v23, %v523_v24 }
  0xb0   : > { %1929 = vmatprep.subr.bf16.mxu0 %v4982_v37  ;;  %2075 = vmatprep.subr.bf16.mxu1 %v4984_v38  ;;  %v5038_v37 = vcombine.high %v527_v31, %v531_v32 }
  0xb3   : > { %1930 = vmatpush1.bf16.msra.mxu0 %v4981_v44  ;;  %2076 = vmatpush1.bf16.msra.mxu1 %v4983_v45  ;;  %v5037_v44 = vcombine.low %v527_v31, %v531_v32  ;;  %v5046_v45 = vcombine.high %v535_v39, %v539_v41 }
  0xb4   : > { %1972 = vmatprep.subr.bf16.mxu0 %v4990_v47  ;;  %2118 = vmatprep.subr.bf16.mxu1 %v4992_v48  ;;  %v5048_v47 = vcombine.high %v536_v42, %v540_v43  ;;  %v5045_v48 = vcombine.low %v535_v39, %v539_v41 }
  0xb6   : > { %1932 = vmatmul.mubr.bf16.vlgmr.msra.gmra.mrb[16].mxu0 %v5856_v10  ;;  %2078 = vmatmul.mubr.bf16.vlgmr.msra.gmra.mrb[16].mxu1 %v5856_v10  ;;  %v508_v10 = vld [vmem:[%s5768_s16 + $0x4f8] sm:$0xff] }
  0xb7   : > { %1973 = vmatpush1.bf16.msra.mxu0 %v4989_v52  ;;  %2119 = vmatpush1.bf16.msra.mxu1 %v4991_v54  ;;  %v5016_v11 = vcombine.high %v504_v6, %v508_v10  ;;  %v5015_v19 = vcombine.low %v504_v6, %v508_v10 }
  0xb8   : > { %1974 = vmatprep.subr.bf16.mxu0 %v4998_v55  ;;  %2120 = vmatprep.subr.bf16.mxu1 %v5000_v57 }
  0xb9   : > { %1941 = vmatprep.mubr.bf16.mxu0 %v5863_v17  ;;  %2087 = vmatprep.mubr.bf16.mxu1 %v5863_v17  ;;  %v516_v17 = vld [vmem:[%s5768_s16 + $0x538] sm:$0xff] }
  0xba   : > { %v5024_v22 = vcombine.high %v512_v14, %v516_v17  ;;  %v5023_v27 = vcombine.low %v512_v14, %v516_v17 }
  0xbb   : > { %1975 = vmatpush1.bf16.msra.mxu0 %v4997_v63  ;;  %2121 = vmatpush1.bf16.msra.mxu1 %v4999_v0 }
  0xbc   : > { %1976 = vmatprep.subr.bf16.mxu0 %v5006_v2  ;;  %2122 = vmatprep.subr.bf16.mxu1 %v5008_v3 }
  0xbe   : > { %1942 = vmatmul.mubr.bf16.gmra.mrb[20].mxu0 %v5878_v28  ;;  %2088 = vmatmul.mubr.bf16.gmra.mrb[20].mxu1 %v5878_v28  ;;  %v524_v28 = vld [vmem:[%s5768_s16 + $0x578] sm:$0xff] }
  0xbf   : > { %1977 = vmatpush1.bf16.msra.mxu0 %v5005_v7  ;;  %2123 = vmatpush1.bf16.msra.mxu1 %v5007_v8  ;;  %v5032_v30 = vcombine.high %v520_v25, %v524_v28  ;;  %v5031_v36 = vcombine.low %v520_v25, %v524_v28 }
  0xc0   : > { %1978 = vmatprep.subr.bf16.mxu0 %v5014_v9  ;;  %2124 = vmatprep.subr.bf16.mxu1 %v5016_v11 }
  0xc1   : > { %1951 = vmatprep.mubr.bf16.mxu0 %v5885_v35  ;;  %2097 = vmatprep.mubr.bf16.mxu1 %v5885_v35  ;;  %v532_v35 = vld [vmem:[%s5768_s16 + $0x5b8] sm:$0xff] }
  0xc2   : > { %v5040_v38 = vcombine.high %v528_v33, %v532_v35 }
  0xc3   : > { %1979 = vmatpush1.bf16.msra.mxu0 %v5013_v18  ;;  %2125 = vmatpush1.bf16.msra.mxu1 %v5015_v19 }
  0xc4   : > { %1980 = vmatprep.subr.bf16.mxu0 %v5022_v20  ;;  %2126 = vmatprep.subr.bf16.mxu1 %v5024_v22 }
  0xc6   : > { %1952 = vmatmul.mubr.bf16.gmra.mrb[24].mxu0 %v5900_v46  ;;  %2098 = vmatmul.mubr.bf16.gmra.mrb[24].mxu1 %v5900_v46  ;;  %v5039_v46 = vcombine.low %v528_v33, %v532_v35 }
  0xc7   : > { %1981 = vmatpush1.bf16.msra.mxu0 %v5021_v26  ;;  %2127 = vmatpush1.bf16.msra.mxu1 %v5023_v27 }
  0xc8   : > { %1982 = vmatprep.subr.bf16.mxu0 %v5030_v29  ;;  %2128 = vmatprep.subr.bf16.mxu1 %v5032_v30 }
  0xc9   : > { %1961 = vmatprep.mubr.bf16.mxu0 %v5907_v53  ;;  %2107 = vmatprep.mubr.bf16.mxu1 %v5907_v53  ;;  %v543_v53 = vlaneseq }
  0xcb   : > { %1983 = vmatpush1.bf16.msra.mxu0 %v5029_v34  ;;  %2129 = vmatpush1.bf16.msra.mxu1 %v5031_v36 }
  0xcc   : > { %1984 = vmatprep.subr.bf16.mxu0 %v5038_v37  ;;  %2130 = vmatprep.subr.bf16.mxu1 %v5040_v38 }
  0xce   : > { %1962 = vmatmul.mubr.bf16.gmra.mrb[28].mxu0 %v5922_v1  ;;  %2108 = vmatmul.mubr.bf16.gmra.mrb[28].mxu1 %v5922_v1  ;;  %v6092_v1 = vshrl.u32 %v543_v53, 7 }
  0xcf   : > { %1985 = vmatpush1.bf16.msra.mxu0 %v5037_v44  ;;  %2131 = vmatpush1.bf16.msra.mxu1 %v5039_v46 }
  0xd0   : > { %1986 = vmatprep.subr.bf16.mxu0 %v5046_v45  ;;  %2132 = vmatprep.subr.bf16.mxu1 %v5048_v47  ;;  %v553_v56 = vsub.s32 2, %v6092_v1  ;;  %v549_v50 = vsub.s32 1, %v6092_v1 }
  0xd1   : > { %2004 = vmatprep.mubr.bf16.mxu0 %v5700_v16  ;;  %2150 = vmatprep.mubr.bf16.mxu1 %v5700_v16 }
  0xd3   : > { %1987 = vmatpush1.bf16.msra.mxu0 %v5045_v48  ;;  %2133 = vmatpush1.bf16.msra.mxu1 %v5047_v49 }
  0xd6   : > { %2005 = vmatmul.mubr.bf16.vlgmr.msra.gmra.mrb[16].mxu0 %v5939_v21  ;;  %2151 = vmatmul.mubr.bf16.vlgmr.msra.gmra.mrb[16].mxu1 %v5939_v21  ;;  %v545_v21 = vsub.s32 0, %v6092_v1 }
  0xd7   : > { %2014 = vmatprep.mubr.bf16.mxu0 %v5700_v16  ;;  %2160 = vmatprep.mubr.bf16.mxu1 %v5700_v16 }
  0xde   : > { %2015 = vmatmul.mubr.bf16.gmra.mrb[20].mxu0 %v5956_v40  ;;  %2161 = vmatmul.mubr.bf16.gmra.mrb[20].mxu1 %v5956_v40  ;;  %v6096_v40 = vld [vmem:[%s5773_s19] sm:$0xff] }
  0xdf   : > { %2024 = vmatprep.mubr.bf16.mxu0 %v5700_v16  ;;  %2170 = vmatprep.mubr.bf16.mxu1 %v5700_v16  ;;  %v6102_v51 = vrot.slane %v6096_v40, %v545_v21 }
  0xe6   : > { %2025 = vmatmul.mubr.bf16.gmra.mrb[24].mxu0 %v5973_v60  ;;  %2171 = vmatmul.mubr.bf16.gmra.mrb[24].mxu1 %v5973_v60  ;;  %v557_v60 = vsub.s32 3, %v6092_v1 }
  0xe7   : > { %2034 = vmatprep.mubr.bf16.mxu0 %v5700_v16  ;;  %2180 = vmatprep.mubr.bf16.mxu1 %v5700_v16  ;;  %v6105_v16 = vrot.slane %v6096_v40, %v553_v56 }
  0xe8   : > { %v6111_v52 = vrot.slane %v6096_v40, %v557_v60 }
  0xee   : > { %2035 = vmatmul.mubr.bf16.gmra.mrb[28].mxu0 %v5990_v15  ;;  %2181 = vmatmul.mubr.bf16.gmra.mrb[28].mxu1 %v5990_v15  ;;  %v6108_v15 = vrot.slane %v6096_v40, %v549_v50 }
 0x149   : > { %v1714_v54 = vpop.f32.mrb[0].mxu0  ;;  %v1860_v57 = vpop.f32.mrb[0].mxu1 }
 0x14a   : > { %v5400_v55 = vadd.f32 %v1714_v54, %v6102_v51  ;;  %v1716_v58 = vpop.f32.mrb[1].mxu0  ;;  %v5416_v59 = vadd.f32 %v1860_v57, %v6105_v16  ;;  %v1862_v62 = vpop.f32.mrb[1].mxu1 }
 0x14b   : > { %v5401_v61 = vadd.f32 %v1716_v58, %v6108_v15  ;;  %v1718_v63 = vpop.f32.mrb[2].mxu0  ;;  %v5417_v0 = vadd.f32 %v1862_v62, %v6111_v52  ;;  %v1864_v3 = vpop.f32.mrb[2].mxu1  ;;  %v561_v62 = vsub.s32 4, %v6092_v1 }
 0x14c   : > { %2191 = vst [vmem:[#allocation2] sm:$0xff] %v5400_v55  ;;  %v5402_v2 = vadd.f32 %v1718_v63, %v6102_v51  ;;  %v1720_v4 = vpop.f32.mrb[3].mxu0  ;;  %2193 = vst [vmem:[#allocation2 + $0x10] sm:$0xff] %v5416_v59  ;;  %v5418_v5 = vadd.f32 %v1864_v3, %v6105_v16  ;;  %v1866_v10 = vpop.f32.mrb[3].mxu1  ;;  %v565_v63 = vsub.s32 5, %v6092_v1 }
 0x14d   : > { %2192 = vst [vmem:[#allocation2 + $0x8] sm:$0xff] %v5401_v61  ;;  %v5403_v6 = vadd.f32 %v1720_v4, %v6108_v15  ;;  %2194 = vst [vmem:[#allocation2 + $0x18] sm:$0xff] %v5417_v0  ;;  %v5419_v7 = vadd.f32 %v1866_v10, %v6111_v52  ;;  %v573_v0 = vsub.s32 7, %v6092_v1 }
 0x14e   : > { %2199 = vst [vmem:[#allocation2 + $0x40] sm:$0xff] %v5402_v2  ;;  %2201 = vst [vmem:[#allocation2 + $0x50] sm:$0xff] %v5418_v5  ;;  %v6156_v2 = vrot.slane %v6096_v40, %v565_v63 }
 0x14f   : > { %2200 = vst [vmem:[#allocation2 + $0x48] sm:$0xff] %v5403_v6  ;;  %2202 = vst [vmem:[#allocation2 + $0x58] sm:$0xff] %v5419_v7 }
 0x151   : > { %v1724_v8 = vpop.f32.mrb[4].mxu0  ;;  %v1870_v11 = vpop.f32.mrb[4].mxu1 }
 0x152   : > { %v5404_v9 = vadd.f32 %v1724_v8, %v6102_v51  ;;  %v1726_v12 = vpop.f32.mrb[5].mxu0  ;;  %v5420_v13 = vadd.f32 %v1870_v11, %v6105_v16  ;;  %v1872_v17 = vpop.f32.mrb[5].mxu1 }
 0x153   : > { %v5405_v14 = vadd.f32 %v1726_v12, %v6108_v15  ;;  %v1728_v18 = vpop.f32.mrb[6].mxu0  ;;  %v5421_v19 = vadd.f32 %v1872_v17, %v6111_v52  ;;  %v1874_v22 = vpop.f32.mrb[6].mxu1 }
 0x154   : > { %2207 = vst [vmem:[#allocation2 + $0x80] sm:$0xff] %v5404_v9  ;;  %v5406_v20 = vadd.f32 %v1728_v18, %v6102_v51  ;;  %v1730_v23 = vpop.f32.mrb[7].mxu0  ;;  %2209 = vst [vmem:[#allocation2 + $0x90] sm:$0xff] %v5420_v13  ;;  %v5422_v24 = vadd.f32 %v1874_v22, %v6105_v16  ;;  %v1876_v28 = vpop.f32.mrb[7].mxu1 }
 0x155   : > { %2208 = vst [vmem:[#allocation2 + $0x88] sm:$0xff] %v5405_v14  ;;  %v5407_v25 = vadd.f32 %v1730_v23, %v6108_v15  ;;  %2210 = vst [vmem:[#allocation2 + $0x98] sm:$0xff] %v5421_v19  ;;  %v5423_v26 = vadd.f32 %v1876_v28, %v6111_v52 }
 0x156   : > { %2215 = vst [vmem:[#allocation2 + $0xc0] sm:$0xff] %v5406_v20  ;;  %2217 = vst [vmem:[#allocation2 + $0xd0] sm:$0xff] %v5422_v24 }
 0x157   : > { %2216 = vst [vmem:[#allocation2 + $0xc8] sm:$0xff] %v5407_v25  ;;  %2218 = vst [vmem:[#allocation2 + $0xd8] sm:$0xff] %v5423_v26 }
 0x159   : > { %v1734_v27 = vpop.f32.mrb[8].mxu0  ;;  %v1880_v30 = vpop.f32.mrb[8].mxu1 }
 0x15a   : > { %v5408_v29 = vadd.f32 %v1734_v27, %v6102_v51  ;;  %v1736_v31 = vpop.f32.mrb[9].mxu0  ;;  %v5424_v32 = vadd.f32 %v1880_v30, %v6105_v16  ;;  %v1882_v35 = vpop.f32.mrb[9].mxu1 }
 0x15b   : > { %v5409_v33 = vadd.f32 %v1736_v31, %v6108_v15  ;;  %v1738_v34 = vpop.f32.mrb[10].mxu0  ;;  %v5425_v36 = vadd.f32 %v1882_v35, %v6111_v52  ;;  %v1884_v38 = vpop.f32.mrb[10].mxu1 }
 0x15c   : > { %2223 = vst [vmem:[#allocation2 + $0x100] sm:$0xff] %v5408_v29  ;;  %v5410_v37 = vadd.f32 %v1738_v34, %v6102_v51  ;;  %v1740_v39 = vpop.f32.mrb[11].mxu0  ;;  %2225 = vst [vmem:[#allocation2 + $0x110] sm:$0xff] %v5424_v32  ;;  %v5426_v41 = vadd.f32 %v1884_v38, %v6105_v16  ;;  %v1886_v43 = vpop.f32.mrb[11].mxu1 }
 0x15d   : > { %2224 = vst [vmem:[#allocation2 + $0x108] sm:$0xff] %v5409_v33  ;;  %v5411_v42 = vadd.f32 %v1740_v39, %v6108_v15  ;;  %2226 = vst [vmem:[#allocation2 + $0x118] sm:$0xff] %v5425_v36  ;;  %v5427_v44 = vadd.f32 %v1886_v43, %v6111_v52 }
 0x15e   : > { %2231 = vst [vmem:[#allocation2 + $0x140] sm:$0xff] %v5410_v37  ;;  %2233 = vst [vmem:[#allocation2 + $0x150] sm:$0xff] %v5426_v41 }
 0x15f   : > { %2232 = vst [vmem:[#allocation2 + $0x148] sm:$0xff] %v5411_v42  ;;  %2234 = vst [vmem:[#allocation2 + $0x158] sm:$0xff] %v5427_v44 }
 0x161   : > { %v1744_v46 = vpop.f32.mrb[12].mxu0  ;;  %v1890_v47 = vpop.f32.mrb[12].mxu1 }
 0x162   : > { %v5412_v45 = vadd.f32 %v1744_v46, %v6102_v51  ;;  %v1746_v48 = vpop.f32.mrb[13].mxu0  ;;  %v5428_v49 = vadd.f32 %v1890_v47, %v6105_v16  ;;  %v1892_v21 = vpop.f32.mrb[13].mxu1 }
 0x163   : > { %v5413_v53 = vadd.f32 %v1746_v48, %v6108_v15  ;;  %v1748_v56 = vpop.f32.mrb[14].mxu0  ;;  %v5429_v50 = vadd.f32 %v1892_v21, %v6111_v52  ;;  %v1894_v54 = vpop.f32.mrb[14].mxu1 }
 0x164   : > { %2239 = vst [vmem:[#allocation2 + $0x180] sm:$0xff] %v5412_v45  ;;  %v5414_v60 = vadd.f32 %v1748_v56, %v6102_v51  ;;  %v1750_v55 = vpop.f32.mrb[15].mxu0  ;;  %2241 = vst [vmem:[#allocation2 + $0x190] sm:$0xff] %v5428_v49  ;;  %v5430_v57 = vadd.f32 %v1894_v54, %v6105_v16  ;;  %v1896_v59 = vpop.f32.mrb[15].mxu1  ;;  %v569_v51 = vsub.s32 6, %v6092_v1  ;;  %v6150_v16 = vrot.slane %v6096_v40, %v561_v62 }
 0x165   : > { %2240 = vst [vmem:[#allocation2 + $0x188] sm:$0xff] %v5413_v53  ;;  %v5415_v58 = vadd.f32 %v1750_v55, %v6108_v15  ;;  %2242 = vst [vmem:[#allocation2 + $0x198] sm:$0xff] %v5429_v50  ;;  %v5431_v61 = vadd.f32 %v1896_v59, %v6111_v52  ;;  %v6159_v52 = vrot.slane %v6096_v40, %v573_v0 }
 0x166   : > { %2247 = vst [vmem:[#allocation2 + $0x1c0] sm:$0xff] %v5414_v60  ;;  %2249 = vst [vmem:[#allocation2 + $0x1d0] sm:$0xff] %v5430_v57  ;;  %v6153_v15 = vrot.slane %v6096_v40, %v569_v51 }
 0x167   : > { %2248 = vst [vmem:[#allocation2 + $0x1c8] sm:$0xff] %v5415_v58  ;;  %2250 = vst [vmem:[#allocation2 + $0x1d8] sm:$0xff] %v5431_v61 }
 0x1a9   : > { %v2006_v3 = vpop.f32.mrb[16].mxu0  ;;  %v2152_v5 = vpop.f32.mrb[16].mxu1 }
 0x1aa   : > { %v5432_v4 = vadd.f32 %v2006_v3, %v6150_v16  ;;  %v2008_v6 = vpop.f32.mrb[17].mxu0  ;;  %v5448_v10 = vadd.f32 %v2152_v5, %v6153_v15  ;;  %v2154_v7 = vpop.f32.mrb[17].mxu1 }
 0x1ab   : > { %v5433_v1 = vadd.f32 %v2008_v6, %v6156_v2  ;;  %v2010_v8 = vpop.f32.mrb[18].mxu0  ;;  %v5449_v9 = vadd.f32 %v2154_v7, %v6159_v52  ;;  %v2156_v12 = vpop.f32.mrb[18].mxu1 }
 0x1ac   : > { %2195 = vst [vmem:[#allocation2 + $0x20] sm:$0xff] %v5432_v4  ;;  %v5434_v11 = vadd.f32 %v2010_v8, %v6150_v16  ;;  %v2012_v13 = vpop.f32.mrb[19].mxu0  ;;  %2197 = vst [vmem:[#allocation2 + $0x30] sm:$0xff] %v5448_v10  ;;  %v5450_v40 = vadd.f32 %v2156_v12, %v6153_v15  ;;  %v2158_v17 = vpop.f32.mrb[19].mxu1 }
 0x1ad   : > { %2196 = vst [vmem:[#allocation2 + $0x28] sm:$0xff] %v5433_v1  ;;  %v5435_v14 = vadd.f32 %v2012_v13, %v6156_v2  ;;  %2198 = vst [vmem:[#allocation2 + $0x38] sm:$0xff] %v5449_v9  ;;  %v5451_v18 = vadd.f32 %v2158_v17, %v6159_v52 }
 0x1ae   : > { %2203 = vst [vmem:[#allocation2 + $0x60] sm:$0xff] %v5434_v11  ;;  %2205 = vst [vmem:[#allocation2 + $0x70] sm:$0xff] %v5450_v40 }
 0x1af   : > { %2204 = vst [vmem:[#allocation2 + $0x68] sm:$0xff] %v5435_v14  ;;  %2206 = vst [vmem:[#allocation2 + $0x78] sm:$0xff] %v5451_v18 }
 0x1b1   : > { %v2016_v19 = vpop.f32.mrb[20].mxu0  ;;  %v2162_v22 = vpop.f32.mrb[20].mxu1 }
 0x1b2   : > { %v5436_v20 = vadd.f32 %v2016_v19, %v6150_v16  ;;  %v2018_v23 = vpop.f32.mrb[21].mxu0  ;;  %v5452_v24 = vadd.f32 %v2162_v22, %v6153_v15  ;;  %v2164_v28 = vpop.f32.mrb[21].mxu1 }
 0x1b3   : > { %v5437_v25 = vadd.f32 %v2018_v23, %v6156_v2  ;;  %v2020_v26 = vpop.f32.mrb[22].mxu0  ;;  %v5453_v27 = vadd.f32 %v2164_v28, %v6159_v52  ;;  %v2166_v30 = vpop.f32.mrb[22].mxu1 }
 0x1b4   : > { %2211 = vst [vmem:[#allocation2 + $0xa0] sm:$0xff] %v5436_v20  ;;  %v5438_v29 = vadd.f32 %v2020_v26, %v6150_v16  ;;  %v2022_v31 = vpop.f32.mrb[23].mxu0  ;;  %2213 = vst [vmem:[#allocation2 + $0xb0] sm:$0xff] %v5452_v24  ;;  %v5454_v32 = vadd.f32 %v2166_v30, %v6153_v15  ;;  %v2168_v35 = vpop.f32.mrb[23].mxu1 }
 0x1b5   : > { %2212 = vst [vmem:[#allocation2 + $0xa8] sm:$0xff] %v5437_v25  ;;  %v5439_v33 = vadd.f32 %v2022_v31, %v6156_v2  ;;  %2214 = vst [vmem:[#allocation2 + $0xb8] sm:$0xff] %v5453_v27  ;;  %v5455_v34 = vadd.f32 %v2168_v35, %v6159_v52 }
 0x1b6   : > { %2219 = vst [vmem:[#allocation2 + $0xe0] sm:$0xff] %v5438_v29  ;;  %2221 = vst [vmem:[#allocation2 + $0xf0] sm:$0xff] %v5454_v32 }
 0x1b7   : > { %2220 = vst [vmem:[#allocation2 + $0xe8] sm:$0xff] %v5439_v33  ;;  %2222 = vst [vmem:[#allocation2 + $0xf8] sm:$0xff] %v5455_v34 }
 0x1b9   : > { %v2026_v36 = vpop.f32.mrb[24].mxu0  ;;  %v2172_v38 = vpop.f32.mrb[24].mxu1 }
 0x1ba   : > { %v5440_v37 = vadd.f32 %v2026_v36, %v6150_v16  ;;  %v2028_v39 = vpop.f32.mrb[25].mxu0  ;;  %v5456_v41 = vadd.f32 %v2172_v38, %v6153_v15  ;;  %v2174_v43 = vpop.f32.mrb[25].mxu1 }
 0x1bb   : > { %v5441_v42 = vadd.f32 %v2028_v39, %v6156_v2  ;;  %v2030_v44 = vpop.f32.mrb[26].mxu0  ;;  %v5457_v46 = vadd.f32 %v2174_v43, %v6159_v52  ;;  %v2176_v47 = vpop.f32.mrb[26].mxu1 }
 0x1bc   : > { %2227 = vst [vmem:[#allocation2 + $0x120] sm:$0xff] %v5440_v37  ;;  %v5442_v45 = vadd.f32 %v2030_v44, %v6150_v16  ;;  %v2032_v48 = vpop.f32.mrb[27].mxu0  ;;  %2229 = vst [vmem:[#allocation2 + $0x130] sm:$0xff] %v5456_v41  ;;  %v5458_v49 = vadd.f32 %v2176_v47, %v6153_v15  ;;  %v2178_v21 = vpop.f32.mrb[27].mxu1 }
 0x1bd   : > { %2228 = vst [vmem:[#allocation2 + $0x128] sm:$0xff] %v5441_v42  ;;  %v5443_v53 = vadd.f32 %v2032_v48, %v6156_v2  ;;  %2230 = vst [vmem:[#allocation2 + $0x138] sm:$0xff] %v5457_v46  ;;  %v5459_v56 = vadd.f32 %v2178_v21, %v6159_v52 }
 0x1be   : > { %2235 = vst [vmem:[#allocation2 + $0x160] sm:$0xff] %v5442_v45  ;;  %2237 = vst [vmem:[#allocation2 + $0x170] sm:$0xff] %v5458_v49 }
 0x1bf   : > { %2236 = vst [vmem:[#allocation2 + $0x168] sm:$0xff] %v5443_v53  ;;  %2238 = vst [vmem:[#allocation2 + $0x178] sm:$0xff] %v5459_v56 }
 0x1c1   : > { %v2036_v50 = vpop.f32.mrb[28].mxu0  ;;  %v2182_v54 = vpop.f32.mrb[28].mxu1 }
 0x1c2   : > { %v5444_v60 = vadd.f32 %v2036_v50, %v6150_v16  ;;  %v2038_v55 = vpop.f32.mrb[29].mxu0  ;;  %v5460_v57 = vadd.f32 %v2182_v54, %v6153_v15  ;;  %v2184_v59 = vpop.f32.mrb[29].mxu1 }
 0x1c3   : > { %v5445_v58 = vadd.f32 %v2038_v55, %v6156_v2  ;;  %v2040_v61 = vpop.f32.mrb[30].mxu0  ;;  %v5461_v62 = vadd.f32 %v2184_v59, %v6159_v52  ;;  %v2186_v63 = vpop.f32.mrb[30].mxu1 }
 0x1c4   : > { %2243 = vst [vmem:[#allocation2 + $0x1a0] sm:$0xff] %v5444_v60  ;;  %v5446_v51 = vadd.f32 %v2040_v61, %v6150_v16  ;;  %v2042_v0 = vpop.f32.mrb[31].mxu0  ;;  %2245 = vst [vmem:[#allocation2 + $0x1b0] sm:$0xff] %v5460_v57  ;;  %v5462_v3 = vadd.f32 %v2186_v63, %v6153_v15  ;;  %v2188_v5 = vpop.f32.mrb[31].mxu1 }
 0x1c5   : > { %2244 = vst [vmem:[#allocation2 + $0x1a8] sm:$0xff] %v5445_v58  ;;  %v5447_v4 = vadd.f32 %v2042_v0, %v6156_v2  ;;  %2246 = vst [vmem:[#allocation2 + $0x1b8] sm:$0xff] %v5461_v62  ;;  %v5463_v6 = vadd.f32 %v2188_v5, %v6159_v52 }
 0x1c6   : > { %2251 = vst [vmem:[#allocation2 + $0x1e0] sm:$0xff] %v5446_v51  ;;  %2253 = vst [vmem:[#allocation2 + $0x1f0] sm:$0xff] %v5462_v3 }
 0x1c7   : > { %2252 = vst [vmem:[#allocation2 + $0x1e8] sm:$0xff] %v5447_v4  ;;  %2254 = vst [vmem:[#allocation2 + $0x1f8] sm:$0xff] %v5463_v6 }
 0x1c8 PF: > { %p5049_p5 = scmp.le.s32.totalorder %s5754_s28, 0 }
 0x1c9   : > { %v2283_v16 = vld [vmem:[%s5768_s16] sm:$0xff] (!%p5049_p5)  ;;  %v2284_v2 = vld [vmem:[%s5768_s16 + $0x8] sm:$0xff] (!%p5049_p5)  ;;  %v2262_v59 = vld [vmem:[#allocation3 + $0x18] sm:$0xff] (!%p5049_p5) }
 0x1ca   : > { %2258 = sbr.rel (%p5049_p5) target bundleno = 831 (0x33f), region = 60  ;;  %v2287_v15 = vld [vmem:[%s5768_s16 + $0x20] sm:$0xff] (!%p5049_p5)  ;;  %v2288_v10 = vld [vmem:[%s5768_s16 + $0x28] sm:$0xff] (!%p5049_p5) }
 0x1cb   : > { %v5051_v52 = vcombine.high (!%p5049_p5), %v2283_v16, %v2287_v15  ;;  %v5050_v1 = vcombine.low (!%p5049_p5), %v2283_v16, %v2287_v15  ;;  %v2291_v7 = vld [vmem:[%s5768_s16 + $0x40] sm:$0xff] (!%p5049_p5)  ;;  %v5053_v9 = vcombine.high (!%p5049_p5), %v2284_v2, %v2288_v10  ;;  %v5052_v11 = vcombine.low (!%p5049_p5), %v2284_v2, %v2288_v10  ;;  %v2292_v13 = vld [vmem:[%s5768_s16 + $0x48] sm:$0xff] (!%p5049_p5) }
 0x1cc   : > { %v2295_v8 = vld [vmem:[%s5768_s16 + $0x60] sm:$0xff] (!%p5049_p5)  ;;  %v2296_v40 = vld [vmem:[%s5768_s16 + $0x68] sm:$0xff] (!%p5049_p5) }
 0x1cd   : > { %v5059_v12 = vcombine.high (!%p5049_p5), %v2291_v7, %v2295_v8  ;;  %v2299_v14 = vld [vmem:[%s5768_s16 + $0x80] sm:$0xff] (!%p5049_p5)  ;;  %3093 = vmatprep.subr.bf16.mxu0 (!%p5049_p5), %v5051_v52  ;;  %v5061_v17 = vcombine.high (!%p5049_p5), %v2292_v13, %v2296_v40  ;;  %v2300_v19 = vld [vmem:[%s5768_s16 + $0x88] sm:$0xff] (!%p5049_p5)  ;;  %3166 = vmatprep.subr.bf16.mxu1 (!%p5049_p5), %v5053_v9  ;;  %v5058_v22 = vcombine.low (!%p5049_p5), %v2291_v7, %v2295_v8 }
 0x1ce   : > { %v2303_v18 = vld [vmem:[%s5768_s16 + $0xa0] sm:$0xff] (!%p5049_p5)  ;;  %v2304_v20 = vld [vmem:[%s5768_s16 + $0xa8] sm:$0xff] (!%p5049_p5)  ;;  %3094 = vmatpush1.bf16.msra.mxu0 (!%p5049_p5), %v5050_v1  ;;  %3167 = vmatpush1.bf16.msra.mxu1 (!%p5049_p5), %v5052_v11  ;;  %v5060_v23 = vcombine.low (!%p5049_p5), %v2292_v13, %v2296_v40 }
 0x1cf   : > { %3095 = vmatprep.subr.bf16.mxu0 (!%p5049_p5), %v5059_v12  ;;  %v5067_v24 = vcombine.high (!%p5049_p5), %v2299_v14, %v2303_v18  ;;  %3168 = vmatprep.subr.bf16.mxu1 (!%p5049_p5), %v5061_v17  ;;  %v5069_v25 = vcombine.high (!%p5049_p5), %v2300_v19, %v2304_v20  ;;  %v2307_v28 = vld [vmem:[%s5768_s16 + $0xc0] sm:$0xff] (!%p5049_p5)  ;;  %v2308_v27 = vld [vmem:[%s5768_s16 + $0xc8] sm:$0xff] (!%p5049_p5)  ;;  %v5066_v30 = vcombine.low (!%p5049_p5), %v2299_v14, %v2303_v18 }
 0x1d0   : > { %v2311_v26 = vld [vmem:[%s5768_s16 + $0xe0] sm:$0xff] (!%p5049_p5)  ;;  %v2312_v29 = vld [vmem:[%s5768_s16 + $0xe8] sm:$0xff] (!%p5049_p5)  ;;  %v5068_v31 = vcombine.low (!%p5049_p5), %v2300_v19, %v2304_v20 }
 0x1d1   : > { %v5075_v32 = vcombine.high %v2307_v28, %v2311_v26  ;;  %v5077_v33 = vcombine.high %v2308_v27, %v2312_v29  ;;  %v2315_v35 = vld [vmem:[%s5768_s16 + $0x100] sm:$0xff]  ;;  %v2316_v36 = vld [vmem:[%s5768_s16 + $0x108] sm:$0xff]  ;;  %v5074_v38 = vcombine.low %v2307_v28, %v2311_v26  ;;  %v5076_v39 = vcombine.low %v2308_v27, %v2312_v29 }
 0x1d2   : > { %3096 = vmatpush1.bf16.msra.mxu0 %v5058_v22  ;;  %3169 = vmatpush1.bf16.msra.mxu1 %v5060_v23  ;;  %v2319_v34 = vld [vmem:[%s5768_s16 + $0x120] sm:$0xff]  ;;  %v2320_v37 = vld [vmem:[%s5768_s16 + $0x128] sm:$0xff] }
 0x1d3   : > { %3097 = vmatprep.subr.bf16.mxu0 %v5067_v24  ;;  %3170 = vmatprep.subr.bf16.mxu1 %v5069_v25  ;;  %v5083_v41 = vcombine.high %v2315_v35, %v2319_v34  ;;  %v5085_v42 = vcombine.high %v2316_v36, %v2320_v37  ;;  %v2323_v43 = vld [vmem:[%s5768_s16 + $0x140] sm:$0xff]  ;;  %v2324_v46 = vld [vmem:[%s5768_s16 + $0x148] sm:$0xff]  ;;  %v5082_v47 = vcombine.low %v2315_v35, %v2319_v34 }
 0x1d4   : > { %v2327_v44 = vld [vmem:[%s5768_s16 + $0x160] sm:$0xff]  ;;  %v2328_v45 = vld [vmem:[%s5768_s16 + $0x168] sm:$0xff]  ;;  %v5084_v48 = vcombine.low %v2316_v36, %v2320_v37 }
 0x1d5   : > { %v5091_v49 = vcombine.high %v2323_v43, %v2327_v44  ;;  %v5093_v53 = vcombine.high %v2324_v46, %v2328_v45  ;;  %v2331_v21 = vld [vmem:[%s5768_s16 + $0x180] sm:$0xff]  ;;  %v2332_v50 = vld [vmem:[%s5768_s16 + $0x188] sm:$0xff]  ;;  %v5090_v54 = vcombine.low %v2323_v43, %v2327_v44  ;;  %v5092_v55 = vcombine.low %v2324_v46, %v2328_v45 }
 0x1d6   : > { %3098 = vmatpush1.bf16.msra.mxu0 %v5066_v30  ;;  %3171 = vmatpush1.bf16.msra.mxu1 %v5068_v31  ;;  %v2335_v56 = vld [vmem:[%s5768_s16 + $0x1a0] sm:$0xff]  ;;  %v2336_v60 = vld [vmem:[%s5768_s16 + $0x1a8] sm:$0xff] }
 0x1d7   : > { %3099 = vmatprep.subr.bf16.mxu0 %v5075_v32  ;;  %3172 = vmatprep.subr.bf16.mxu1 %v5077_v33  ;;  %v5099_v57 = vcombine.high %v2331_v21, %v2335_v56  ;;  %v2260_v58 = vld [vmem:[#allocation3 + $0x8] sm:$0xff]  ;;  %v5101_v61 = vcombine.high %v2332_v50, %v2336_v60  ;;  %v2339_v62 = vld [vmem:[%s5768_s16 + $0x1c0] sm:$0xff]  ;;  %v5098_v4 = vcombine.low %v2331_v21, %v2335_v56 }
 0x1d8   : > { %v2343_v51 = vld [vmem:[%s5768_s16 + $0x1e0] sm:$0xff]  ;;  %v6224_v63 = vpack.c.bf16 %v2262_v59, %v2260_v58  ;;  %v2340_v0 = vld [vmem:[%s5768_s16 + $0x1c8] sm:$0xff]  ;;  %v5100_v5 = vcombine.low %v2332_v50, %v2336_v60 }
 0x1d9   : > { %v2344_v3 = vld [vmem:[%s5768_s16 + $0x1e8] sm:$0xff]  ;;  %v5107_v6 = vcombine.high %v2339_v62, %v2343_v51  ;;  %v2347_v15 = vld [vmem:[%s5768_s16 + $0x200] sm:$0xff]  ;;  %v5106_v1 = vcombine.low %v2339_v62, %v2343_v51 }
 0x1da   : > { %3100 = vmatpush1.bf16.msra.mxu0 %v5074_v38  ;;  %3173 = vmatpush1.bf16.msra.mxu1 %v5076_v39  ;;  %v5109_v16 = vcombine.high %v2340_v0, %v2344_v3  ;;  %v2351_v2 = vld [vmem:[%s5768_s16 + $0x220] sm:$0xff]  ;;  %v2348_v52 = vld [vmem:[%s5768_s16 + $0x208] sm:$0xff]  ;;  %v5108_v7 = vcombine.low %v2340_v0, %v2344_v3 }
 0x1db   : > { %3101 = vmatprep.subr.bf16.mxu0 %v5083_v41  ;;  %3174 = vmatprep.subr.bf16.mxu1 %v5085_v42  ;;  %v2352_v10 = vld [vmem:[%s5768_s16 + $0x228] sm:$0xff]  ;;  %v5115_v8 = vcombine.high %v2347_v15, %v2351_v2  ;;  %v2355_v11 = vld [vmem:[%s5768_s16 + $0x240] sm:$0xff]  ;;  %v5114_v14 = vcombine.low %v2347_v15, %v2351_v2  ;;  %v2285_v2 = vld [vmem:[%s5768_s16 + $0x10] sm:$0xff] }
 0x1dc   : > { %3125 = vmatprep.mubr.bf16.mxu0 %v6224_v63  ;;  %3198 = vmatprep.mubr.bf16.mxu1 %v6224_v63  ;;  %v5117_v9 = vcombine.high %v2348_v52, %v2352_v10  ;;  %v2359_v12 = vld [vmem:[%s5768_s16 + $0x260] sm:$0xff]  ;;  %v2356_v13 = vld [vmem:[%s5768_s16 + $0x248] sm:$0xff]  ;;  %v5116_v17 = vcombine.low %v2348_v52, %v2352_v10  ;;  %v2289_v52 = vld [vmem:[%s5768_s16 + $0x30] sm:$0xff] }
 0x1dd   : > { %v2360_v40 = vld [vmem:[%s5768_s16 + $0x268] sm:$0xff]  ;;  %v5123_v18 = vcombine.high %v2355_v11, %v2359_v12  ;;  %v2363_v20 = vld [vmem:[%s5768_s16 + $0x280] sm:$0xff]  ;;  %v5122_v25 = vcombine.low %v2355_v11, %v2359_v12  ;;  %v2286_v10 = vld [vmem:[%s5768_s16 + $0x18] sm:$0xff]  ;;  %v5055_v12 = vcombine.high %v2285_v2, %v2289_v52 }
 0x1de   : > { %3102 = vmatpush1.bf16.msra.mxu0 %v5082_v47  ;;  %3175 = vmatpush1.bf16.msra.mxu1 %v5084_v48  ;;  %v5125_v19 = vcombine.high %v2356_v13, %v2360_v40  ;;  %v2367_v22 = vld [vmem:[%s5768_s16 + $0x2a0] sm:$0xff]  ;;  %v2364_v23 = vld [vmem:[%s5768_s16 + $0x288] sm:$0xff]  ;;  %v5124_v28 = vcombine.low %v2356_v13, %v2360_v40  ;;  %v2293_v40 = vld [vmem:[%s5768_s16 + $0x50] sm:$0xff] }
 0x1df   : > { %3103 = vmatprep.subr.bf16.mxu0 %v5091_v49  ;;  %3176 = vmatprep.subr.bf16.mxu1 %v5093_v53  ;;  %v2368_v24 = vld [vmem:[%s5768_s16 + $0x2a8] sm:$0xff]  ;;  %v5131_v26 = vcombine.high %v2363_v20, %v2367_v22  ;;  %v2371_v29 = vld [vmem:[%s5768_s16 + $0x2c0] sm:$0xff]  ;;  %v5130_v33 = vcombine.low %v2363_v20, %v2367_v22  ;;  %v2266_v22 = vld [vmem:[#allocation3 + $0x38] sm:$0xff] }
 0x1e0   : > { %v5133_v27 = vcombine.high %v2364_v23, %v2368_v24  ;;  %v2375_v30 = vld [vmem:[%s5768_s16 + $0x2e0] sm:$0xff]  ;;  %v2372_v31 = vld [vmem:[%s5768_s16 + $0x2c8] sm:$0xff]  ;;  %v5132_v35 = vcombine.low %v2364_v23, %v2368_v24  ;;  %v5054_v23 = vcombine.low %v2285_v2, %v2289_v52 }
 0x1e1   : > { %v2376_v32 = vld [vmem:[%s5768_s16 + $0x2e8] sm:$0xff]  ;;  %v5139_v34 = vcombine.high %v2371_v29, %v2375_v30  ;;  %v2379_v37 = vld [vmem:[%s5768_s16 + $0x300] sm:$0xff]  ;;  %v5138_v42 = vcombine.low %v2371_v29, %v2375_v30  ;;  %v2302_v30 = vld [vmem:[%s5768_s16 + $0x98] sm:$0xff] }
 0x1e2   : > { %3104 = vmatpush1.bf16.msra.mxu0 %v5090_v54  ;;  %3177 = vmatpush1.bf16.msra.mxu1 %v5092_v55  ;;  %v5141_v36 = vcombine.high %v2372_v31, %v2376_v32  ;;  %v2383_v38 = vld [vmem:[%s5768_s16 + $0x320] sm:$0xff]  ;;  %v2380_v39 = vld [vmem:[%s5768_s16 + $0x308] sm:$0xff]  ;;  %v5140_v43 = vcombine.low %v2372_v31, %v2376_v32  ;;  %v2306_v31 = vld [vmem:[%s5768_s16 + $0xb8] sm:$0xff] }
 0x1e3   : > { %3105 = vmatprep.subr.bf16.mxu0 %v5099_v57  ;;  %3178 = vmatprep.subr.bf16.mxu1 %v5101_v61  ;;  %v2384_v41 = vld [vmem:[%s5768_s16 + $0x328] sm:$0xff]  ;;  %v5147_v44 = vcombine.high %v2379_v37, %v2383_v38  ;;  %v2387_v45 = vld [vmem:[%s5768_s16 + $0x340] sm:$0xff]  ;;  %v5146_v53 = vcombine.low %v2379_v37, %v2383_v38  ;;  %v5073_v37 = vcombine.high %v2302_v30, %v2306_v31  ;;  %v2309_v38 = vld [vmem:[%s5768_s16 + $0xd0] sm:$0xff] }
 0x1e4   : > { %v5149_v46 = vcombine.high %v2380_v39, %v2384_v41  ;;  %v2391_v47 = vld [vmem:[%s5768_s16 + $0x360] sm:$0xff]  ;;  %v2388_v48 = vld [vmem:[%s5768_s16 + $0x348] sm:$0xff]  ;;  %v5148_v21 = vcombine.low %v2380_v39, %v2384_v41  ;;  %v2313_v39 = vld [vmem:[%s5768_s16 + $0xf0] sm:$0xff] }
 0x1e5   : > { %v2392_v49 = vld [vmem:[%s5768_s16 + $0x368] sm:$0xff]  ;;  %v5155_v56 = vcombine.high %v2387_v45, %v2391_v47  ;;  %v2395_v60 = vld [vmem:[%s5768_s16 + $0x380] sm:$0xff]  ;;  %v5154_v58 = vcombine.low %v2387_v45, %v2391_v47  ;;  %v2310_v41 = vld [vmem:[%s5768_s16 + $0xd8] sm:$0xff]  ;;  %v5072_v47 = vcombine.low %v2302_v30, %v2306_v31 }
 0x1e6   : > { %3106 = vmatpush1.bf16.msra.mxu0 %v5098_v4  ;;  %3179 = vmatpush1.bf16.msra.mxu1 %v5100_v5  ;;  %v5157_v50 = vcombine.high %v2388_v48, %v2392_v49  ;;  %v2399_v54 = vld [vmem:[%s5768_s16 + $0x3a0] sm:$0xff]  ;;  %v2396_v55 = vld [vmem:[%s5768_s16 + $0x388] sm:$0xff]  ;;  %v5156_v59 = vcombine.low %v2388_v48, %v2392_v49  ;;  %v5079_v48 = vcombine.high %v2309_v38, %v2313_v39  ;;  %v2349_v30 = vld [vmem:[%s5768_s16 + $0x210] sm:$0xff] }
 0x1e7   : > { %3107 = vmatprep.subr.bf16.mxu0 %v5107_v6  ;;  %3180 = vmatprep.subr.bf16.mxu1 %v5109_v16  ;;  %v2400_v57 = vld [vmem:[%s5768_s16 + $0x3a8] sm:$0xff]  ;;  %v5163_v61 = vcombine.high %v2395_v60, %v2399_v54  ;;  %v2403_v51 = vld [vmem:[%s5768_s16 + $0x3c0] sm:$0xff]  ;;  %v5162_v5 = vcombine.low %v2395_v60, %v2399_v54  ;;  %v2322_v60 = vld [vmem:[%s5768_s16 + $0x138] sm:$0xff]  ;;  %v5078_v54 = vcombine.low %v2309_v38, %v2313_v39 }
 0x1e8   : > { %v5165_v62 = vcombine.high %v2396_v55, %v2400_v57  ;;  %v2407_v0 = vld [vmem:[%s5768_s16 + $0x3e0] sm:$0xff]  ;;  %v2404_v3 = vld [vmem:[%s5768_s16 + $0x3c8] sm:$0xff]  ;;  %v5164_v6 = vcombine.low %v2396_v55, %v2400_v57  ;;  %v2269_v57 = vld [vmem:[#allocation3 + $0x50] sm:$0xff] }
 0x1e9   : > { %v2408_v4 = vld [vmem:[%s5768_s16 + $0x3e8] sm:$0xff]  ;;  %v5171_v16 = vcombine.high %v2403_v51, %v2407_v0  ;;  %v2267_v55 = vld [vmem:[#allocation3 + $0x40] sm:$0xff]  ;;  %v2353_v31 = vld [vmem:[%s5768_s16 + $0x230] sm:$0xff] }
 0x1ea   : > { %3108 = vmatpush1.bf16.msra.mxu0 %v5106_v1  ;;  %3181 = vmatpush1.bf16.msra.mxu1 %v5108_v7  ;;  %v5173_v15 = vcombine.high %v2404_v3, %v2408_v4  ;;  %v2290_v1 = vld [vmem:[%s5768_s16 + $0x38] sm:$0xff]  ;;  %v5170_v7 = vcombine.low %v2403_v51, %v2407_v0  ;;  %v5172_v11 = vcombine.low %v2404_v3, %v2408_v4  ;;  %v2264_v20 = vld [vmem:[#allocation3 + $0x28] sm:$0xff]  ;;  %v2329_v51 = vld [vmem:[%s5768_s16 + $0x170] sm:$0xff] }
 0x1eb   : > { %3109 = vmatprep.subr.bf16.mxu0 %v5115_v8  ;;  %3182 = vmatprep.subr.bf16.mxu1 %v5117_v9  ;;  %v2259_v8 = vld [vmem:[#allocation3] sm:$0xff]  ;;  %v2261_v9 = vld [vmem:[#allocation3 + $0x10] sm:$0xff]  ;;  %v5057_v13 = vcombine.high %v2286_v10, %v2290_v1  ;;  %v5056_v24 = vcombine.low %v2286_v10, %v2290_v1  ;;  %v6274_v29 = vpack.c.bf16 %v2266_v22, %v2264_v20  ;;  %v2326_v0 = vld [vmem:[%s5768_s16 + $0x158] sm:$0xff] }
 0x1ec   : > { %v2330_v3 = vld [vmem:[%s5768_s16 + $0x178] sm:$0xff]  ;;  %v6302_v4 = vpack.c.bf16 %v2269_v57, %v2267_v55  ;;  %v2333_v10 = vld [vmem:[%s5768_s16 + $0x190] sm:$0xff] }
 0x1ed   : > { %v5097_v52 = vcombine.high %v2326_v0, %v2330_v3  ;;  %v2337_v1 = vld [vmem:[%s5768_s16 + $0x1b0] sm:$0xff]  ;;  %v2342_v22 = vld [vmem:[%s5768_s16 + $0x1d8] sm:$0xff] }
 0x1ee   : > { %3110 = vmatpush1.bf16.msra.mxu0 %v5114_v14  ;;  %3183 = vmatpush1.bf16.msra.mxu1 %v5116_v17  ;;  %v2297_v14 = vld [vmem:[%s5768_s16 + $0x70] sm:$0xff]  ;;  %v2294_v17 = vld [vmem:[%s5768_s16 + $0x58] sm:$0xff] }
 0x1ef   : > { %3111 = vmatprep.subr.bf16.mxu0 %v5123_v18  ;;  %3184 = vmatprep.subr.bf16.mxu1 %v5125_v19  ;;  %v6269_v18 = vpack.c.bf16 %v2261_v9, %v2259_v8  ;;  %v2298_v19 = vld [vmem:[%s5768_s16 + $0x78] sm:$0xff]  ;;  %v5062_v32 = vcombine.low %v2293_v40, %v2297_v14  ;;  %v2345_v20 = vld [vmem:[%s5768_s16 + $0x1f0] sm:$0xff] }
 0x1f0   : > { %v2334_v8 = vld [vmem:[%s5768_s16 + $0x198] sm:$0xff]  ;;  %v2357_v38 = vld [vmem:[%s5768_s16 + $0x250] sm:$0xff] }
 0x1f1   : > { %v2338_v9 = vld [vmem:[%s5768_s16 + $0x1b8] sm:$0xff]  ;;  %v2361_v39 = vld [vmem:[%s5768_s16 + $0x270] sm:$0xff] }
 0x1f2   : > { %3112 = vmatpush1.bf16.msra.mxu0 %v5122_v25  ;;  %3185 = vmatpush1.bf16.msra.mxu1 %v5124_v28  ;;  %v5063_v25 = vcombine.high %v2293_v40, %v2297_v14  ;;  %v5065_v28 = vcombine.high %v2294_v17, %v2298_v19  ;;  %v5096_v40 = vcombine.low %v2326_v0, %v2330_v3  ;;  %v2373_v55 = vld [vmem:[%s5768_s16 + $0x2d0] sm:$0xff] }
 0x1f3   : > { %3113 = vmatprep.subr.bf16.mxu0 %v5131_v26  ;;  %3186 = vmatprep.subr.bf16.mxu1 %v5133_v27  ;;  %v2301_v26 = vld [vmem:[%s5768_s16 + $0x90] sm:$0xff]  ;;  %v5103_v14 = vcombine.high %v2333_v10, %v2337_v1 }
 0x1f4   : > { %v2305_v27 = vld [vmem:[%s5768_s16 + $0xb0] sm:$0xff] }
 0x1f5   : > { %v5070_v45 = vcombine.low %v2301_v26, %v2305_v27  ;;  %v2377_v57 = vld [vmem:[%s5768_s16 + $0x2f0] sm:$0xff] }
 0x1f6   : > { %3114 = vmatpush1.bf16.msra.mxu0 %v5130_v33  ;;  %3187 = vmatpush1.bf16.msra.mxu1 %v5132_v35  ;;  %v2263_v33 = vld [vmem:[#allocation3 + $0x20] sm:$0xff]  ;;  %v2265_v35 = vld [vmem:[#allocation3 + $0x30] sm:$0xff] }
 0x1f7   : > { %3115 = vmatprep.subr.bf16.mxu0 %v5139_v34  ;;  %3188 = vmatprep.subr.bf16.mxu1 %v5141_v36  ;;  %v5064_v34 = vcombine.low %v2294_v17, %v2298_v19  ;;  %v5071_v36 = vcombine.high %v2301_v26, %v2305_v27  ;;  %v5105_v17 = vcombine.high %v2334_v8, %v2338_v9  ;;  %v2341_v19 = vld [vmem:[%s5768_s16 + $0x1d0] sm:$0xff] }
 0x1f8   : > { %v5111_v26 = vcombine.high %v2341_v19, %v2345_v20  ;;  %v2381_v3 = vld [vmem:[%s5768_s16 + $0x310] sm:$0xff] }
 0x1fa   : > { %3116 = vmatpush1.bf16.msra.mxu0 %v5138_v42  ;;  %3189 = vmatpush1.bf16.msra.mxu1 %v5140_v43  ;;  %v2314_v42 = vld [vmem:[%s5768_s16 + $0xf8] sm:$0xff]  ;;  %v6286_v43 = vpack.c.bf16 %v2265_v35, %v2263_v33  ;;  %v5110_v35 = vcombine.low %v2341_v19, %v2345_v20  ;;  %v2401_v19 = vld [vmem:[%s5768_s16 + $0x3b0] sm:$0xff] }
 0x1fb   : > { %3117 = vmatprep.subr.bf16.mxu0 %v5147_v44  ;;  %3190 = vmatprep.subr.bf16.mxu1 %v5149_v46  ;;  %v2268_v44 = vld [vmem:[#allocation3 + $0x48] sm:$0xff]  ;;  %v2270_v46 = vld [vmem:[#allocation3 + $0x58] sm:$0xff]  ;;  %v5081_v49 = vcombine.high %v2310_v41, %v2314_v42 }
 0x1fc   : > { %v2354_v33 = vld [vmem:[%s5768_s16 + $0x238] sm:$0xff] }
 0x1fd   : > { %v2398_v20 = vld [vmem:[%s5768_s16 + $0x398] sm:$0xff] }
 0x1fe   : > { %3118 = vmatpush1.bf16.msra.mxu0 %v5146_v53  ;;  %3191 = vmatpush1.bf16.msra.mxu1 %v5148_v21  ;;  %v2317_v53 = vld [vmem:[%s5768_s16 + $0x110] sm:$0xff] }
 0x1ff   : > { %3119 = vmatprep.subr.bf16.mxu0 %v5155_v56  ;;  %3192 = vmatprep.subr.bf16.mxu1 %v5157_v50  ;;  %v2321_v21 = vld [vmem:[%s5768_s16 + $0x130] sm:$0xff]  ;;  %v6290_v56 = vpack.c.bf16 %v2270_v46, %v2268_v44  ;;  %v2318_v50 = vld [vmem:[%s5768_s16 + $0x118] sm:$0xff]  ;;  %v5118_v44 = vcombine.low %v2349_v30, %v2353_v31 }
 0x202   : > { %3120 = vmatpush1.bf16.msra.mxu0 %v5154_v58  ;;  %3193 = vmatpush1.bf16.msra.mxu1 %v5156_v59  ;;  %v5080_v58 = vcombine.low %v2310_v41, %v2314_v42  ;;  %v5087_v59 = vcombine.high %v2317_v53, %v2321_v21  ;;  %v2358_v41 = vld [vmem:[%s5768_s16 + $0x258] sm:$0xff] }
 0x203   : > { %3121 = vmatprep.subr.bf16.mxu0 %v5163_v61  ;;  %3194 = vmatprep.subr.bf16.mxu1 %v5165_v62  ;;  %v5089_v61 = vcombine.high %v2318_v50, %v2322_v60  ;;  %v2325_v62 = vld [vmem:[%s5768_s16 + $0x150] sm:$0xff]  ;;  %v2362_v42 = vld [vmem:[%s5768_s16 + $0x278] sm:$0xff] }
 0x204   : > { %v5095_v2 = vcombine.high %v2325_v62, %v2329_v51 }
 0x206   : > { %3122 = vmatpush1.bf16.msra.mxu0 %v5162_v5  ;;  %3195 = vmatpush1.bf16.msra.mxu1 %v5164_v6  ;;  %v2272_v5 = vld [vmem:[#allocation3 + $0x68] sm:$0xff]  ;;  %v2274_v6 = vld [vmem:[#allocation3 + $0x78] sm:$0xff] }
 0x207   : > { %3123 = vmatprep.subr.bf16.mxu0 %v5171_v16  ;;  %3196 = vmatprep.subr.bf16.mxu1 %v5173_v15  ;;  %v5086_v16 = vcombine.low %v2317_v53, %v2321_v21  ;;  %v5088_v15 = vcombine.low %v2318_v50, %v2322_v60  ;;  %v2366_v53 = vld [vmem:[%s5768_s16 + $0x298] sm:$0xff]  ;;  %v5126_v50 = vcombine.low %v2357_v38, %v2361_v39 }
 0x208   : > { %v2370_v21 = vld [vmem:[%s5768_s16 + $0x2b8] sm:$0xff] }
 0x20a   : > { %3124 = vmatpush1.bf16.msra.mxu0 %v5170_v7  ;;  %3197 = vmatpush1.bf16.msra.mxu1 %v5172_v11  ;;  %v6306_v7 = vpack.c.bf16 %v2274_v6, %v2272_v5  ;;  %v5094_v11 = vcombine.low %v2325_v62, %v2329_v51  ;;  %v5136_v62 = vcombine.low %v2366_v53, %v2370_v21  ;;  %v2385_v5 = vld [vmem:[%s5768_s16 + $0x330] sm:$0xff]  ;;  %v2382_v6 = vld [vmem:[%s5768_s16 + $0x318] sm:$0xff] }
 0x20b   : > { %3239 = vmatprep.subr.bf16.mxu0 %v5055_v12  ;;  %3312 = vmatprep.subr.bf16.mxu1 %v5057_v13  ;;  %v2271_v12 = vld [vmem:[#allocation3 + $0x60] sm:$0xff]  ;;  %v2273_v13 = vld [vmem:[#allocation3 + $0x70] sm:$0xff]  ;;  %v5143_v51 = vcombine.high %v2373_v55, %v2377_v57 }
 0x20d   : > { %3126 = vmatmul.mubr.bf16.vlgmr.msra.gmra.mrb[0].mxu0 %v6269_v18  ;;  %3199 = vmatmul.mubr.bf16.vlgmr.msra.gmra.mrb[0].mxu1 %v6269_v18 }
 0x20e   : > { %3240 = vmatpush1.bf16.msra.mxu0 %v5054_v23  ;;  %3313 = vmatpush1.bf16.msra.mxu1 %v5056_v24  ;;  %v2346_v23 = vld [vmem:[%s5768_s16 + $0x1f8] sm:$0xff]  ;;  %v6318_v24 = vpack.c.bf16 %v2273_v13, %v2271_v12  ;;  %v5150_v12 = vcombine.low %v2381_v3, %v2385_v5 }
 0x20f   : > { %3241 = vmatprep.subr.bf16.mxu0 %v5063_v25  ;;  %3314 = vmatprep.subr.bf16.mxu1 %v5065_v28  ;;  %v5102_v25 = vcombine.low %v2333_v10, %v2337_v1  ;;  %v5104_v28 = vcombine.low %v2334_v8, %v2338_v9  ;;  %v5113_v27 = vcombine.high %v2342_v22, %v2346_v23  ;;  %v2389_v1 = vld [vmem:[%s5768_s16 + $0x350] sm:$0xff]  ;;  %v2390_v9 = vld [vmem:[%s5768_s16 + $0x358] sm:$0xff] }
 0x210   : > { %3135 = vmatprep.mubr.bf16.mxu0 %v6274_v29  ;;  %3208 = vmatprep.mubr.bf16.mxu1 %v6274_v29  ;;  %v2393_v8 = vld [vmem:[%s5768_s16 + $0x370] sm:$0xff] }
 0x212   : > { %3242 = vmatpush1.bf16.msra.mxu0 %v5062_v32  ;;  %3315 = vmatpush1.bf16.msra.mxu1 %v5064_v34  ;;  %v2350_v32 = vld [vmem:[%s5768_s16 + $0x218] sm:$0xff]  ;;  %v5112_v34 = vcombine.low %v2342_v22, %v2346_v23  ;;  %v5158_v23 = vcombine.low %v2389_v1, %v2393_v8 }
 0x213   : > { %3243 = vmatprep.subr.bf16.mxu0 %v5071_v36  ;;  %3316 = vmatprep.subr.bf16.mxu1 %v5073_v37  ;;  %v5119_v36 = vcombine.high %v2349_v30, %v2353_v31  ;;  %v5121_v37 = vcombine.high %v2350_v32, %v2354_v33  ;;  %v5120_v46 = vcombine.low %v2350_v32, %v2354_v33  ;;  %v2402_v22 = vld [vmem:[%s5768_s16 + $0x3b8] sm:$0xff]  ;;  %v2409_v30 = vld [vmem:[%s5768_s16 + $0x3f0] sm:$0xff] }
 0x214   : > { %v2406_v31 = vld [vmem:[%s5768_s16 + $0x3d8] sm:$0xff] }
 0x215   : > { %3136 = vmatmul.mubr.bf16.gmra.mrb[4].mxu0 %v6286_v43  ;;  %3209 = vmatmul.mubr.bf16.gmra.mrb[4].mxu1 %v6286_v43  ;;  %v2410_v32 = vld [vmem:[%s5768_s16 + $0x3f8] sm:$0xff] }
 0x216   : > { %3244 = vmatpush1.bf16.msra.mxu0 %v5070_v45  ;;  %3317 = vmatpush1.bf16.msra.mxu1 %v5072_v47  ;;  %v5127_v45 = vcombine.high %v2357_v38, %v2361_v39  ;;  %v5129_v47 = vcombine.high %v2358_v41, %v2362_v42  ;;  %v5176_v38 = vcombine.low %v2406_v31, %v2410_v32  ;;  %v6374_v39 = vld [vmem:[%s5773_s19] sm:$0xff] }
 0x217   : > { %3245 = vmatprep.subr.bf16.mxu0 %v5079_v48  ;;  %3318 = vmatprep.subr.bf16.mxu1 %v5081_v49  ;;  %v2365_v48 = vld [vmem:[%s5768_s16 + $0x290] sm:$0xff] }
 0x218   : > { %3145 = vmatprep.mubr.bf16.mxu0 %v6290_v56  ;;  %3218 = vmatprep.mubr.bf16.mxu1 %v6290_v56  ;;  %v2369_v49 = vld [vmem:[%s5768_s16 + $0x2b0] sm:$0xff] }
 0x219   : > { %v5135_v60 = vcombine.high %v2365_v48, %v2369_v49 }
 0x21a   : > { %3246 = vmatpush1.bf16.msra.mxu0 %v5078_v54  ;;  %3319 = vmatpush1.bf16.msra.mxu1 %v5080_v58  ;;  %v5137_v54 = vcombine.high %v2366_v53, %v2370_v21  ;;  %v2374_v58 = vld [vmem:[%s5768_s16 + $0x2d8] sm:$0xff] }
 0x21b   : > { %3247 = vmatprep.subr.bf16.mxu0 %v5087_v59  ;;  %3320 = vmatprep.subr.bf16.mxu1 %v5089_v61  ;;  %v2378_v59 = vld [vmem:[%s5768_s16 + $0x2f8] sm:$0xff]  ;;  %v5134_v61 = vcombine.low %v2365_v48, %v2369_v49 }
 0x21c   : > { %v5145_v0 = vcombine.high %v2374_v58, %v2378_v59 }
 0x21d   : > { %3146 = vmatmul.mubr.bf16.gmra.mrb[8].mxu0 %v6302_v4  ;;  %3219 = vmatmul.mubr.bf16.gmra.mrb[8].mxu1 %v6302_v4 }
 0x21e   : > { %3248 = vmatpush1.bf16.msra.mxu0 %v5086_v16  ;;  %3321 = vmatpush1.bf16.msra.mxu1 %v5088_v15  ;;  %v2386_v16 = vld [vmem:[%s5768_s16 + $0x338] sm:$0xff]  ;;  %v5142_v15 = vcombine.low %v2373_v55, %v2377_v57 }
 0x21f   : > { %3249 = vmatprep.subr.bf16.mxu0 %v5095_v2  ;;  %3322 = vmatprep.subr.bf16.mxu1 %v5097_v52  ;;  %v5144_v2 = vcombine.low %v2374_v58, %v2378_v59  ;;  %v5151_v52 = vcombine.high %v2381_v3, %v2385_v5  ;;  %v5153_v10 = vcombine.high %v2382_v6, %v2386_v16 }
 0x220   : > { %3155 = vmatprep.mubr.bf16.mxu0 %v6306_v7  ;;  %3228 = vmatprep.mubr.bf16.mxu1 %v6306_v7  ;;  %v5152_v13 = vcombine.low %v2382_v6, %v2386_v16 }
 0x222   : > { %3250 = vmatpush1.bf16.msra.mxu0 %v5094_v11  ;;  %3323 = vmatpush1.bf16.msra.mxu1 %v5096_v40  ;;  %v2394_v11 = vld [vmem:[%s5768_s16 + $0x378] sm:$0xff]  ;;  %v5159_v40 = vcombine.high %v2389_v1, %v2393_v8 }
 0x223   : > { %3251 = vmatprep.subr.bf16.mxu0 %v5103_v14  ;;  %3324 = vmatprep.subr.bf16.mxu1 %v5105_v17  ;;  %v5161_v14 = vcombine.high %v2390_v9, %v2394_v11  ;;  %v2397_v17 = vld [vmem:[%s5768_s16 + $0x390] sm:$0xff] }
 0x224   : > { %v5166_v33 = vcombine.low %v2397_v17, %v2401_v19 }
 0x225   : > { %3156 = vmatmul.mubr.bf16.gmra.mrb[12].mxu0 %v6318_v24  ;;  %3229 = vmatmul.mubr.bf16.gmra.mrb[12].mxu1 %v6318_v24 }
 0x226   : > { %3252 = vmatpush1.bf16.msra.mxu0 %v5102_v25  ;;  %3325 = vmatpush1.bf16.msra.mxu1 %v5104_v28  ;;  %v5160_v25 = vcombine.low %v2390_v9, %v2394_v11  ;;  %v5167_v28 = vcombine.high %v2397_v17, %v2401_v19 }
 0x227   : > { %3253 = vmatprep.subr.bf16.mxu0 %v5111_v26  ;;  %3326 = vmatprep.subr.bf16.mxu1 %v5113_v27  ;;  %v5169_v26 = vcombine.high %v2398_v20, %v2402_v22  ;;  %v2405_v27 = vld [vmem:[%s5768_s16 + $0x3d0] sm:$0xff] }
 0x228   : > { %3271 = vmatprep.mubr.bf16.mxu0 %v6224_v63  ;;  %3344 = vmatprep.mubr.bf16.mxu1 %v6224_v63  ;;  %v5128_v63 = vcombine.low %v2358_v41, %v2362_v42 }
 0x22a   : > { %3254 = vmatpush1.bf16.msra.mxu0 %v5110_v35  ;;  %3327 = vmatpush1.bf16.msra.mxu1 %v5112_v34  ;;  %v5168_v35 = vcombine.low %v2398_v20, %v2402_v22  ;;  %v5175_v34 = vcombine.high %v2405_v27, %v2409_v30 }
 0x22b   : > { %3255 = vmatprep.subr.bf16.mxu0 %v5119_v36  ;;  %3328 = vmatprep.subr.bf16.mxu1 %v5121_v37  ;;  %v5177_v36 = vcombine.high %v2406_v31, %v2410_v32  ;;  %v5174_v37 = vcombine.low %v2405_v27, %v2409_v30 }
 0x22e   : > { %3256 = vmatpush1.bf16.msra.mxu0 %v5118_v44  ;;  %3329 = vmatpush1.bf16.msra.mxu1 %v5120_v46 }
 0x22f   : > { %3257 = vmatprep.subr.bf16.mxu0 %v5127_v45  ;;  %3330 = vmatprep.subr.bf16.mxu1 %v5129_v47 }
 0x232   : > { %3258 = vmatpush1.bf16.msra.mxu0 %v5126_v50  ;;  %3331 = vmatpush1.bf16.msra.mxu1 %v5128_v63 }
 0x233   : > { %3259 = vmatprep.subr.bf16.mxu0 %v5135_v60  ;;  %3332 = vmatprep.subr.bf16.mxu1 %v5137_v54 }
 0x236   : > { %3260 = vmatpush1.bf16.msra.mxu0 %v5134_v61  ;;  %3333 = vmatpush1.bf16.msra.mxu1 %v5136_v62 }
 0x237   : > { %3261 = vmatprep.subr.bf16.mxu0 %v5143_v51  ;;  %3334 = vmatprep.subr.bf16.mxu1 %v5145_v0 }
 0x23a   : > { %3262 = vmatpush1.bf16.msra.mxu0 %v5142_v15  ;;  %3335 = vmatpush1.bf16.msra.mxu1 %v5144_v2 }
 0x23b   : > { %3263 = vmatprep.subr.bf16.mxu0 %v5151_v52  ;;  %3336 = vmatprep.subr.bf16.mxu1 %v5153_v10 }
 0x23e   : > { %3264 = vmatpush1.bf16.msra.mxu0 %v5150_v12  ;;  %3337 = vmatpush1.bf16.msra.mxu1 %v5152_v13 }
 0x23f   : > { %3265 = vmatprep.subr.bf16.mxu0 %v5159_v40  ;;  %3338 = vmatprep.subr.bf16.mxu1 %v5161_v14 }
 0x242   : > { %3266 = vmatpush1.bf16.msra.mxu0 %v5158_v23  ;;  %3339 = vmatpush1.bf16.msra.mxu1 %v5160_v25 }
 0x243   : > { %3267 = vmatprep.subr.bf16.mxu0 %v5167_v28  ;;  %3340 = vmatprep.subr.bf16.mxu1 %v5169_v26 }
 0x246   : > { %3268 = vmatpush1.bf16.msra.mxu0 %v5166_v33  ;;  %3341 = vmatpush1.bf16.msra.mxu1 %v5168_v35 }
 0x247   : > { %3269 = vmatprep.subr.bf16.mxu0 %v5175_v34  ;;  %3342 = vmatprep.subr.bf16.mxu1 %v5177_v36 }
 0x24a   : > { %3270 = vmatpush1.bf16.msra.mxu0 %v5174_v37  ;;  %3343 = vmatpush1.bf16.msra.mxu1 %v5176_v38 }
 0x24d   : > { %3272 = vmatmul.mubr.bf16.vlgmr.msra.gmra.mrb[16].mxu0 %v6269_v18  ;;  %3345 = vmatmul.mubr.bf16.vlgmr.msra.gmra.mrb[16].mxu1 %v6269_v18  ;;  %v2413_v18 = vlaneseq }
 0x24e   : > { %3281 = vmatprep.mubr.bf16.mxu0 %v6274_v29  ;;  %3354 = vmatprep.mubr.bf16.mxu1 %v6274_v29 }
 0x24f   : > { %v6370_v29 = vshrl.u32 %v2413_v18, 7 }
 0x251   : > { %v2419_v41 = vsub.s32 1, %v6370_v29 }
 0x255   : > { %3282 = vmatmul.mubr.bf16.gmra.mrb[20].mxu0 %v6286_v43  ;;  %3355 = vmatmul.mubr.bf16.gmra.mrb[20].mxu1 %v6286_v43  ;;  %v2415_v43 = vsub.s32 0, %v6370_v29 }
 0x256   : > { %3291 = vmatprep.mubr.bf16.mxu0 %v6290_v56  ;;  %3364 = vmatprep.mubr.bf16.mxu1 %v6290_v56  ;;  %v2423_v56 = vsub.s32 2, %v6370_v29 }
 0x257   : > { %v6380_v42 = vrot.slane %v6374_v39, %v2415_v43 }
 0x25d   : > { %3292 = vmatmul.mubr.bf16.gmra.mrb[24].mxu0 %v6302_v4  ;;  %3365 = vmatmul.mubr.bf16.gmra.mrb[24].mxu1 %v6302_v4  ;;  %v2427_v4 = vsub.s32 3, %v6370_v29 }
 0x25e   : > { %3301 = vmatprep.mubr.bf16.mxu0 %v6306_v7  ;;  %3374 = vmatprep.mubr.bf16.mxu1 %v6306_v7  ;;  %v6383_v7 = vrot.slane %v6374_v39, %v2423_v56 }
 0x25f   : > { %v6389_v44 = vrot.slane %v6374_v39, %v2427_v4 }
 0x265   : > { %3302 = vmatmul.mubr.bf16.gmra.mrb[28].mxu0 %v6318_v24  ;;  %3375 = vmatmul.mubr.bf16.gmra.mrb[28].mxu1 %v6318_v24  ;;  %v6386_v24 = vrot.slane %v6374_v39, %v2419_v41 }
 0x2e0   : > { %v3127_v46 = vpop.f32.mrb[0].mxu0  ;;  %v3200_v47 = vpop.f32.mrb[0].mxu1 }
 0x2e1   : > { %v3128_v45 = vadd.f32 %v3127_v46, %v6380_v42  ;;  %v3129_v48 = vpop.f32.mrb[1].mxu0  ;;  %v3201_v49 = vadd.f32 %v3200_v47, %v6383_v7  ;;  %v3202_v21 = vpop.f32.mrb[1].mxu1 }
 0x2e2   : > { %v3130_v53 = vadd.f32 %v3129_v48, %v6386_v24  ;;  %v3131_v50 = vpop.f32.mrb[2].mxu0  ;;  %v3203_v63 = vadd.f32 %v3202_v21, %v6389_v44  ;;  %v3204_v54 = vpop.f32.mrb[2].mxu1  ;;  %v2431_v21 = vsub.s32 4, %v6370_v29 }
 0x2e3   : > { %3385 = vst [vmem:[#allocation2] sm:$0xff] %v3128_v45  ;;  %v3132_v60 = vadd.f32 %v3131_v50, %v6380_v42  ;;  %v3133_v55 = vpop.f32.mrb[3].mxu0  ;;  %3387 = vst [vmem:[#allocation2 + $0x10] sm:$0xff] %v3201_v49  ;;  %v3205_v57 = vadd.f32 %v3204_v54, %v6383_v7  ;;  %v3206_v59 = vpop.f32.mrb[3].mxu1  ;;  %v2435_v50 = vsub.s32 5, %v6370_v29 }
 0x2e4   : > { %3386 = vst [vmem:[#allocation2 + $0x8] sm:$0xff] %v3130_v53  ;;  %v3134_v58 = vadd.f32 %v3133_v55, %v6386_v24  ;;  %3388 = vst [vmem:[#allocation2 + $0x18] sm:$0xff] %v3203_v63  ;;  %v3207_v61 = vadd.f32 %v3206_v59, %v6389_v44  ;;  %v2443_v63 = vsub.s32 7, %v6370_v29 }
 0x2e5   : > { %3393 = vst [vmem:[#allocation2 + $0x40] sm:$0xff] %v3132_v60  ;;  %3395 = vst [vmem:[#allocation2 + $0x50] sm:$0xff] %v3205_v57  ;;  %v6434_v60 = vrot.slane %v6374_v39, %v2435_v50 }
 0x2e6   : > { %3394 = vst [vmem:[#allocation2 + $0x48] sm:$0xff] %v3134_v58  ;;  %3396 = vst [vmem:[#allocation2 + $0x58] sm:$0xff] %v3207_v61 }
 0x2e8   : > { %v3137_v62 = vpop.f32.mrb[4].mxu0  ;;  %v3210_v0 = vpop.f32.mrb[4].mxu1 }
 0x2e9   : > { %v3138_v51 = vadd.f32 %v3137_v62, %v6380_v42  ;;  %v3139_v3 = vpop.f32.mrb[5].mxu0  ;;  %v3211_v5 = vadd.f32 %v3210_v0, %v6383_v7  ;;  %v3212_v16 = vpop.f32.mrb[5].mxu1 }
 0x2ea   : > { %v3140_v6 = vadd.f32 %v3139_v3, %v6386_v24  ;;  %v3141_v15 = vpop.f32.mrb[6].mxu0  ;;  %v3213_v2 = vadd.f32 %v3212_v16, %v6389_v44  ;;  %v3214_v10 = vpop.f32.mrb[6].mxu1 }
 0x2eb   : > { %3401 = vst [vmem:[#allocation2 + $0x80] sm:$0xff] %v3138_v51  ;;  %v3142_v52 = vadd.f32 %v3141_v15, %v6380_v42  ;;  %v3143_v1 = vpop.f32.mrb[7].mxu0  ;;  %3403 = vst [vmem:[#allocation2 + $0x90] sm:$0xff] %v3211_v5  ;;  %v3215_v8 = vadd.f32 %v3214_v10, %v6383_v7  ;;  %v3216_v11 = vpop.f32.mrb[7].mxu1 }
 0x2ec   : > { %3402 = vst [vmem:[#allocation2 + $0x88] sm:$0xff] %v3140_v6  ;;  %v3144_v9 = vadd.f32 %v3143_v1, %v6386_v24  ;;  %3404 = vst [vmem:[#allocation2 + $0x98] sm:$0xff] %v3213_v2  ;;  %v3217_v12 = vadd.f32 %v3216_v11, %v6389_v44 }
 0x2ed   : > { %3409 = vst [vmem:[#allocation2 + $0xc0] sm:$0xff] %v3142_v52  ;;  %3411 = vst [vmem:[#allocation2 + $0xd0] sm:$0xff] %v3215_v8 }
 0x2ee   : > { %3410 = vst [vmem:[#allocation2 + $0xc8] sm:$0xff] %v3144_v9  ;;  %3412 = vst [vmem:[#allocation2 + $0xd8] sm:$0xff] %v3217_v12 }
 0x2f0   : > { %v3147_v13 = vpop.f32.mrb[8].mxu0  ;;  %v3220_v14 = vpop.f32.mrb[8].mxu1 }
 0x2f1   : > { %v3148_v40 = vadd.f32 %v3147_v13, %v6380_v42  ;;  %v3149_v17 = vpop.f32.mrb[9].mxu0  ;;  %v3221_v19 = vadd.f32 %v3220_v14, %v6383_v7  ;;  %v3222_v22 = vpop.f32.mrb[9].mxu1 }
 0x2f2   : > { %v3150_v20 = vadd.f32 %v3149_v17, %v6386_v24  ;;  %v3151_v23 = vpop.f32.mrb[10].mxu0  ;;  %v3223_v25 = vadd.f32 %v3222_v22, %v6389_v44  ;;  %v3224_v26 = vpop.f32.mrb[10].mxu1 }
 0x2f3   : > { %3417 = vst [vmem:[#allocation2 + $0x100] sm:$0xff] %v3148_v40  ;;  %v3152_v28 = vadd.f32 %v3151_v23, %v6380_v42  ;;  %v3153_v27 = vpop.f32.mrb[11].mxu0  ;;  %3419 = vst [vmem:[#allocation2 + $0x110] sm:$0xff] %v3221_v19  ;;  %v3225_v30 = vadd.f32 %v3224_v26, %v6383_v7  ;;  %v3226_v32 = vpop.f32.mrb[11].mxu1 }
 0x2f4   : > { %3418 = vst [vmem:[#allocation2 + $0x108] sm:$0xff] %v3150_v20  ;;  %v3154_v31 = vadd.f32 %v3153_v27, %v6386_v24  ;;  %3420 = vst [vmem:[#allocation2 + $0x118] sm:$0xff] %v3223_v25  ;;  %v3227_v33 = vadd.f32 %v3226_v32, %v6389_v44 }
 0x2f5   : > { %3425 = vst [vmem:[#allocation2 + $0x140] sm:$0xff] %v3152_v28  ;;  %3427 = vst [vmem:[#allocation2 + $0x150] sm:$0xff] %v3225_v30 }
 0x2f6   : > { %3426 = vst [vmem:[#allocation2 + $0x148] sm:$0xff] %v3154_v31  ;;  %3428 = vst [vmem:[#allocation2 + $0x158] sm:$0xff] %v3227_v33 }
 0x2f8   : > { %v3157_v35 = vpop.f32.mrb[12].mxu0  ;;  %v3230_v36 = vpop.f32.mrb[12].mxu1 }
 0x2f9   : > { %v3158_v34 = vadd.f32 %v3157_v35, %v6380_v42  ;;  %v3159_v37 = vpop.f32.mrb[13].mxu0  ;;  %v3231_v38 = vadd.f32 %v3230_v36, %v6383_v7  ;;  %v3232_v43 = vpop.f32.mrb[13].mxu1 }
 0x2fa   : > { %v3160_v18 = vadd.f32 %v3159_v37, %v6386_v24  ;;  %v3161_v56 = vpop.f32.mrb[14].mxu0  ;;  %v3233_v41 = vadd.f32 %v3232_v43, %v6389_v44  ;;  %v3234_v46 = vpop.f32.mrb[14].mxu1 }
 0x2fb   : > { %3433 = vst [vmem:[#allocation2 + $0x180] sm:$0xff] %v3158_v34  ;;  %v3162_v4 = vadd.f32 %v3161_v56, %v6380_v42  ;;  %v3163_v45 = vpop.f32.mrb[15].mxu0  ;;  %3435 = vst [vmem:[#allocation2 + $0x190] sm:$0xff] %v3231_v38  ;;  %v3235_v47 = vadd.f32 %v3234_v46, %v6383_v7  ;;  %v3236_v49 = vpop.f32.mrb[15].mxu1  ;;  %v2439_v42 = vsub.s32 6, %v6370_v29  ;;  %v6428_v7 = vrot.slane %v6374_v39, %v2431_v21 }
 0x2fc   : > { %3434 = vst [vmem:[#allocation2 + $0x188] sm:$0xff] %v3160_v18  ;;  %v3164_v48 = vadd.f32 %v3163_v45, %v6386_v24  ;;  %3436 = vst [vmem:[#allocation2 + $0x198] sm:$0xff] %v3233_v41  ;;  %v3237_v53 = vadd.f32 %v3236_v49, %v6389_v44  ;;  %v6437_v44 = vrot.slane %v6374_v39, %v2443_v63 }
 0x2fd   : > { %3441 = vst [vmem:[#allocation2 + $0x1c0] sm:$0xff] %v3162_v4  ;;  %3443 = vst [vmem:[#allocation2 + $0x1d0] sm:$0xff] %v3235_v47  ;;  %v6431_v24 = vrot.slane %v6374_v39, %v2439_v42 }
 0x2fe   : > { %3442 = vst [vmem:[#allocation2 + $0x1c8] sm:$0xff] %v3164_v48  ;;  %3444 = vst [vmem:[#allocation2 + $0x1d8] sm:$0xff] %v3237_v53 }
 0x320   : > { %v3273_v54 = vpop.f32.mrb[16].mxu0  ;;  %v3346_v57 = vpop.f32.mrb[16].mxu1 }
 0x321   : > { %v3274_v55 = vadd.f32 %v3273_v54, %v6428_v7  ;;  %v3275_v58 = vpop.f32.mrb[17].mxu0  ;;  %v3347_v59 = vadd.f32 %v3346_v57, %v6431_v24  ;;  %v3348_v61 = vpop.f32.mrb[17].mxu1 }
 0x322   : > { %v3276_v29 = vadd.f32 %v3275_v58, %v6434_v60  ;;  %v3277_v62 = vpop.f32.mrb[18].mxu0  ;;  %v3349_v51 = vadd.f32 %v3348_v61, %v6437_v44  ;;  %v3350_v3 = vpop.f32.mrb[18].mxu1 }
 0x323   : > { %3389 = vst [vmem:[#allocation2 + $0x20] sm:$0xff] %v3274_v55  ;;  %v3278_v0 = vadd.f32 %v3277_v62, %v6428_v7  ;;  %v3279_v5 = vpop.f32.mrb[19].mxu0  ;;  %3391 = vst [vmem:[#allocation2 + $0x30] sm:$0xff] %v3347_v59  ;;  %v3351_v39 = vadd.f32 %v3350_v3, %v6431_v24  ;;  %v3352_v16 = vpop.f32.mrb[19].mxu1 }
 0x324   : > { %3390 = vst [vmem:[#allocation2 + $0x28] sm:$0xff] %v3276_v29  ;;  %v3280_v6 = vadd.f32 %v3279_v5, %v6434_v60  ;;  %3392 = vst [vmem:[#allocation2 + $0x38] sm:$0xff] %v3349_v51  ;;  %v3353_v15 = vadd.f32 %v3352_v16, %v6437_v44 }
 0x325   : > { %3397 = vst [vmem:[#allocation2 + $0x60] sm:$0xff] %v3278_v0  ;;  %3399 = vst [vmem:[#allocation2 + $0x70] sm:$0xff] %v3351_v39 }
 0x326   : > { %3398 = vst [vmem:[#allocation2 + $0x68] sm:$0xff] %v3280_v6  ;;  %3400 = vst [vmem:[#allocation2 + $0x78] sm:$0xff] %v3353_v15 }
 0x328   : > { %v3283_v2 = vpop.f32.mrb[20].mxu0  ;;  %v3356_v10 = vpop.f32.mrb[20].mxu1 }
 0x329   : > { %v3284_v52 = vadd.f32 %v3283_v2, %v6428_v7  ;;  %v3285_v1 = vpop.f32.mrb[21].mxu0  ;;  %v3357_v8 = vadd.f32 %v3356_v10, %v6431_v24  ;;  %v3358_v11 = vpop.f32.mrb[21].mxu1 }
 0x32a   : > { %v3286_v9 = vadd.f32 %v3285_v1, %v6434_v60  ;;  %v3287_v12 = vpop.f32.mrb[22].mxu0  ;;  %v3359_v13 = vadd.f32 %v3358_v11, %v6437_v44  ;;  %v3360_v14 = vpop.f32.mrb[22].mxu1 }
 0x32b   : > { %3405 = vst [vmem:[#allocation2 + $0xa0] sm:$0xff] %v3284_v52  ;;  %v3288_v40 = vadd.f32 %v3287_v12, %v6428_v7  ;;  %v3289_v17 = vpop.f32.mrb[23].mxu0  ;;  %3407 = vst [vmem:[#allocation2 + $0xb0] sm:$0xff] %v3357_v8  ;;  %v3361_v19 = vadd.f32 %v3360_v14, %v6431_v24  ;;  %v3362_v22 = vpop.f32.mrb[23].mxu1 }
 0x32c   : > { %3406 = vst [vmem:[#allocation2 + $0xa8] sm:$0xff] %v3286_v9  ;;  %v3290_v20 = vadd.f32 %v3289_v17, %v6434_v60  ;;  %3408 = vst [vmem:[#allocation2 + $0xb8] sm:$0xff] %v3359_v13  ;;  %v3363_v23 = vadd.f32 %v3362_v22, %v6437_v44 }
 0x32d   : > { %3413 = vst [vmem:[#allocation2 + $0xe0] sm:$0xff] %v3288_v40  ;;  %3415 = vst [vmem:[#allocation2 + $0xf0] sm:$0xff] %v3361_v19 }
 0x32e   : > { %3414 = vst [vmem:[#allocation2 + $0xe8] sm:$0xff] %v3290_v20  ;;  %3416 = vst [vmem:[#allocation2 + $0xf8] sm:$0xff] %v3363_v23 }
 0x330   : > { %v3293_v25 = vpop.f32.mrb[24].mxu0  ;;  %v3366_v26 = vpop.f32.mrb[24].mxu1 }
 0x331   : > { %v3294_v28 = vadd.f32 %v3293_v25, %v6428_v7  ;;  %v3295_v27 = vpop.f32.mrb[25].mxu0  ;;  %v3367_v30 = vadd.f32 %v3366_v26, %v6431_v24  ;;  %v3368_v32 = vpop.f32.mrb[25].mxu1 }
 0x332   : > { %v3296_v31 = vadd.f32 %v3295_v27, %v6434_v60  ;;  %v3297_v33 = vpop.f32.mrb[26].mxu0  ;;  %v3369_v35 = vadd.f32 %v3368_v32, %v6437_v44  ;;  %v3370_v36 = vpop.f32.mrb[26].mxu1 }
 0x333   : > { %3421 = vst [vmem:[#allocation2 + $0x120] sm:$0xff] %v3294_v28  ;;  %v3298_v34 = vadd.f32 %v3297_v33, %v6428_v7  ;;  %v3299_v37 = vpop.f32.mrb[27].mxu0  ;;  %3423 = vst [vmem:[#allocation2 + $0x130] sm:$0xff] %v3367_v30  ;;  %v3371_v38 = vadd.f32 %v3370_v36, %v6431_v24  ;;  %v3372_v43 = vpop.f32.mrb[27].mxu1 }
 0x334   : > { %3422 = vst [vmem:[#allocation2 + $0x128] sm:$0xff] %v3296_v31  ;;  %v3300_v18 = vadd.f32 %v3299_v37, %v6434_v60  ;;  %3424 = vst [vmem:[#allocation2 + $0x138] sm:$0xff] %v3369_v35  ;;  %v3373_v56 = vadd.f32 %v3372_v43, %v6437_v44 }
 0x335   : > { %3429 = vst [vmem:[#allocation2 + $0x160] sm:$0xff] %v3298_v34  ;;  %3431 = vst [vmem:[#allocation2 + $0x170] sm:$0xff] %v3371_v38 }
 0x336   : > { %3430 = vst [vmem:[#allocation2 + $0x168] sm:$0xff] %v3300_v18  ;;  %3432 = vst [vmem:[#allocation2 + $0x178] sm:$0xff] %v3373_v56 }
 0x338   : > { %v3303_v41 = vpop.f32.mrb[28].mxu0  ;;  %v3376_v46 = vpop.f32.mrb[28].mxu1 }
 0x339   : > { %v3304_v4 = vadd.f32 %v3303_v41, %v6428_v7  ;;  %v3305_v45 = vpop.f32.mrb[29].mxu0  ;;  %v3377_v47 = vadd.f32 %v3376_v46, %v6431_v24  ;;  %v3378_v49 = vpop.f32.mrb[29].mxu1 }
 0x33a   : > { %v3306_v48 = vadd.f32 %v3305_v45, %v6434_v60  ;;  %v3307_v53 = vpop.f32.mrb[30].mxu0  ;;  %v3379_v21 = vadd.f32 %v3378_v49, %v6437_v44  ;;  %v3380_v50 = vpop.f32.mrb[30].mxu1 }
 0x33b   : > { %3437 = vst [vmem:[#allocation2 + $0x1a0] sm:$0xff] %v3304_v4  ;;  %v3308_v42 = vadd.f32 %v3307_v53, %v6428_v7  ;;  %v3309_v63 = vpop.f32.mrb[31].mxu0  ;;  %3439 = vst [vmem:[#allocation2 + $0x1b0] sm:$0xff] %v3377_v47  ;;  %v3381_v54 = vadd.f32 %v3380_v50, %v6431_v24  ;;  %v3382_v57 = vpop.f32.mrb[31].mxu1 }
 0x33c   : > { %3438 = vst [vmem:[#allocation2 + $0x1a8] sm:$0xff] %v3306_v48  ;;  %v3310_v55 = vadd.f32 %v3309_v63, %v6434_v60  ;;  %3440 = vst [vmem:[#allocation2 + $0x1b8] sm:$0xff] %v3379_v21  ;;  %v3383_v58 = vadd.f32 %v3382_v57, %v6437_v44 }
 0x33d   : > { %3445 = vst [vmem:[#allocation2 + $0x1e0] sm:$0xff] %v3308_v42  ;;  %3447 = vst [vmem:[#allocation2 + $0x1f0] sm:$0xff] %v3381_v54 }
 0x33e   : > { %3446 = vst [vmem:[#allocation2 + $0x1e8] sm:$0xff] %v3310_v55  ;;  %3448 = vst [vmem:[#allocation2 + $0x1f8] sm:$0xff] %v3383_v58 }
 0x33f PF: > { %v6471_v59 = vmov 0.0   ;;  %v6473_v7 = vmov 0.0   ;;  %v6475_v29 = vmov 0.0   ;;  %v6477_v61 = vmov 0.0   ;;  %s6479_s16 = smov 0  }
 0x340 LB: >> { %v3475_v24 = vld [vmem:[%s5763_s12] sm:$0xff]  ;;  %v3476_v44 = vld [vmem:[%s5763_s12 + $0x8] sm:$0xff]  ;;  %v6506_v11 = vpack.c.bf16 %v5690_v29, %v5690_v29  ;;  %s5178_s19 = sshll.u32 %s5698_s16, 3  ;;  %s3454_s16 = sadd.s32 1, %s5698_s16   ;;  %s5698_s16 = sphi %s6479_s16, %s3454_s16   ;;  %v5694_v61 = vphi %v6477_v61, %v6766_v61   ;;  %v5690_v29 = vphi %v6475_v29, %v6765_v29   ;;  %v5686_v7 = vphi %v6473_v7, %v4457_v7   ;;  %v5682_v59 = vphi %v6471_v59, %v4458_v59  }
 0x341   : >> { %v3479_v60 = vld [vmem:[%s5763_s12 + $0x20] sm:$0xff]  ;;  %v3480_v51 = vld [vmem:[%s5763_s12 + $0x28] sm:$0xff]  ;;  %s6637_s29 = sshra.s32 %s5178_s19, 3  ;;  %p3451_p6 = scmp.ge.s32.totalorder %s3454_s16, 8  }
 0x342   : >> { %v5182_v62 = vcombine.high %v3475_v24, %v3479_v60  ;;  %v5181_v0 = vcombine.low %v3475_v24, %v3479_v60  ;;  %v3483_v3 = vld [vmem:[%s5763_s12 + $0x40] sm:$0xff]  ;;  %v5184_v39 = vcombine.high %v3476_v44, %v3480_v51  ;;  %v5183_v6 = vcombine.low %v3476_v44, %v3480_v51  ;;  %v3484_v15 = vld [vmem:[%s5763_s12 + $0x48] sm:$0xff]  ;;  %4275 = vmatprep.mubr.bf16.mxu0 %v6506_v11  ;;  %s5347_s30 = sshll.u32 %s6637_s29, 6  ;;  %s5348_s10 = sshll.u32 %s6637_s29, 4 }
 0x343   : >> { %v3487_v5 = vld [vmem:[%s5763_s12 + $0x60] sm:$0xff]  ;;  %v3488_v2 = vld [vmem:[%s5763_s12 + $0x68] sm:$0xff]  ;;  %4316 = vmatprep.mubr.bf16.mxu1 %v6506_v11  ;;  %s6640_s9 = scalar_lea.vmem [#allocation2], %s5347_s30  ;;  %s4465_s11 = scalar_lea.vmem [#allocation3], %s5348_s10 }
 0x344   : >> { %v5190_v16 = vcombine.high %v3483_v3, %v3487_v5  ;;  %v3491_v52 = vld [vmem:[%s5763_s12 + $0x80] sm:$0xff]  ;;  %4243 = vmatprep.subr.bf16.mxu0 %v5182_v62  ;;  %v5192_v10 = vcombine.high %v3484_v15, %v3488_v2  ;;  %v3492_v8 = vld [vmem:[%s5763_s12 + $0x88] sm:$0xff]  ;;  %4284 = vmatprep.subr.bf16.mxu1 %v5184_v39  ;;  %v5189_v12 = vcombine.low %v3483_v3, %v3487_v5  ;;  %p5317_p7 = scmp.ne.s32.totalorder (%p3451_p6), %s5754_s28, 2 }
 0x345   : >> { %v3495_v1 = vld [vmem:[%s5763_s12 + $0xa0] sm:$0xff]  ;;  %v3496_v9 = vld [vmem:[%s5763_s12 + $0xa8] sm:$0xff]  ;;  %4244 = vmatpush1.bf16.msra.mxu0 %v5181_v0  ;;  %4285 = vmatpush1.bf16.msra.mxu1 %v5183_v6  ;;  %v5191_v13 = vcombine.low %v3484_v15, %v3488_v2 }
 0x346   : >> { %4245 = vmatprep.subr.bf16.mxu0 %v5190_v16  ;;  %v5198_v40 = vcombine.high %v3491_v52, %v3495_v1  ;;  %4286 = vmatprep.subr.bf16.mxu1 %v5192_v10  ;;  %v5200_v14 = vcombine.high %v3492_v8, %v3496_v9  ;;  %v3499_v17 = vld [vmem:[%s5763_s12 + $0xc0] sm:$0xff]  ;;  %v3500_v20 = vld [vmem:[%s5763_s12 + $0xc8] sm:$0xff]  ;;  %v5197_v23 = vcombine.low %v3491_v52, %v3495_v1 }
 0x347   : >> { %v3503_v19 = vld [vmem:[%s5763_s12 + $0xe0] sm:$0xff]  ;;  %v3504_v22 = vld [vmem:[%s5763_s12 + $0xe8] sm:$0xff]  ;;  %v5199_v25 = vcombine.low %v3492_v8, %v3496_v9 }
 0x348   : >> { %v5206_v28 = vcombine.high %v3499_v17, %v3503_v19  ;;  %v5208_v26 = vcombine.high %v3500_v20, %v3504_v22  ;;  %v3507_v27 = vld [vmem:[%s5763_s12 + $0x100] sm:$0xff]  ;;  %v3508_v31 = vld [vmem:[%s5763_s12 + $0x108] sm:$0xff]  ;;  %v5205_v33 = vcombine.low %v3499_v17, %v3503_v19  ;;  %v5207_v35 = vcombine.low %v3500_v20, %v3504_v22 }
 0x349   : >> { %4246 = vmatpush1.bf16.msra.mxu0 %v5189_v12  ;;  %4287 = vmatpush1.bf16.msra.mxu1 %v5191_v13  ;;  %v3511_v30 = vld [vmem:[%s5763_s12 + $0x120] sm:$0xff]  ;;  %v3512_v32 = vld [vmem:[%s5763_s12 + $0x128] sm:$0xff] }
 0x34a   : >> { %4247 = vmatprep.subr.bf16.mxu0 %v5198_v40  ;;  %4288 = vmatprep.subr.bf16.mxu1 %v5200_v14  ;;  %v5214_v34 = vcombine.high %v3507_v27, %v3511_v30  ;;  %v5216_v36 = vcombine.high %v3508_v31, %v3512_v32  ;;  %v3515_v37 = vld [vmem:[%s5763_s12 + $0x140] sm:$0xff]  ;;  %v3516_v18 = vld [vmem:[%s5763_s12 + $0x148] sm:$0xff]  ;;  %v5213_v56 = vcombine.low %v3507_v27, %v3511_v30 }
 0x34b   : >> { %v3519_v38 = vld [vmem:[%s5763_s12 + $0x160] sm:$0xff]  ;;  %v3520_v43 = vld [vmem:[%s5763_s12 + $0x168] sm:$0xff]  ;;  %v5215_v41 = vcombine.low %v3508_v31, %v3512_v32 }
 0x34c   : >> { %v5222_v4 = vcombine.high %v3515_v37, %v3519_v38  ;;  %v5224_v46 = vcombine.high %v3516_v18, %v3520_v43  ;;  %v3523_v45 = vld [vmem:[%s5763_s12 + $0x180] sm:$0xff]  ;;  %v3524_v48 = vld [vmem:[%s5763_s12 + $0x188] sm:$0xff]  ;;  %v5221_v53 = vcombine.low %v3515_v37, %v3519_v38  ;;  %v5223_v21 = vcombine.low %v3516_v18, %v3520_v43 }
 0x34d   : >> { %4248 = vmatpush1.bf16.msra.mxu0 %v5197_v23  ;;  %4289 = vmatpush1.bf16.msra.mxu1 %v5199_v25  ;;  %v3527_v47 = vld [vmem:[%s5763_s12 + $0x1a0] sm:$0xff]  ;;  %v3528_v49 = vld [vmem:[%s5763_s12 + $0x1a8] sm:$0xff] }
 0x34e   : >> { %4249 = vmatprep.subr.bf16.mxu0 %v5206_v28  ;;  %4290 = vmatprep.subr.bf16.mxu1 %v5208_v26  ;;  %v5230_v42 = vcombine.high %v3523_v45, %v3527_v47  ;;  %v5232_v50 = vcombine.high %v3524_v48, %v3528_v49  ;;  %v3531_v63 = vld [vmem:[%s5763_s12 + $0x1c0] sm:$0xff]  ;;  %v3532_v55 = vld [vmem:[%s5763_s12 + $0x1c8] sm:$0xff]  ;;  %v5229_v58 = vcombine.low %v3523_v45, %v3527_v47 }
 0x34f   : >> { %v3535_v54 = vld [vmem:[%s5763_s12 + $0x1e0] sm:$0xff]  ;;  %v3536_v57 = vld [vmem:[%s5763_s12 + $0x1e8] sm:$0xff]  ;;  %v5231_v29 = vcombine.low %v3524_v48, %v3528_v49 }
 0x350   : >> { %v5238_v24 = vcombine.high %v3531_v63, %v3535_v54  ;;  %v5240_v60 = vcombine.high %v3532_v55, %v3536_v57  ;;  %v3539_v44 = vld [vmem:[%s5763_s12 + $0x200] sm:$0xff]  ;;  %v3540_v51 = vld [vmem:[%s5763_s12 + $0x208] sm:$0xff]  ;;  %v5237_v3 = vcombine.low %v3531_v63, %v3535_v54  ;;  %v5239_v5 = vcombine.low %v3532_v55, %v3536_v57 }
 0x351   : >> { %4250 = vmatpush1.bf16.msra.mxu0 %v5205_v33  ;;  %4291 = vmatpush1.bf16.msra.mxu1 %v5207_v35  ;;  %v3543_v62 = vld [vmem:[%s5763_s12 + $0x220] sm:$0xff]  ;;  %v3544_v0 = vld [vmem:[%s5763_s12 + $0x228] sm:$0xff] }
 0x352   : >> { %4251 = vmatprep.subr.bf16.mxu0 %v5214_v34  ;;  %4292 = vmatprep.subr.bf16.mxu1 %v5216_v36  ;;  %v5246_v39 = vcombine.high %v3539_v44, %v3543_v62  ;;  %v5248_v6 = vcombine.high %v3540_v51, %v3544_v0  ;;  %v3547_v16 = vld [vmem:[%s5763_s12 + $0x240] sm:$0xff]  ;;  %v3548_v2 = vld [vmem:[%s5763_s12 + $0x248] sm:$0xff]  ;;  %v5245_v10 = vcombine.low %v3539_v44, %v3543_v62 }
 0x353   : >> { %v3551_v15 = vld [vmem:[%s5763_s12 + $0x260] sm:$0xff]  ;;  %v3552_v52 = vld [vmem:[%s5763_s12 + $0x268] sm:$0xff]  ;;  %v5247_v1 = vcombine.low %v3540_v51, %v3544_v0 }
 0x354   : >> { %v5254_v8 = vcombine.high %v3547_v16, %v3551_v15  ;;  %v5256_v9 = vcombine.high %v3548_v2, %v3552_v52  ;;  %v3555_v12 = vld [vmem:[%s5763_s12 + $0x280] sm:$0xff]  ;;  %v3556_v40 = vld [vmem:[%s5763_s12 + $0x288] sm:$0xff]  ;;  %v5253_v17 = vcombine.low %v3547_v16, %v3551_v15  ;;  %v5255_v19 = vcombine.low %v3548_v2, %v3552_v52 }
 0x355   : >> { %4252 = vmatpush1.bf16.msra.mxu0 %v5213_v56  ;;  %4293 = vmatpush1.bf16.msra.mxu1 %v5215_v41  ;;  %v3559_v13 = vld [vmem:[%s5763_s12 + $0x2a0] sm:$0xff]  ;;  %v3560_v14 = vld [vmem:[%s5763_s12 + $0x2a8] sm:$0xff] }
 0x356   : >> { %4253 = vmatprep.subr.bf16.mxu0 %v5222_v4  ;;  %4294 = vmatprep.subr.bf16.mxu1 %v5224_v46  ;;  %v5262_v20 = vcombine.high %v3555_v12, %v3559_v13  ;;  %v5264_v22 = vcombine.high %v3556_v40, %v3560_v14  ;;  %v3563_v23 = vld [vmem:[%s5763_s12 + $0x2c0] sm:$0xff]  ;;  %v3564_v28 = vld [vmem:[%s5763_s12 + $0x2c8] sm:$0xff]  ;;  %v5261_v27 = vcombine.low %v3555_v12, %v3559_v13  ;;  %v3490_v12 = vld [vmem:[%s5763_s12 + $0x78] sm:$0xff] }
 0x357   : >> { %v3567_v25 = vld [vmem:[%s5763_s12 + $0x2e0] sm:$0xff]  ;;  %v3568_v26 = vld [vmem:[%s5763_s12 + $0x2e8] sm:$0xff]  ;;  %v5263_v30 = vcombine.low %v3556_v40, %v3560_v14 }
 0x358   : >> { %v5270_v31 = vcombine.high %v3563_v23, %v3567_v25  ;;  %v5272_v32 = vcombine.high %v3564_v28, %v3568_v26  ;;  %v3571_v33 = vld [vmem:[%s5763_s12 + $0x300] sm:$0xff]  ;;  %v3572_v34 = vld [vmem:[%s5763_s12 + $0x308] sm:$0xff]  ;;  %v5269_v37 = vcombine.low %v3563_v23, %v3567_v25  ;;  %v5271_v38 = vcombine.low %v3564_v28, %v3568_v26 }
 0x359   : >> { %4254 = vmatpush1.bf16.msra.mxu0 %v5221_v53  ;;  %4295 = vmatpush1.bf16.msra.mxu1 %v5223_v21  ;;  %v3575_v35 = vld [vmem:[%s5763_s12 + $0x320] sm:$0xff]  ;;  %v3576_v36 = vld [vmem:[%s5763_s12 + $0x328] sm:$0xff] }
 0x35a   : >> { %4255 = vmatprep.subr.bf16.mxu0 %v5230_v42  ;;  %4296 = vmatprep.subr.bf16.mxu1 %v5232_v50  ;;  %v5278_v18 = vcombine.high %v3571_v33, %v3575_v35  ;;  %v5280_v43 = vcombine.high %v3572_v34, %v3576_v36  ;;  %v3579_v56 = vld [vmem:[%s5763_s12 + $0x340] sm:$0xff]  ;;  %v3580_v4 = vld [vmem:[%s5763_s12 + $0x348] sm:$0xff]  ;;  %v5277_v45 = vcombine.low %v3571_v33, %v3575_v35 }
 0x35b   : >> { %v3583_v41 = vld [vmem:[%s5763_s12 + $0x360] sm:$0xff]  ;;  %v3584_v46 = vld [vmem:[%s5763_s12 + $0x368] sm:$0xff]  ;;  %v5279_v47 = vcombine.low %v3572_v34, %v3576_v36 }
 0x35c   : >> { %v5286_v48 = vcombine.high %v3579_v56, %v3583_v41  ;;  %v5288_v49 = vcombine.high %v3580_v4, %v3584_v46  ;;  %v3587_v53 = vld [vmem:[%s5763_s12 + $0x380] sm:$0xff]  ;;  %v3588_v42 = vld [vmem:[%s5763_s12 + $0x388] sm:$0xff]  ;;  %v5285_v63 = vcombine.low %v3579_v56, %v3583_v41  ;;  %v5287_v54 = vcombine.low %v3580_v4, %v3584_v46  ;;  %v3517_v46 = vld [vmem:[%s5763_s12 + $0x150] sm:$0xff] }
 0x35d   : >> { %4256 = vmatpush1.bf16.msra.mxu0 %v5229_v58  ;;  %4297 = vmatpush1.bf16.msra.mxu1 %v5231_v29  ;;  %v3591_v21 = vld [vmem:[%s5763_s12 + $0x3a0] sm:$0xff]  ;;  %v3592_v50 = vld [vmem:[%s5763_s12 + $0x3a8] sm:$0xff] }
 0x35e   : >> { %4257 = vmatprep.subr.bf16.mxu0 %v5238_v24  ;;  %4298 = vmatprep.subr.bf16.mxu1 %v5240_v60  ;;  %v5294_v55 = vcombine.high %v3587_v53, %v3591_v21  ;;  %v5296_v57 = vcombine.high %v3588_v42, %v3592_v50  ;;  %v3595_v58 = vld [vmem:[%s5763_s12 + $0x3c0] sm:$0xff]  ;;  %v3596_v24 = vld [vmem:[%s5763_s12 + $0x3c8] sm:$0xff]  ;;  %v5293_v44 = vcombine.low %v3587_v53, %v3591_v21 }
 0x35f   : >> { %v3599_v29 = vld [vmem:[%s5763_s12 + $0x3e0] sm:$0xff]  ;;  %v3600_v60 = vld [vmem:[%s5763_s12 + $0x3e8] sm:$0xff]  ;;  %v5295_v62 = vcombine.low %v3588_v42, %v3592_v50  ;;  %v3525_v50 = vld [vmem:[%s5763_s12 + $0x190] sm:$0xff] }
 0x360   : >> { %v5302_v51 = vcombine.high %v3595_v58, %v3599_v29  ;;  %v5304_v0 = vcombine.high %v3596_v24, %v3600_v60  ;;  %v5301_v16 = vcombine.low %v3595_v58, %v3599_v29  ;;  %v5303_v15 = vcombine.low %v3596_v24, %v3600_v60  ;;  %v3533_v60 = vld [vmem:[%s5763_s12 + $0x1d0] sm:$0xff] }
 0x361   : >> { %4258 = vmatpush1.bf16.msra.mxu0 %v5237_v3  ;;  %4299 = vmatpush1.bf16.msra.mxu1 %v5239_v5  ;;  %v3477_v3 = vld [vmem:[%s5763_s12 + $0x10] sm:$0xff] }
 0x362   : >> { %4259 = vmatprep.subr.bf16.mxu0 %v5246_v39  ;;  %4300 = vmatprep.subr.bf16.mxu1 %v5248_v6  ;;  %v3481_v5 = vld [vmem:[%s5763_s12 + $0x30] sm:$0xff]  ;;  %v3478_v39 = vld [vmem:[%s5763_s12 + $0x18] sm:$0xff] }
 0x363   : >> { %v3482_v6 = vld [vmem:[%s5763_s12 + $0x38] sm:$0xff]  ;;  %v5186_v2 = vcombine.high %v3477_v3, %v3481_v5  ;;  %v5185_v13 = vcombine.low %v3477_v3, %v3481_v5 }
 0x364   : >> { %v5188_v52 = vcombine.high %v3478_v39, %v3482_v6  ;;  %v5187_v40 = vcombine.low %v3478_v39, %v3482_v6  ;;  %v3541_v6 = vld [vmem:[%s5763_s12 + $0x210] sm:$0xff] }
 0x365   : >> { %4260 = vmatpush1.bf16.msra.mxu0 %v5245_v10  ;;  %4301 = vmatpush1.bf16.msra.mxu1 %v5247_v1  ;;  %v3485_v10 = vld [vmem:[%s5763_s12 + $0x50] sm:$0xff] }
 0x366   : >> { %4261 = vmatprep.subr.bf16.mxu0 %v5254_v8  ;;  %4302 = vmatprep.subr.bf16.mxu1 %v5256_v9  ;;  %v3489_v1 = vld [vmem:[%s5763_s12 + $0x70] sm:$0xff]  ;;  %v6570_v8 = vpack.c.bf16 %v5694_v61, %v5694_v61  ;;  %v3486_v9 = vld [vmem:[%s5763_s12 + $0x58] sm:$0xff] }
 0x367   : >> { %v5194_v14 = vcombine.high %v3485_v10, %v3489_v1  ;;  %v3494_v61 = vld [vmem:[%s5763_s12 + $0x98] sm:$0xff]  ;;  %v5193_v23 = vcombine.low %v3485_v10, %v3489_v1  ;;  %v5195_v25 = vcombine.low %v3486_v9, %v3490_v12 }
 0x369   : >> { %4262 = vmatpush1.bf16.msra.mxu0 %v5253_v17  ;;  %4303 = vmatpush1.bf16.msra.mxu1 %v5255_v19  ;;  %v5196_v17 = vcombine.high %v3486_v9, %v3490_v12  ;;  %v3493_v19 = vld [vmem:[%s5763_s12 + $0x90] sm:$0xff] }
 0x36a   : >> { %4263 = vmatprep.subr.bf16.mxu0 %v5262_v20  ;;  %4304 = vmatprep.subr.bf16.mxu1 %v5264_v22  ;;  %v3497_v20 = vld [vmem:[%s5763_s12 + $0xb0] sm:$0xff]  ;;  %v3498_v22 = vld [vmem:[%s5763_s12 + $0xb8] sm:$0xff] }
 0x36b   : >> { %v5202_v28 = vcombine.high %v3493_v19, %v3497_v20  ;;  %v5204_v26 = vcombine.high %v3494_v61, %v3498_v22  ;;  %v5201_v33 = vcombine.low %v3493_v19, %v3497_v20  ;;  %v5203_v35 = vcombine.low %v3494_v61, %v3498_v22  ;;  %v3549_v12 = vld [vmem:[%s5763_s12 + $0x250] sm:$0xff] }
 0x36c   : >> { %v3557_v22 = vld [vmem:[%s5763_s12 + $0x290] sm:$0xff] }
 0x36d   : >> { %4264 = vmatpush1.bf16.msra.mxu0 %v5261_v27  ;;  %4305 = vmatpush1.bf16.msra.mxu1 %v5263_v30  ;;  %v3501_v27 = vld [vmem:[%s5763_s12 + $0xd0] sm:$0xff] }
 0x36e   : >> { %4265 = vmatprep.subr.bf16.mxu0 %v5270_v31  ;;  %4306 = vmatprep.subr.bf16.mxu1 %v5272_v32  ;;  %v3505_v30 = vld [vmem:[%s5763_s12 + $0xf0] sm:$0xff]  ;;  %v3502_v31 = vld [vmem:[%s5763_s12 + $0xd8] sm:$0xff] }
 0x36f   : >> { %v3506_v32 = vld [vmem:[%s5763_s12 + $0xf8] sm:$0xff]  ;;  %v5210_v34 = vcombine.high %v3501_v27, %v3505_v30  ;;  %v5209_v56 = vcombine.low %v3501_v27, %v3505_v30 }
 0x370   : >> { %v5212_v36 = vcombine.high %v3502_v31, %v3506_v32 }
 0x371   : >> { %4266 = vmatpush1.bf16.msra.mxu0 %v5269_v37  ;;  %4307 = vmatpush1.bf16.msra.mxu1 %v5271_v38  ;;  %v3509_v37 = vld [vmem:[%s5763_s12 + $0x110] sm:$0xff] }
 0x372   : >> { %4267 = vmatprep.subr.bf16.mxu0 %v5278_v18  ;;  %4308 = vmatprep.subr.bf16.mxu1 %v5280_v43  ;;  %v3513_v38 = vld [vmem:[%s5763_s12 + $0x130] sm:$0xff]  ;;  %v3510_v18 = vld [vmem:[%s5763_s12 + $0x118] sm:$0xff] }
 0x373   : >> { %v3514_v43 = vld [vmem:[%s5763_s12 + $0x138] sm:$0xff]  ;;  %v5218_v41 = vcombine.high %v3509_v37, %v3513_v38 }
 0x374   : >> { %v5220_v4 = vcombine.high %v3510_v18, %v3514_v43  ;;  %v5219_v53 = vcombine.low %v3510_v18, %v3514_v43  ;;  %v3573_v43 = vld [vmem:[%s5763_s12 + $0x310] sm:$0xff] }
 0x375   : >> { %4268 = vmatpush1.bf16.msra.mxu0 %v5277_v45  ;;  %4309 = vmatpush1.bf16.msra.mxu1 %v5279_v47  ;;  %v3521_v45 = vld [vmem:[%s5763_s12 + $0x170] sm:$0xff]  ;;  %v3518_v47 = vld [vmem:[%s5763_s12 + $0x158] sm:$0xff] }
 0x376   : >> { %4269 = vmatprep.subr.bf16.mxu0 %v5286_v48  ;;  %4310 = vmatprep.subr.bf16.mxu1 %v5288_v49  ;;  %v3522_v48 = vld [vmem:[%s5763_s12 + $0x178] sm:$0xff]  ;;  %v5217_v49 = vcombine.low %v3509_v37, %v3513_v38  ;;  %v5226_v21 = vcombine.high %v3517_v46, %v3521_v45 }
 0x377   : >> { %v5228_v42 = vcombine.high %v3518_v47, %v3522_v48  ;;  %v5227_v58 = vcombine.low %v3518_v47, %v3522_v48  ;;  %v3581_v48 = vld [vmem:[%s5763_s12 + $0x350] sm:$0xff] }
 0x379   : >> { %4270 = vmatpush1.bf16.msra.mxu0 %v5285_v63  ;;  %4311 = vmatpush1.bf16.msra.mxu1 %v5287_v54  ;;  %v3529_v63 = vld [vmem:[%s5763_s12 + $0x1b0] sm:$0xff]  ;;  %v3526_v54 = vld [vmem:[%s5763_s12 + $0x198] sm:$0xff] }
 0x37a   : >> { %4271 = vmatprep.subr.bf16.mxu0 %v5294_v55  ;;  %4312 = vmatprep.subr.bf16.mxu1 %v5296_v57  ;;  %v3530_v55 = vld [vmem:[%s5763_s12 + $0x1b8] sm:$0xff]  ;;  %v5225_v57 = vcombine.low %v3517_v46, %v3521_v45  ;;  %v5234_v29 = vcombine.high %v3525_v50, %v3529_v63 }
 0x37b   : >> { %v5236_v24 = vcombine.high %v3526_v54, %v3530_v55  ;;  %v5235_v3 = vcombine.low %v3526_v54, %v3530_v55  ;;  %v3589_v55 = vld [vmem:[%s5763_s12 + $0x390] sm:$0xff] }
 0x37d   : >> { %4272 = vmatpush1.bf16.msra.mxu0 %v5293_v44  ;;  %4313 = vmatpush1.bf16.msra.mxu1 %v5295_v62  ;;  %v3537_v44 = vld [vmem:[%s5763_s12 + $0x1f0] sm:$0xff]  ;;  %v3534_v62 = vld [vmem:[%s5763_s12 + $0x1d8] sm:$0xff] }
 0x37e   : >> { %4273 = vmatprep.subr.bf16.mxu0 %v5302_v51  ;;  %4314 = vmatprep.subr.bf16.mxu1 %v5304_v0  ;;  %v3538_v51 = vld [vmem:[%s5763_s12 + $0x1f8] sm:$0xff]  ;;  %v5233_v0 = vcombine.low %v3525_v50, %v3529_v63  ;;  %v5242_v5 = vcombine.high %v3533_v60, %v3537_v44 }
 0x37f   : >> { %v5244_v39 = vcombine.high %v3534_v62, %v3538_v51  ;;  %v5243_v10 = vcombine.low %v3534_v62, %v3538_v51  ;;  %v3597_v51 = vld [vmem:[%s5763_s12 + $0x3d0] sm:$0xff] }
 0x381   : >> { %4274 = vmatpush1.bf16.msra.mxu0 %v5301_v16  ;;  %4315 = vmatpush1.bf16.msra.mxu1 %v5303_v15  ;;  %v3545_v16 = vld [vmem:[%s5763_s12 + $0x230] sm:$0xff]  ;;  %v3542_v15 = vld [vmem:[%s5763_s12 + $0x218] sm:$0xff] }
 0x382   : >> { %4325 = vmatprep.subr.bf16.mxu0 %v5186_v2  ;;  %4366 = vmatprep.subr.bf16.mxu1 %v5188_v52  ;;  %v3546_v2 = vld [vmem:[%s5763_s12 + $0x238] sm:$0xff]  ;;  %v5241_v52 = vcombine.low %v3533_v60, %v3537_v44  ;;  %v5250_v1 = vcombine.high %v3541_v6, %v3545_v16 }
 0x383   : >> { %v5252_v9 = vcombine.high %v3542_v15, %v3546_v2  ;;  %v5251_v19 = vcombine.low %v3542_v15, %v3546_v2 }
 0x384   : >> { %4276 = vmatmul.mubr.bf16.vlgmr.msra.gmra.mrb[0].mxu0 %v6570_v8  ;;  %4317 = vmatmul.mubr.bf16.vlgmr.msra.gmra.mrb[0].mxu1 %v6570_v8 }
 0x385   : >> { %4326 = vmatpush1.bf16.msra.mxu0 %v5185_v13  ;;  %4367 = vmatpush1.bf16.msra.mxu1 %v5187_v40  ;;  %v3553_v13 = vld [vmem:[%s5763_s12 + $0x270] sm:$0xff]  ;;  %v3550_v40 = vld [vmem:[%s5763_s12 + $0x258] sm:$0xff] }
 0x386   : >> { %4327 = vmatprep.subr.bf16.mxu0 %v5194_v14  ;;  %4368 = vmatprep.subr.bf16.mxu1 %v5196_v17  ;;  %v3554_v14 = vld [vmem:[%s5763_s12 + $0x278] sm:$0xff]  ;;  %v5249_v17 = vcombine.low %v3541_v6, %v3545_v16  ;;  %v5258_v20 = vcombine.high %v3549_v12, %v3553_v13 }
 0x387   : >> { %4357 = vmatprep.mubr.bf16.mxu0 %v6506_v11  ;;  %4398 = vmatprep.mubr.bf16.mxu1 %v6506_v11  ;;  %v5211_v11 = vcombine.low %v3502_v31, %v3506_v32  ;;  %v5260_v61 = vcombine.high %v3550_v40, %v3554_v14  ;;  %v5259_v27 = vcombine.low %v3550_v40, %v3554_v14  ;;  %v3565_v32 = vld [vmem:[%s5763_s12 + $0x2d0] sm:$0xff] }
 0x389   : >> { %4328 = vmatpush1.bf16.msra.mxu0 %v5193_v23  ;;  %4369 = vmatpush1.bf16.msra.mxu1 %v5195_v25  ;;  %v3561_v23 = vld [vmem:[%s5763_s12 + $0x2b0] sm:$0xff]  ;;  %v3558_v25 = vld [vmem:[%s5763_s12 + $0x298] sm:$0xff] }
 0x38a   : >> { %4329 = vmatprep.subr.bf16.mxu0 %v5202_v28  ;;  %4370 = vmatprep.subr.bf16.mxu1 %v5204_v26  ;;  %v3562_v28 = vld [vmem:[%s5763_s12 + $0x2b8] sm:$0xff]  ;;  %v5257_v26 = vcombine.low %v3549_v12, %v3553_v13  ;;  %v5266_v30 = vcombine.high %v3557_v22, %v3561_v23 }
 0x38b   : >> { %v5268_v31 = vcombine.high %v3558_v25, %v3562_v28  ;;  %v5267_v37 = vcombine.low %v3558_v25, %v3562_v28 }
 0x38d   : >> { %4330 = vmatpush1.bf16.msra.mxu0 %v5201_v33  ;;  %4371 = vmatpush1.bf16.msra.mxu1 %v5203_v35  ;;  %v3569_v33 = vld [vmem:[%s5763_s12 + $0x2f0] sm:$0xff]  ;;  %v3566_v35 = vld [vmem:[%s5763_s12 + $0x2d8] sm:$0xff] }
 0x38e   : >> { %4331 = vmatprep.subr.bf16.mxu0 %v5210_v34  ;;  %4372 = vmatprep.subr.bf16.mxu1 %v5212_v36  ;;  %v3570_v34 = vld [vmem:[%s5763_s12 + $0x2f8] sm:$0xff]  ;;  %v5265_v36 = vcombine.low %v3557_v22, %v3561_v23  ;;  %v5274_v38 = vcombine.high %v3565_v32, %v3569_v33 }
 0x38f   : >> { %v5276_v18 = vcombine.high %v3566_v35, %v3570_v34  ;;  %v5275_v46 = vcombine.low %v3566_v35, %v3570_v34  ;;  %v3468_v22 = vld [vmem:[%s6640_s9 + $0x18] sm:$0xff] }
 0x391   : >> { %4332 = vmatpush1.bf16.msra.mxu0 %v5209_v56  ;;  %4373 = vmatpush1.bf16.msra.mxu1 %v5211_v11  ;;  %v3577_v56 = vld [vmem:[%s5763_s12 + $0x330] sm:$0xff]  ;;  %v3574_v11 = vld [vmem:[%s5763_s12 + $0x318] sm:$0xff] }
 0x392   : >> { %4333 = vmatprep.subr.bf16.mxu0 %v5218_v41  ;;  %4374 = vmatprep.subr.bf16.mxu1 %v5220_v4  ;;  %v3578_v41 = vld [vmem:[%s5763_s12 + $0x338] sm:$0xff]  ;;  %v5273_v4 = vcombine.low %v3565_v32, %v3569_v33  ;;  %v5282_v45 = vcombine.high %v3573_v43, %v3577_v56 }
 0x393   : >> { %v5284_v47 = vcombine.high %v3574_v11, %v3578_v41  ;;  %v5283_v50 = vcombine.low %v3574_v11, %v3578_v41  ;;  %v3470_v11 = vld [vmem:[%s6640_s9 + $0x28] sm:$0xff] }
 0x395   : >> { %4334 = vmatpush1.bf16.msra.mxu0 %v5217_v49  ;;  %4375 = vmatpush1.bf16.msra.mxu1 %v5219_v53  ;;  %v3585_v49 = vld [vmem:[%s5763_s12 + $0x370] sm:$0xff]  ;;  %v3582_v53 = vld [vmem:[%s5763_s12 + $0x358] sm:$0xff] }
 0x396   : >> { %4335 = vmatprep.subr.bf16.mxu0 %v5226_v21  ;;  %4376 = vmatprep.subr.bf16.mxu1 %v5228_v42  ;;  %v3586_v21 = vld [vmem:[%s5763_s12 + $0x378] sm:$0xff]  ;;  %v5281_v42 = vcombine.low %v3573_v43, %v3577_v56  ;;  %v5290_v63 = vcombine.high %v3581_v48, %v3585_v49  ;;  %v3469_v43 = vld [vmem:[%s6640_s9 + $0x20] sm:$0xff]  ;;  %v3471_v56 = vld [vmem:[%s6640_s9 + $0x30] sm:$0xff] }
 0x397   : >> { %v5292_v54 = vcombine.high %v3582_v53, %v3586_v21  ;;  %v5291_v60 = vcombine.low %v3582_v53, %v3586_v21 }
 0x399   : >> { %4336 = vmatpush1.bf16.msra.mxu0 %v5225_v57  ;;  %4377 = vmatpush1.bf16.msra.mxu1 %v5227_v58  ;;  %v3593_v57 = vld [vmem:[%s5763_s12 + $0x3b0] sm:$0xff]  ;;  %v3590_v58 = vld [vmem:[%s5763_s12 + $0x398] sm:$0xff] }
 0x39a   : >> { %4337 = vmatprep.subr.bf16.mxu0 %v5234_v29  ;;  %4378 = vmatprep.subr.bf16.mxu1 %v5236_v24  ;;  %v3594_v29 = vld [vmem:[%s5763_s12 + $0x3b8] sm:$0xff]  ;;  %v5289_v24 = vcombine.low %v3581_v48, %v3585_v49  ;;  %v5298_v44 = vcombine.high %v3589_v55, %v3593_v57 }
 0x39b   : >> { %v5300_v62 = vcombine.high %v3590_v58, %v3594_v29  ;;  %v5299_v6 = vcombine.low %v3590_v58, %v3594_v29 }
 0x39d   : >> { %4338 = vmatpush1.bf16.msra.mxu0 %v5233_v0  ;;  %4379 = vmatpush1.bf16.msra.mxu1 %v5235_v3  ;;  %v3601_v0 = vld [vmem:[%s5763_s12 + $0x3f0] sm:$0xff]  ;;  %v3598_v3 = vld [vmem:[%s5763_s12 + $0x3d8] sm:$0xff] }
 0x39e   : >> { %4339 = vmatprep.subr.bf16.mxu0 %v5242_v5  ;;  %4380 = vmatprep.subr.bf16.mxu1 %v5244_v39  ;;  %v3602_v5 = vld [vmem:[%s5763_s12 + $0x3f8] sm:$0xff]  ;;  %v5297_v39 = vcombine.low %v3589_v55, %v3593_v57  ;;  %v5306_v16 = vcombine.high %v3597_v51, %v3601_v0  ;;  %v5305_v2 = vcombine.low %v3597_v51, %v3601_v0 }
 0x39f   : >> { %v5308_v15 = vcombine.high %v3598_v3, %v3602_v5 }
 0x3a1   : >> { %4340 = vmatpush1.bf16.msra.mxu0 %v5241_v52  ;;  %4381 = vmatpush1.bf16.msra.mxu1 %v5243_v10  ;;  %v5307_v52 = vcombine.low %v3598_v3, %v3602_v5 }
 0x3a2   : >> { %4341 = vmatprep.subr.bf16.mxu0 %v5250_v1  ;;  %4382 = vmatprep.subr.bf16.mxu1 %v5252_v9 }
 0x3a5   : >> { %4342 = vmatpush1.bf16.msra.mxu0 %v5249_v17  ;;  %4383 = vmatpush1.bf16.msra.mxu1 %v5251_v19  ;;  %v3467_v19 = vld [vmem:[%s6640_s9 + $0x10] sm:$0xff] }
 0x3a6   : >> { %4343 = vmatprep.subr.bf16.mxu0 %v5258_v20  ;;  %4384 = vmatprep.subr.bf16.mxu1 %v5260_v61  ;;  %v3466_v20 = vld [vmem:[%s6640_s9 + $0x8] sm:$0xff] }
 0x3a9   : >> { %4344 = vmatpush1.bf16.msra.mxu0 %v5257_v26  ;;  %4385 = vmatpush1.bf16.msra.mxu1 %v5259_v27 }
 0x3aa   : >> { %4345 = vmatprep.subr.bf16.mxu0 %v5266_v30  ;;  %4386 = vmatprep.subr.bf16.mxu1 %v5268_v31 }
 0x3ad   : >> { %4346 = vmatpush1.bf16.msra.mxu0 %v5265_v36  ;;  %4387 = vmatpush1.bf16.msra.mxu1 %v5267_v37 }
 0x3ae   : >> { %4347 = vmatprep.subr.bf16.mxu0 %v5274_v38  ;;  %4388 = vmatprep.subr.bf16.mxu1 %v5276_v18 }
 0x3b1   : >> { %4348 = vmatpush1.bf16.msra.mxu0 %v5273_v4  ;;  %4389 = vmatpush1.bf16.msra.mxu1 %v5275_v46  ;;  %v3472_v4 = vld [vmem:[%s6640_s9 + $0x38] sm:$0xff] }
 0x3b2   : >> { %4349 = vmatprep.subr.bf16.mxu0 %v5282_v45  ;;  %4390 = vmatprep.subr.bf16.mxu1 %v5284_v47 }
 0x3b5   : >> { %4350 = vmatpush1.bf16.msra.mxu0 %v5281_v42  ;;  %4391 = vmatpush1.bf16.msra.mxu1 %v5283_v50 }
 0x3b6   : >> { %4351 = vmatprep.subr.bf16.mxu0 %v5290_v63  ;;  %4392 = vmatprep.subr.bf16.mxu1 %v5292_v54 }
 0x3b9   : >> { %4352 = vmatpush1.bf16.msra.mxu0 %v5289_v24  ;;  %4393 = vmatpush1.bf16.msra.mxu1 %v5291_v60 }
 0x3ba   : >> { %4353 = vmatprep.subr.bf16.mxu0 %v5298_v44  ;;  %4394 = vmatprep.subr.bf16.mxu1 %v5300_v62 }
 0x3bd   : >> { %4354 = vmatpush1.bf16.msra.mxu0 %v5297_v39  ;;  %4395 = vmatpush1.bf16.msra.mxu1 %v5299_v6 }
 0x3be   : >> { %4355 = vmatprep.subr.bf16.mxu0 %v5306_v16  ;;  %4396 = vmatprep.subr.bf16.mxu1 %v5308_v15 }
 0x3c1   : >> { %4356 = vmatpush1.bf16.msra.mxu0 %v5305_v2  ;;  %4397 = vmatpush1.bf16.msra.mxu1 %v5307_v52 }
 0x3c4   : >> { %4358 = vmatmul.mubr.bf16.vlgmr.msra.gmra.mrb[4].mxu0 %v6570_v8  ;;  %4399 = vmatmul.mubr.bf16.vlgmr.msra.gmra.mrb[4].mxu1 %v6570_v8  ;;  %v3465_v8 = vld [vmem:[%s6640_s9] sm:$0xff] }
 0x457   : >> { %v4277_v10 = vpop.f32.mrb[0].mxu0  ;;  %v4318_v1 = vpop.f32.mrb[0].mxu1 }
 0x458   : >> { %v4279_v9 = vpop.f32.mrb[1].mxu0  ;;  %v4320_v12 = vpop.f32.mrb[1].mxu1  ;;  %v4407_v61 = vadd.f32 %v4277_v10, %v3465_v8  ;;  %v4409_v23 = vadd.f32 %v4318_v1, %v3467_v19 }
 0x459   : >> { %v4281_v13 = vpop.f32.mrb[2].mxu0  ;;  %v4322_v40 = vpop.f32.mrb[2].mxu1  ;;  %v4408_v25 = vadd.f32 %v4279_v9, %v3466_v20  ;;  %v4410_v28 = vadd.f32 %v4320_v12, %v3468_v22 }
 0x45a   : >> { %v4282_v14 = vpop.f32.mrb[3].mxu0  ;;  %v4323_v17 = vpop.f32.mrb[3].mxu1  ;;  %v5309_v26 = vmul.f32 -1.442695, %v4407_v61  ;;  %v5311_v27 = vmul.f32 -1.442695, %v4409_v23 }
 0x45b   : >> { %v5310_v30 = vmul.f32 -1.442695, %v4408_v25  ;;  %v5312_v31 = vmul.f32 -1.442695, %v4410_v28 }
 0x45c   : >> { %5596 = vpow2.f32 %v5309_v26 }
 0x45d   : >> { %5598 = vpow2.f32 %v5311_v27 }
 0x45e   : >> { %5600 = vpow2.f32 %v5310_v30 }
 0x45f   : >> { %5602 = vpow2.f32 %v5312_v31 }
 0x466   : >> { %v5597_v32 = vpop.eup %5596 }
 0x467   : >> { %v5599_v33 = vpop.eup %5598  ;;  %v4421_v36 = vadd.f32 1.0, %v5597_v32 }
 0x468   : >> { %v5601_v35 = vpop.eup %5600  ;;  %v4433_v37 = vadd.f32 1.0, %v5599_v33 }
 0x469   : >> { %v5603_v34 = vpop.eup %5602  ;;  %v4422_v38 = vadd.f32 1.0, %v5601_v35  ;;  %5604 = vrcp.f32 %v4421_v36 }
 0x46a   : >> { %v4434_v18 = vadd.f32 1.0, %v5603_v34  ;;  %5606 = vrcp.f32 %v4433_v37 }
 0x46b   : >> { %5608 = vrcp.f32 %v4422_v38 }
 0x46c   : >> { %5610 = vrcp.f32 %v4434_v18 }
 0x473   : >> { %v5605_v58 = vpop.eup %5604 }
 0x474   : >> { %v5607_v29 = vpop.eup %5606 }
 0x475   : >> { %v5609_v24 = vpop.eup %5608  ;;  %v4453_v51 = vmul.f32 %v5686_v7, %v5607_v29 }
 0x476   : >> { %v5611_v60 = vpop.eup %5610 }
 0x477   : >> { %v4454_v3 = vmul.f32 %v5682_v59, %v5611_v60 }
 0x497   : >> { %v4359_v41 = vpop.f32.mrb[4].mxu0  ;;  %v4400_v45 = vpop.f32.mrb[4].mxu1 }
 0x498   : >> { %v4411_v46 = vadd.f32 %v4359_v41, %v3469_v43  ;;  %v4361_v47 = vpop.f32.mrb[5].mxu0  ;;  %v4413_v48 = vadd.f32 %v4400_v45, %v3471_v56  ;;  %v4402_v53 = vpop.f32.mrb[5].mxu1 }
 0x499   : >> { %v4412_v49 = vadd.f32 %v4361_v47, %v3470_v11  ;;  %v4363_v21 = vpop.f32.mrb[6].mxu0  ;;  %v4414_v42 = vadd.f32 %v4402_v53, %v3472_v4  ;;  %v4404_v50 = vpop.f32.mrb[6].mxu1 }
 0x49a   : >> { %5612 = vtanh.f32 %v4411_v46  ;;  %v4364_v63 = vpop.f32.mrb[7].mxu0  ;;  %v5313_v54 = vmul.f32 -1.442695, %v4413_v48  ;;  %v4405_v55 = vpop.f32.mrb[7].mxu1 }
 0x49b   : >> { %5614 = vtanh.f32 %v4412_v49  ;;  %v5314_v57 = vmul.f32 -1.442695, %v4414_v42 }
 0x49c   : >> { %5616 = vpow2.f32 %v5313_v54 }
 0x49d   : >> { %5618 = vpow2.f32 %v5314_v57 }
 0x4a4   : >> { %v5613_v44 = vpop.eup %5612 }
 0x4a5   : >> { %v5615_v62 = vpop.eup %5614  ;;  %v4455_v0 = vmul.f32 %v5613_v44, %v5605_v58 }
 0x4a6   : >> { %v4456_v5 = vmul.f32 %v5615_v62, %v5609_v24  ;;  %v5617_v39 = vpop.eup %5616 }
 0x4a7   : >> { %v4457_v7 = vadd.f32 %v4455_v0, %v4453_v51   ;;  %v5619_v6 = vpop.eup %5618  ;;  %v4447_v16 = vadd.f32 1.0, %v5617_v39 }
 0x4a8   : >> { %v4458_v59 = vadd.f32 %v4456_v5, %v4454_v3   ;;  %v4448_v15 = vadd.f32 1.0, %v5619_v6 }
 0x4a9   : >> { %5620 = vtanh.f32 %v4457_v7 }
 0x4aa   : >> { %5622 = vrcp.f32 %v4447_v16 }
 0x4ab   : >> { %5624 = vtanh.f32 %v4458_v59 }
 0x4ac   : >> { %5626 = vrcp.f32 %v4448_v15 }
 0x4b3   : >> { %v5621_v2 = vpop.eup %5620  ;;  %3453 = sbr.rel (!%p3451_p6) target bundleno = 832 (0x340), region = 105 }
 0x4b4   : >> { %v5623_v52 = vpop.eup %5622 }
 0x4b5   : >> { %v5625_v10 = vpop.eup %5624  ;;  %v6653_v61 = vmul.f32 %v5623_v52, %v5621_v2  }
 0x4b6   : >> { %v5627_v9 = vpop.eup %5626 }
 0x4b7   : >> { %v6764_v1 = vmov %v6653_v61  ;;  %v4462_v12 = vmul.f32 %v5627_v9, %v5625_v10  }
 0x4b8   : >> { %4466 = vst [vmem:[%s4465_s11] sm:$0xff] %v6764_v1  ;;  %v6766_v61 = vmov %v6764_v1 }
 0x4b9   : >> { %4467 = vst [vmem:[%s4465_s11 + $0x8] sm:$0xff] %v4462_v12  ;;  %v6765_v29 = vmov %v4462_v12 }
 0x4ba   : > { %4471 = sbr.rel (%p5317_p7) target bundleno = 1679 (0x68f), region = 71  ;;  %v5628_v13 = vld [vmem:[%s6759_s4 + $0x40] sm:$0xff] (!%p5317_p7)   ;;  %v4473_v40 = vpack.c.bf16 (!%p5317_p7), %v4462_v12, %v4462_v12  ;;  %v5701_v17 = vmov (!%p5317_p7), 0.0   ;;  %v5630_v8 = vld [vmem:[%s6759_s4 + $0x48] sm:$0xff] (!%p5317_p7)   ;;  %v5632_v7 = vld [vmem:[%s6759_s4 + $0x50] sm:$0xff] (!%p5317_p7)   ;;  %v4472_v36 = vpack.c.bf16 (!%p5317_p7), %v6764_v1, %v6764_v1  ;;  %vm5702_vm0 = vmmov (!%p5317_p7), 0  }
 0x4bb   : > { %v5629_v14 = vld [vmem:[%s6759_s4] sm:$0xff] (!%p5317_p7)   ;;  %5380 = vmatprep.subr.bf16.mxu1 (!%p5317_p7), %v5701_v17  ;;  %5349 = vmatprep.subr.bf16.mxu0 (!%p5317_p7), %v5628_v13  ;;  %v5631_v59 = vld [vmem:[%s6759_s4 + $0x8] sm:$0xff] (!%p5317_p7)   ;;  %v5633_v19 = vld [vmem:[%s6759_s4 + $0x10] sm:$0xff] (!%p5317_p7)  }
 0x4bc   : > { %4641 = vmatprep.mubr.bf16.mxu0 (!%p5317_p7), %v4473_v40  ;;  %5350 = vmatpush3.bf16.msra.mxu0 (!%p5317_p7), %v5629_v14  ;;  %v5634_v20 = vld [vmem:[%s6759_s4 + $0x58] sm:$0xff] (!%p5317_p7)   ;;  %v5636_v22 = vld [vmem:[%s6759_s4 + $0x60] sm:$0xff] (!%p5317_p7)   ;;  %v5638_v25 = vld [vmem:[%s6759_s4 + $0x68] sm:$0xff] (!%p5317_p7)  }
 0x4bd   : > { %5351 = vmatprep.subr.bf16.mxu0 (!%p5317_p7), %v5630_v8  ;;  %v5635_v61 = vld [vmem:[%s6759_s4 + $0x18] sm:$0xff] (!%p5317_p7)   ;;  %v5637_v23 = vld [vmem:[%s6759_s4 + $0x20] sm:$0xff] (!%p5317_p7)   ;;  %v5645_v26 = vld [vmem:[%s6761_s6 + $0x8] sm:$0xff] (!%p5317_p7)   ;;  %5396 = vmatprep.mubr.msk.bf16.mxu1 (!%p5317_p7), %vm5702_vm0, %v5701_v17 }
 0x4be   : > { %v5644_v28 = vld [vmem:[%s6761_s6] sm:$0xff] (!%p5317_p7)   ;;  %v5639_v27 = vld [vmem:[%s6759_s4 + $0x28] sm:$0xff] (!%p5317_p7)   ;;  %v5640_v30 = vld [vmem:[%s6759_s4 + $0x70] sm:$0xff] (!%p5317_p7)  }
 0x4bf   : > { %5381 = vmatpush3.bf16.msra.mxu1 (!%p5317_p7), %v5644_v28  ;;  %v5646_v31 = vld [vmem:[%s6761_s6 + $0x10] sm:$0xff] (!%p5317_p7)   ;;  %v5642_v33 = vld [vmem:[%s6759_s4 + $0x78] sm:$0xff] (!%p5317_p7)   ;;  %v5648_v37 = vld [vmem:[%s6761_s6 + $0x20] sm:$0xff] (!%p5317_p7)  }
 0x4c0   : > { %5352 = vmatpush3.bf16.msra.mxu0 (!%p5317_p7), %v5631_v59  ;;  %5382 = vmatprep.subr.bf16.mxu1 (!%p5317_p7), %v5701_v17  ;;  %v5641_v32 = vld [vmem:[%s6759_s4 + $0x30] sm:$0xff] (!%p5317_p7)   ;;  %v5647_v35 = vld [vmem:[%s6761_s6 + $0x18] sm:$0xff] (!%p5317_p7)   ;;  %v5649_v38 = vld [vmem:[%s6761_s6 + $0x28] sm:$0xff] (!%p5317_p7)  }
 0x4c1   : > { %5353 = vmatprep.subr.bf16.mxu0 %v5632_v7  ;;  %v5643_v34 = vld [vmem:[%s6759_s4 + $0x38] sm:$0xff]   ;;  %v5650_v18 = vld [vmem:[%s6761_s6 + $0x30] sm:$0xff]   ;;  %v5318_v11 = vld [vmem:[%s6760_s5] ss:$0 sm:$0xff] }
 0x4c2   : > { %v5651_v43 = vld [vmem:[%s6761_s6 + $0x38] sm:$0xff]   ;;  %v5335_v53 = vld [vmem:[%s6762_s7] ss:$0 sm:$0xff] }
 0x4c3   : > { %5383 = vmatpush3.bf16.msra.mxu1 %v5645_v26 }
 0x4c4   : > { %5354 = vmatpush3.bf16.msra.mxu0 %v5633_v19  ;;  %5384 = vmatprep.subr.bf16.mxu1 %v5701_v17 }
 0x4c5   : > { %5355 = vmatprep.subr.bf16.mxu0 %v5634_v20 }
 0x4c7   : > { %5385 = vmatpush3.bf16.msra.mxu1 %v5646_v31 }
 0x4c8   : > { %5356 = vmatpush3.bf16.msra.mxu0 %v5635_v61  ;;  %5386 = vmatprep.subr.bf16.mxu1 %v5701_v17 }
 0x4c9   : > { %5357 = vmatprep.subr.bf16.mxu0 %v5636_v22 }
 0x4cb   : > { %5387 = vmatpush3.bf16.msra.mxu1 %v5647_v35 }
 0x4cc   : > { %5358 = vmatpush3.bf16.msra.mxu0 %v5637_v23  ;;  %5388 = vmatprep.subr.bf16.mxu1 %v5701_v17 }
 0x4cd   : > { %5359 = vmatprep.subr.bf16.mxu0 %v5638_v25 }
 0x4cf   : > { %5389 = vmatpush3.bf16.msra.mxu1 %v5648_v37 }
 0x4d0   : > { %5360 = vmatpush3.bf16.msra.mxu0 %v5639_v27  ;;  %5390 = vmatprep.subr.bf16.mxu1 %v5701_v17 }
 0x4d1   : > { %5361 = vmatprep.subr.bf16.mxu0 %v5640_v30 }
 0x4d3   : > { %5391 = vmatpush3.bf16.msra.mxu1 %v5649_v38 }
 0x4d4   : > { %5362 = vmatpush3.bf16.msra.mxu0 %v5641_v32  ;;  %5392 = vmatprep.subr.bf16.mxu1 %v5701_v17 }
 0x4d5   : > { %5363 = vmatprep.subr.bf16.mxu0 %v5642_v33 }
 0x4d7   : > { %5393 = vmatpush3.bf16.msra.mxu1 %v5650_v18 }
 0x4d8   : > { %5364 = vmatpush3.bf16.msra.mxu0 %v5643_v34  ;;  %5394 = vmatprep.subr.bf16.mxu1 %v5701_v17 }
 0x4db   : > { %4642 = vmatmul.mubr.bf16.vlgmr.msra.gmra.mrb[0].mxu0 %v4472_v36  ;;  %5395 = vmatpush3.bf16.msra.mxu1 %v5651_v43 }
 0x5ae   : > { %v5365_v56 = vpop.f32.mrb[0].mxu0 }
 0x5af   : > { %v5366_v41 = vpop.f32.mrb[1].mxu0 }
 0x5b0   : > { %v5367_v4 = vadd.f32 %v5366_v41, %v5365_v56  ;;  %v5368_v46 = vpop.f32.mrb[2].mxu0 }
 0x5b1   : > { %v5369_v45 = vpop.f32.mrb[3].mxu0 }
 0x5b2   : > { %v4644_v47 = vadd.f32 %v5367_v4, %v5318_v11 }
 0x5b4   : > { %v4649_v48 = vmax.f32 %v4644_v47, 0.0 }
 0x5b6   : > { %v4650_v49 = vpack.c.bf16 %v4649_v48, %v4649_v48 }
 0x5b8   : > { %5397 = vmatmul.mubr.bf16.vlgmr.msra.gmra.mrb[0].mxu1 %v4650_v49 }
 0x68b   : > { %v4756_v21 = vpop.f32.mrb[0].mxu1 }
 0x68c   : > { %v4757_v42 = vadd.f32 %v5335_v53, %v4756_v21  ;;  %v5398_v50 = vpop.f32.mrb[1].mxu1 }
 0x68d   : > { %v4759_v63 = vpop.f32.mrb[2].mxu1 }
 0x68e   : > { %4762 = vst [vmem:[%s6763_s8] sm:$0xff] %v4757_v42  ;;  %v5399_v54 = vpop.f32.mrb[3].mxu1 }
 0x68f PF: > { %s18_s27 = sadd.s32 1, %s5678_s27  }
 0x690   : > { %p15_p8 = scmp.ge.s32.totalorder %s18_s27, 5  }
 0x692   :  { %17 = sbr.rel (!%p15_p8) target bundleno = 1 (0x1), region = 116 }

</bundles_post_ra>
